<compile_context>
chip_gen: v5e
topology: v5e:2x2
jax: 0.10.0
libtpu: 0.0.40
codegen_flags: <defaults>
</compile_context>

<pallas_src>
import math

import jax
import jax.numpy as jnp
import numpy as np
from jax.experimental import pallas as pl
from jax.experimental.pallas import tpu as pltpu

# ---- small, module-consistent config (dim divisible by heads, hidden = dim//4)
B, N, D, HEADS = 2, 16, 256, 8
HD = D // HEADS          # head_dim
FF = D // 4              # feed-forward hidden dim
EPS = 1e-5               # nn.LayerNorm default eps
SCALE = 1.0 / math.sqrt(HD)

# TODO(synk): nn.Dropout(p=0.2) layers are identity in eval mode; stochastic
# training-mode dropout is not implemented in the kernel.


def _erf(x):
    # Abramowitz & Stegun 7.1.26 polynomial erf (|err| < 1.5e-7).
    a1, a2, a3, a4, a5 = 0.254829592, -0.284496736, 1.421413741, -1.453152027, 1.061405429
    p = 0.3275911
    s = jnp.where(x >= 0.0, 1.0, -1.0)
    ax = jnp.abs(x)
    t = 1.0 / (1.0 + p * ax)
    poly = ((((a5 * t + a4) * t + a3) * t + a2) * t + a1) * t
    return s * (1.0 - poly * jnp.exp(-ax * ax))


def _gelu_exact(x):
    # PyTorch nn.GELU() default (erf-based, approximate='none')
    return 0.5 * x * (1.0 + _erf(x * (1.0 / math.sqrt(2.0))))


def _layernorm(x, gamma, beta):
    mu = jnp.mean(x, axis=-1, keepdims=True)
    xc = x - mu
    var = jnp.mean(xc * xc, axis=-1, keepdims=True)
    return xc * jax.lax.rsqrt(var + EPS) * gamma + beta


def encoder_kernel(x_ref, wqkv_ref, bqkv_ref, g1_ref, be1_ref,
                   w1_ref, b1_ref, w2_ref, b2_ref, g2_ref, be2_ref, o_ref):
    bf16 = jnp.bfloat16
    x = x_ref[...]                                       # (B*N, D) f32
    x_bf = x.astype(bf16)

    # --- fused QKV: ONE lane-dense matmul (B*N, D) @ (D, 3D) -> (B*N, 3D)
    #     bf16 operands on the MXU, f32 accumulation, bias add in f32.
    qkv = jnp.dot(x_bf, wqkv_ref[...],
                  preferred_element_type=jnp.float32) + bqkv_ref[...]
    qkv3 = qkv.astype(bf16).reshape(B, N, 3 * D)         # free leading-dim split

    # --- split heads with static lane slices (no placement matmul, no x broadcast)
    def heads_of(col0):                                  # -> (B*HEADS, N, HD) bf16
        hs = [qkv3[:, :, col0 + h * HD: col0 + (h + 1) * HD] for h in range(HEADS)]
        return jnp.stack(hs, axis=1).reshape(B * HEADS, N, HD)

    qh = heads_of(0)          # 1/sqrt(HD) already folded into the Q weights/bias
    kh = heads_of(D)
    vh = heads_of(2 * D)

    # --- head-batched attention, bf16 MXU operands / f32 accumulation
    s = jnp.einsum("bnk,bmk->bnm", qh, kh,
                   preferred_element_type=jnp.float32)   # (B*H, N, N) f32
    s = s - jnp.max(s, axis=-1, keepdims=True)
    p = jnp.exp(s)
    p = p * pl.reciprocal(jnp.sum(p, axis=-1, keepdims=True), approx=True)
    oh = jnp.einsum("bnm,bmk->bnk", p.astype(bf16), vh,
                    preferred_element_type=jnp.float32)  # (B*H, N, HD) f32

    # --- recombine heads into a lane-dense (B*N, D) tile
    oh4 = oh.reshape(B, HEADS, N, HD)                    # free leading-dim split
    attn_out = jnp.concatenate(
        [oh4[:, h] for h in range(HEADS)], axis=-1).reshape(B * N, D)

    # --- residual 1: norm1(attn_out) + attn_out
    x1 = _layernorm(attn_out, g1_ref[...], be1_ref[...]) + attn_out

    # --- feed-forward: Linear(D->FF) -> GELU -> Linear(FF->D), bf16 MXU / f32 acc
    h1 = jnp.dot(x1.astype(bf16), w1_ref[...],
                 preferred_element_type=jnp.float32) + b1_ref[...]
    h1 = _gelu_exact(h1)
    y = jnp.dot(h1.astype(bf16), w2_ref[...],
                preferred_element_type=jnp.float32) + b2_ref[...]

    # --- residual 2: norm2(ff(x1)) + x1
    o_ref[...] = _layernorm(y, g2_ref[...], be2_ref[...]) + x1


def _prep_params(p):
    bf16 = jnp.bfloat16
    # PyTorch Linear weights are (out, in): transpose to (in, out).
    wq = p["wq"].T * SCALE          # fold softmax 1/sqrt(HD) into the Q projection
    bq = p["bq"] * SCALE
    # lane-dense fused QKV weight: columns = [Q(0:256) | K(256:512) | V(512:768)],
    # within each block natural head ordering (head h = cols h*HD:(h+1)*HD).
    w_qkv = jnp.concatenate([wq, p["wk"].T, p["wv"].T], axis=-1).astype(bf16)   # (D, 3D)
    b_qkv = jnp.concatenate([bq, p["bk"], p["bv"]],
                            axis=-1)[None, :].astype(jnp.float32)               # (1, 3D)
    return dict(
        w_qkv=w_qkv, b_qkv=b_qkv,
        g1=p["g1"][None, :], be1=p["be1"][None, :],
        w1=p["w1"].T.astype(bf16), b1=p["b1"][None, :],
        w2=p["w2"].T.astype(bf16), b2=p["b2"][None, :],
        g2=p["g2"][None, :], be2=p["be2"][None, :],
    )


def transformer_encoder_layer(x, params):
    pp = _prep_params(params)
    x2d = x.reshape(B * N, D)       # single-step kernel: 32 MXU rows at once
    args = (x2d, pp["w_qkv"], pp["b_qkv"], pp["g1"], pp["be1"],
            pp["w1"], pp["b1"], pp["w2"], pp["b2"], pp["g2"], pp["be2"])

    flops = (2 * (B * N) * D * (3 * D)              # fused QKV matmul
             + B * HEADS * 2 * (2 * N * N * HD)     # scores + p@v
             + 2 * (2 * (B * N) * D * FF))          # feed-forward (two linears)
    transcendentals = B * HEADS * N * N + B * N * FF + B * HEADS * N + 2 * B * N
    bytes_accessed = (2 * B * N * D * 4             # x in, out (f32)
                      + D * 3 * D * 2 + 3 * D * 4   # bf16 QKV weight + f32 bias
                      + 2 * D * FF * 2              # bf16 FF weights
                      + (FF + D + 4 * D) * 4)       # FF biases + LN params

    # Whole-array VMEM blocks, no grid: one kernel invocation does the whole layer
    # (the problem is overhead/DMA bound; a batch grid only adds serial steps on
    # v5e/v6e, and ~10 MFLOP/batch is too small to amortize a cross-core split on v7x).
    in_specs = [pl.BlockSpec(memory_space=pltpu.MemorySpace.VMEM) for _ in args]
    out = pl.pallas_call(
        encoder_kernel,
        out_shape=jax.ShapeDtypeStruct((B * N, D), jnp.float32),
        in_specs=in_specs,
        out_specs=pl.BlockSpec(memory_space=pltpu.MemorySpace.VMEM),
        cost_estimate=pl.CostEstimate(flops=flops,
                                      transcendentals=transcendentals,
                                      bytes_accessed=bytes_accessed),
    )(*args)
    return out.reshape(B, N, D)


# ------------------------- pure-JAX reference ------------------------------
def ref_forward(x, p):
    bf16 = jnp.bfloat16
    hi = jax.lax.Precision.HIGHEST

    def linear(t, w, b):
        # mirror the kernel's MXU policy for the linears: bf16 operands, f32 acc
        return jnp.dot(t.astype(bf16), w.T.astype(bf16),
                       preferred_element_type=jnp.float32) + b

    def ln(t, g, b):
        mu = t.mean(-1, keepdims=True)
        var = ((t - mu) ** 2).mean(-1, keepdims=True)
        return (t - mu) / jnp.sqrt(var + EPS) * g + b

    q = linear(x, p["wq"], p["bq"]).reshape(B, N, HEADS, HD).transpose(0, 2, 1, 3)
    k = linear(x, p["wk"], p["bk"]).reshape(B, N, HEADS, HD).transpose(0, 2, 1, 3)
    v = linear(x, p["wv"], p["bv"]).reshape(B, N, HEADS, HD).transpose(0, 2, 1, 3)
    attn = jnp.einsum("bhnd,bhmd->bhnm", q, k, precision=hi) / math.sqrt(HD)
    attn = jax.nn.softmax(attn, axis=-1)
    out = jnp.einsum("bhnm,bhmd->bhnd", attn, v,
                     precision=hi).transpose(0, 2, 1, 3).reshape(B, N, D)

    x1 = ln(out, p["g1"], p["be1"]) + out
    h = jax.nn.gelu(linear(x1, p["w1"], p["b1"]), approximate=False)
    y = linear(h, p["w2"], p["b2"])
    return ln(y, p["g2"], p["be2"]) + x1


def init_params(key):
    ks = jax.random.split(key, 8)

    def lin(k, out_f, in_f):
        bound = 1.0 / math.sqrt(in_f)
        kw, kb = jax.random.split(k)
        w = jax.random.uniform(kw, (out_f, in_f), jnp.float32, -bound, bound)
        b = jax.random.uniform(kb, (out_f,), jnp.float32, -bound, bound)
        return w, b

    wq, bq = lin(ks[0], D, D)
    wk, bk = lin(ks[1], D, D)
    wv, bv = lin(ks[2], D, D)
    w1, b1 = lin(ks[3], FF, D)
    w2, b2 = lin(ks[4], D, FF)
    return dict(
        wq=wq, bq=bq, wk=wk, bk=bk, wv=wv, bv=bv,
        w1=w1, b1=b1, w2=w2, b2=b2,
        g1=jnp.ones((D,), jnp.float32), be1=jnp.zeros((D,), jnp.float32),
        g2=jnp.ones((D,), jnp.float32), be2=jnp.zeros((D,), jnp.float32),
    )


if __name__ == "__main__":
    key = jax.random.PRNGKey(0)
    kx, kp = jax.random.split(key)
    x = jax.random.normal(kx, (B, N, D), jnp.float32)
    params = init_params(kp)

    out = jax.jit(transformer_encoder_layer)(x, params)
    out = jax.block_until_ready(out)

    ref = ref_forward(x, params)
    # bf16 MXU operands (incl. attention) + approx reciprocal + poly erf => 3e-2 tol
    np.testing.assert_allclose(np.asarray(out), np.asarray(ref), rtol=3e-2, atol=3e-2)
    print("KERNEL_OK")
</pallas_src>

<mosaic_0001>
module attributes {stable_mosaic.version = 11 : i64} {
  func.func @encoder_kernel(%arg0: memref<32x256xf32, #tpu.memory_space<vmem>>, %arg1: memref<256x768xbf16, #tpu.memory_space<vmem>>, %arg2: memref<1x768xf32, #tpu.memory_space<vmem>>, %arg3: memref<1x256xf32, #tpu.memory_space<vmem>>, %arg4: memref<1x256xf32, #tpu.memory_space<vmem>>, %arg5: memref<256x64xbf16, #tpu.memory_space<vmem>>, %arg6: memref<1x64xf32, #tpu.memory_space<vmem>>, %arg7: memref<64x256xbf16, #tpu.memory_space<vmem>>, %arg8: memref<1x256xf32, #tpu.memory_space<vmem>>, %arg9: memref<1x256xf32, #tpu.memory_space<vmem>>, %arg10: memref<1x256xf32, #tpu.memory_space<vmem>>, %arg11: memref<32x256xf32, #tpu.memory_space<vmem>>) attributes {dimension_semantics = [], scalar_prefetch = 0 : i64, scratch_operands = 0 : i64, tpu.core_type = #tpu.core_type<tc>} {
    %c0 = arith.constant 0 : index
    %c0_0 = arith.constant 0 : index
    %0 = vector.load %arg0[%c0, %c0_0] : memref<32x256xf32, #tpu.memory_space<vmem>>, vector<32x256xf32>
    %1 = arith.truncf %0 : vector<32x256xf32> to vector<32x256xbf16>
    %c0_1 = arith.constant 0 : index
    %c0_2 = arith.constant 0 : index
    %2 = vector.load %arg1[%c0_1, %c0_2] : memref<256x768xbf16, #tpu.memory_space<vmem>>, vector<256x768xbf16>
    %cst = arith.constant dense<0.000000e+00> : vector<32x768xf32>
    %3 = tpu.matmul %1, %2, %cst {dimension_numbers = #tpu.dot_dimension_numbers<[1], [0], [0], [1], [0, 0, 1, 1], [], []>} : vector<32x256xbf16>, vector<256x768xbf16>, vector<32x768xf32> -> vector<32x768xf32>
    %c0_3 = arith.constant 0 : index
    %c0_4 = arith.constant 0 : index
    %4 = vector.load %arg2[%c0_3, %c0_4] : memref<1x768xf32, #tpu.memory_space<vmem>>, vector<1x768xf32>
    %5 = vector.broadcast %4 : vector<1x768xf32> to vector<32x768xf32>
    %6 = arith.addf %3, %5 : vector<32x768xf32>
    %7 = arith.truncf %6 : vector<32x768xf32> to vector<32x768xbf16>
    %8 = vector.shape_cast %7 : vector<32x768xbf16> to vector<2x16x768xbf16>
    %9 = vector.extract_strided_slice %8 {offsets = [0, 0, 0], sizes = [2, 16, 32], strides = [1, 1, 1]} : vector<2x16x768xbf16> to vector<2x16x32xbf16>
    %10 = vector.extract_strided_slice %8 {offsets = [0, 0, 32], sizes = [2, 16, 32], strides = [1, 1, 1]} : vector<2x16x768xbf16> to vector<2x16x32xbf16>
    %11 = vector.extract_strided_slice %8 {offsets = [0, 0, 64], sizes = [2, 16, 32], strides = [1, 1, 1]} : vector<2x16x768xbf16> to vector<2x16x32xbf16>
    %12 = vector.extract_strided_slice %8 {offsets = [0, 0, 96], sizes = [2, 16, 32], strides = [1, 1, 1]} : vector<2x16x768xbf16> to vector<2x16x32xbf16>
    %13 = vector.extract_strided_slice %8 {offsets = [0, 0, 128], sizes = [2, 16, 32], strides = [1, 1, 1]} : vector<2x16x768xbf16> to vector<2x16x32xbf16>
    %14 = vector.extract_strided_slice %8 {offsets = [0, 0, 160], sizes = [2, 16, 32], strides = [1, 1, 1]} : vector<2x16x768xbf16> to vector<2x16x32xbf16>
    %15 = vector.extract_strided_slice %8 {offsets = [0, 0, 192], sizes = [2, 16, 32], strides = [1, 1, 1]} : vector<2x16x768xbf16> to vector<2x16x32xbf16>
    %16 = vector.extract_strided_slice %8 {offsets = [0, 0, 224], sizes = [2, 16, 32], strides = [1, 1, 1]} : vector<2x16x768xbf16> to vector<2x16x32xbf16>
    %17 = vector.shape_cast %9 : vector<2x16x32xbf16> to vector<2x1x16x32xbf16>
    %18 = vector.shape_cast %10 : vector<2x16x32xbf16> to vector<2x1x16x32xbf16>
    %19 = vector.shape_cast %11 : vector<2x16x32xbf16> to vector<2x1x16x32xbf16>
    %20 = vector.shape_cast %12 : vector<2x16x32xbf16> to vector<2x1x16x32xbf16>
    %21 = vector.shape_cast %13 : vector<2x16x32xbf16> to vector<2x1x16x32xbf16>
    %22 = vector.shape_cast %14 : vector<2x16x32xbf16> to vector<2x1x16x32xbf16>
    %23 = vector.shape_cast %15 : vector<2x16x32xbf16> to vector<2x1x16x32xbf16>
    %24 = vector.shape_cast %16 : vector<2x16x32xbf16> to vector<2x1x16x32xbf16>
    %25 = tpu.concatenate %17, %18, %19, %20, %21, %22, %23, %24 in 1 : vector<2x1x16x32xbf16>, vector<2x1x16x32xbf16>, vector<2x1x16x32xbf16>, vector<2x1x16x32xbf16>, vector<2x1x16x32xbf16>, vector<2x1x16x32xbf16>, vector<2x1x16x32xbf16>, vector<2x1x16x32xbf16> -> vector<2x8x16x32xbf16>
    %26 = vector.shape_cast %25 : vector<2x8x16x32xbf16> to vector<16x16x32xbf16>
    %27 = vector.extract_strided_slice %8 {offsets = [0, 0, 256], sizes = [2, 16, 32], strides = [1, 1, 1]} : vector<2x16x768xbf16> to vector<2x16x32xbf16>
    %28 = vector.extract_strided_slice %8 {offsets = [0, 0, 288], sizes = [2, 16, 32], strides = [1, 1, 1]} : vector<2x16x768xbf16> to vector<2x16x32xbf16>
    %29 = vector.extract_strided_slice %8 {offsets = [0, 0, 320], sizes = [2, 16, 32], strides = [1, 1, 1]} : vector<2x16x768xbf16> to vector<2x16x32xbf16>
    %30 = vector.extract_strided_slice %8 {offsets = [0, 0, 352], sizes = [2, 16, 32], strides = [1, 1, 1]} : vector<2x16x768xbf16> to vector<2x16x32xbf16>
    %31 = vector.extract_strided_slice %8 {offsets = [0, 0, 384], sizes = [2, 16, 32], strides = [1, 1, 1]} : vector<2x16x768xbf16> to vector<2x16x32xbf16>
    %32 = vector.extract_strided_slice %8 {offsets = [0, 0, 416], sizes = [2, 16, 32], strides = [1, 1, 1]} : vector<2x16x768xbf16> to vector<2x16x32xbf16>
    %33 = vector.extract_strided_slice %8 {offsets = [0, 0, 448], sizes = [2, 16, 32], strides = [1, 1, 1]} : vector<2x16x768xbf16> to vector<2x16x32xbf16>
    %34 = vector.extract_strided_slice %8 {offsets = [0, 0, 480], sizes = [2, 16, 32], strides = [1, 1, 1]} : vector<2x16x768xbf16> to vector<2x16x32xbf16>
    %35 = vector.shape_cast %27 : vector<2x16x32xbf16> to vector<2x1x16x32xbf16>
    %36 = vector.shape_cast %28 : vector<2x16x32xbf16> to vector<2x1x16x32xbf16>
    %37 = vector.shape_cast %29 : vector<2x16x32xbf16> to vector<2x1x16x32xbf16>
    %38 = vector.shape_cast %30 : vector<2x16x32xbf16> to vector<2x1x16x32xbf16>
    %39 = vector.shape_cast %31 : vector<2x16x32xbf16> to vector<2x1x16x32xbf16>
    %40 = vector.shape_cast %32 : vector<2x16x32xbf16> to vector<2x1x16x32xbf16>
    %41 = vector.shape_cast %33 : vector<2x16x32xbf16> to vector<2x1x16x32xbf16>
    %42 = vector.shape_cast %34 : vector<2x16x32xbf16> to vector<2x1x16x32xbf16>
    %43 = tpu.concatenate %35, %36, %37, %38, %39, %40, %41, %42 in 1 : vector<2x1x16x32xbf16>, vector<2x1x16x32xbf16>, vector<2x1x16x32xbf16>, vector<2x1x16x32xbf16>, vector<2x1x16x32xbf16>, vector<2x1x16x32xbf16>, vector<2x1x16x32xbf16>, vector<2x1x16x32xbf16> -> vector<2x8x16x32xbf16>
    %44 = vector.shape_cast %43 : vector<2x8x16x32xbf16> to vector<16x16x32xbf16>
    %45 = vector.extract_strided_slice %8 {offsets = [0, 0, 512], sizes = [2, 16, 32], strides = [1, 1, 1]} : vector<2x16x768xbf16> to vector<2x16x32xbf16>
    %46 = vector.extract_strided_slice %8 {offsets = [0, 0, 544], sizes = [2, 16, 32], strides = [1, 1, 1]} : vector<2x16x768xbf16> to vector<2x16x32xbf16>
    %47 = vector.extract_strided_slice %8 {offsets = [0, 0, 576], sizes = [2, 16, 32], strides = [1, 1, 1]} : vector<2x16x768xbf16> to vector<2x16x32xbf16>
    %48 = vector.extract_strided_slice %8 {offsets = [0, 0, 608], sizes = [2, 16, 32], strides = [1, 1, 1]} : vector<2x16x768xbf16> to vector<2x16x32xbf16>
    %49 = vector.extract_strided_slice %8 {offsets = [0, 0, 640], sizes = [2, 16, 32], strides = [1, 1, 1]} : vector<2x16x768xbf16> to vector<2x16x32xbf16>
    %50 = vector.extract_strided_slice %8 {offsets = [0, 0, 672], sizes = [2, 16, 32], strides = [1, 1, 1]} : vector<2x16x768xbf16> to vector<2x16x32xbf16>
    %51 = vector.extract_strided_slice %8 {offsets = [0, 0, 704], sizes = [2, 16, 32], strides = [1, 1, 1]} : vector<2x16x768xbf16> to vector<2x16x32xbf16>
    %52 = vector.extract_strided_slice %8 {offsets = [0, 0, 736], sizes = [2, 16, 32], strides = [1, 1, 1]} : vector<2x16x768xbf16> to vector<2x16x32xbf16>
    %53 = vector.shape_cast %45 : vector<2x16x32xbf16> to vector<2x1x16x32xbf16>
    %54 = vector.shape_cast %46 : vector<2x16x32xbf16> to vector<2x1x16x32xbf16>
    %55 = vector.shape_cast %47 : vector<2x16x32xbf16> to vector<2x1x16x32xbf16>
    %56 = vector.shape_cast %48 : vector<2x16x32xbf16> to vector<2x1x16x32xbf16>
    %57 = vector.shape_cast %49 : vector<2x16x32xbf16> to vector<2x1x16x32xbf16>
    %58 = vector.shape_cast %50 : vector<2x16x32xbf16> to vector<2x1x16x32xbf16>
    %59 = vector.shape_cast %51 : vector<2x16x32xbf16> to vector<2x1x16x32xbf16>
    %60 = vector.shape_cast %52 : vector<2x16x32xbf16> to vector<2x1x16x32xbf16>
    %61 = tpu.concatenate %53, %54, %55, %56, %57, %58, %59, %60 in 1 : vector<2x1x16x32xbf16>, vector<2x1x16x32xbf16>, vector<2x1x16x32xbf16>, vector<2x1x16x32xbf16>, vector<2x1x16x32xbf16>, vector<2x1x16x32xbf16>, vector<2x1x16x32xbf16>, vector<2x1x16x32xbf16> -> vector<2x8x16x32xbf16>
    %62 = vector.shape_cast %61 : vector<2x8x16x32xbf16> to vector<16x16x32xbf16>
    "tpu.trace_start"() <{level = 10 : i32, message = "bnk,bmk->bnm"}> : () -> ()
    %cst_5 = arith.constant dense<0.000000e+00> : vector<16x16x16xf32>
    %63 = tpu.matmul %26, %44, %cst_5 {dimension_numbers = #tpu.dot_dimension_numbers<[2], [2], [1], [1], [0, 0, 0, 1, 1, 1], [0], [0]>} : vector<16x16x32xbf16>, vector<16x16x32xbf16>, vector<16x16x16xf32> -> vector<16x16x16xf32>
    "tpu.trace_stop"() : () -> ()
    %cst_6 = arith.constant dense<0xFF800000> : vector<16x16xf32>
    %64 = vector.multi_reduction <maximumf>, %63, %cst_6 [2] : vector<16x16x16xf32> to vector<16x16xf32>
    %65 = vector.shape_cast %64 : vector<16x16xf32> to vector<16x16x1xf32>
    %66 = vector.broadcast %65 : vector<16x16x1xf32> to vector<16x16x16xf32>
    %67 = arith.subf %63, %66 : vector<16x16x16xf32>
    %68 = math.exp %67 : vector<16x16x16xf32>
    %cst_7 = arith.constant dense<0.000000e+00> : vector<16x16xf32>
    %69 = vector.multi_reduction <add>, %68, %cst_7 [2] : vector<16x16x16xf32> to vector<16x16xf32>
    %70 = vector.shape_cast %69 : vector<16x16xf32> to vector<16x16x1xf32>
    %71 = tpu.reciprocal %70 {approx = true} : vector<16x16x1xf32> -> vector<16x16x1xf32>
    %72 = vector.broadcast %71 : vector<16x16x1xf32> to vector<16x16x16xf32>
    %73 = arith.mulf %68, %72 : vector<16x16x16xf32>
    %74 = arith.truncf %73 : vector<16x16x16xf32> to vector<16x16x16xbf16>
    "tpu.trace_start"() <{level = 10 : i32, message = "bnm,bmk->bnk"}> : () -> ()
    %cst_8 = arith.constant dense<0.000000e+00> : vector<16x16x32xf32>
    %75 = tpu.matmul %74, %62, %cst_8 {dimension_numbers = #tpu.dot_dimension_numbers<[2], [1], [1], [2], [0, 0, 0, 1, 1, 2], [0], [0]>} : vector<16x16x16xbf16>, vector<16x16x32xbf16>, vector<16x16x32xf32> -> vector<16x16x32xf32>
    "tpu.trace_stop"() : () -> ()
    %76 = vector.shape_cast %75 : vector<16x16x32xf32> to vector<2x8x16x32xf32>
    %77 = vector.extract_strided_slice %76 {offsets = [0, 0, 0, 0], sizes = [2, 1, 16, 32], strides = [1, 1, 1, 1]} : vector<2x8x16x32xf32> to vector<2x1x16x32xf32>
    %78 = vector.shape_cast %77 : vector<2x1x16x32xf32> to vector<2x16x32xf32>
    %79 = vector.extract_strided_slice %76 {offsets = [0, 1, 0, 0], sizes = [2, 1, 16, 32], strides = [1, 1, 1, 1]} : vector<2x8x16x32xf32> to vector<2x1x16x32xf32>
    %80 = vector.shape_cast %79 : vector<2x1x16x32xf32> to vector<2x16x32xf32>
    %81 = vector.extract_strided_slice %76 {offsets = [0, 2, 0, 0], sizes = [2, 1, 16, 32], strides = [1, 1, 1, 1]} : vector<2x8x16x32xf32> to vector<2x1x16x32xf32>
    %82 = vector.shape_cast %81 : vector<2x1x16x32xf32> to vector<2x16x32xf32>
    %83 = vector.extract_strided_slice %76 {offsets = [0, 3, 0, 0], sizes = [2, 1, 16, 32], strides = [1, 1, 1, 1]} : vector<2x8x16x32xf32> to vector<2x1x16x32xf32>
    %84 = vector.shape_cast %83 : vector<2x1x16x32xf32> to vector<2x16x32xf32>
    %85 = vector.extract_strided_slice %76 {offsets = [0, 4, 0, 0], sizes = [2, 1, 16, 32], strides = [1, 1, 1, 1]} : vector<2x8x16x32xf32> to vector<2x1x16x32xf32>
    %86 = vector.shape_cast %85 : vector<2x1x16x32xf32> to vector<2x16x32xf32>
    %87 = vector.extract_strided_slice %76 {offsets = [0, 5, 0, 0], sizes = [2, 1, 16, 32], strides = [1, 1, 1, 1]} : vector<2x8x16x32xf32> to vector<2x1x16x32xf32>
    %88 = vector.shape_cast %87 : vector<2x1x16x32xf32> to vector<2x16x32xf32>
    %89 = vector.extract_strided_slice %76 {offsets = [0, 6, 0, 0], sizes = [2, 1, 16, 32], strides = [1, 1, 1, 1]} : vector<2x8x16x32xf32> to vector<2x1x16x32xf32>
    %90 = vector.shape_cast %89 : vector<2x1x16x32xf32> to vector<2x16x32xf32>
    %91 = vector.extract_strided_slice %76 {offsets = [0, 7, 0, 0], sizes = [2, 1, 16, 32], strides = [1, 1, 1, 1]} : vector<2x8x16x32xf32> to vector<2x1x16x32xf32>
    %92 = vector.shape_cast %91 : vector<2x1x16x32xf32> to vector<2x16x32xf32>
    %93 = tpu.concatenate %78, %80, %82, %84, %86, %88, %90, %92 in 2 : vector<2x16x32xf32>, vector<2x16x32xf32>, vector<2x16x32xf32>, vector<2x16x32xf32>, vector<2x16x32xf32>, vector<2x16x32xf32>, vector<2x16x32xf32>, vector<2x16x32xf32> -> vector<2x16x256xf32>
    %94 = vector.shape_cast %93 : vector<2x16x256xf32> to vector<32x256xf32>
    %c0_9 = arith.constant 0 : index
    %c0_10 = arith.constant 0 : index
    %95 = vector.load %arg3[%c0_9, %c0_10] : memref<1x256xf32, #tpu.memory_space<vmem>>, vector<1x256xf32>
    %c0_11 = arith.constant 0 : index
    %c0_12 = arith.constant 0 : index
    %96 = vector.load %arg4[%c0_11, %c0_12] : memref<1x256xf32, #tpu.memory_space<vmem>>, vector<1x256xf32>
    %cst_13 = arith.constant dense<0.000000e+00> : vector<32xf32>
    %97 = vector.multi_reduction <add>, %94, %cst_13 [1] : vector<32x256xf32> to vector<32xf32>
    %98 = vector.shape_cast %97 : vector<32xf32> to vector<32x1xf32>
    %cst_14 = arith.constant 2.560000e+02 : f32
    %99 = vector.broadcast %cst_14 : f32 to vector<32x1xf32>
    %100 = arith.divf %98, %99 : vector<32x1xf32>
    %101 = vector.broadcast %100 : vector<32x1xf32> to vector<32x256xf32>
    %102 = arith.subf %94, %101 : vector<32x256xf32>
    %103 = arith.mulf %102, %102 : vector<32x256xf32>
    %cst_15 = arith.constant dense<0.000000e+00> : vector<32xf32>
    %104 = vector.multi_reduction <add>, %103, %cst_15 [1] : vector<32x256xf32> to vector<32xf32>
    %105 = vector.shape_cast %104 : vector<32xf32> to vector<32x1xf32>
    %cst_16 = arith.constant 2.560000e+02 : f32
    %106 = vector.broadcast %cst_16 : f32 to vector<32x1xf32>
    %107 = arith.divf %105, %106 : vector<32x1xf32>
    %cst_17 = arith.constant 9.99999974E-6 : f32
    %108 = vector.broadcast %cst_17 : f32 to vector<32x1xf32>
    %109 = arith.addf %107, %108 : vector<32x1xf32>
    %110 = math.rsqrt %109 : vector<32x1xf32>
    %111 = vector.broadcast %110 : vector<32x1xf32> to vector<32x256xf32>
    %112 = arith.mulf %102, %111 : vector<32x256xf32>
    %113 = vector.broadcast %95 : vector<1x256xf32> to vector<32x256xf32>
    %114 = arith.mulf %112, %113 : vector<32x256xf32>
    %115 = vector.broadcast %96 : vector<1x256xf32> to vector<32x256xf32>
    %116 = arith.addf %114, %115 : vector<32x256xf32>
    %117 = arith.addf %116, %94 : vector<32x256xf32>
    %118 = arith.truncf %117 : vector<32x256xf32> to vector<32x256xbf16>
    %c0_18 = arith.constant 0 : index
    %c0_19 = arith.constant 0 : index
    %119 = vector.load %arg5[%c0_18, %c0_19] : memref<256x64xbf16, #tpu.memory_space<vmem>>, vector<256x64xbf16>
    %cst_20 = arith.constant dense<0.000000e+00> : vector<32x64xf32>
    %120 = tpu.matmul %118, %119, %cst_20 {dimension_numbers = #tpu.dot_dimension_numbers<[1], [0], [0], [1], [0, 0, 1, 1], [], []>} : vector<32x256xbf16>, vector<256x64xbf16>, vector<32x64xf32> -> vector<32x64xf32>
    %c0_21 = arith.constant 0 : index
    %c0_22 = arith.constant 0 : index
    %121 = vector.load %arg6[%c0_21, %c0_22] : memref<1x64xf32, #tpu.memory_space<vmem>>, vector<1x64xf32>
    %122 = vector.broadcast %121 : vector<1x64xf32> to vector<32x64xf32>
    %123 = arith.addf %120, %122 : vector<32x64xf32>
    %cst_23 = arith.constant 5.000000e-01 : f32
    %124 = vector.broadcast %cst_23 : f32 to vector<32x64xf32>
    %125 = arith.mulf %124, %123 : vector<32x64xf32>
    %cst_24 = arith.constant 0.707106769 : f32
    %126 = vector.broadcast %cst_24 : f32 to vector<32x64xf32>
    %127 = arith.mulf %123, %126 : vector<32x64xf32>
    %cst_25 = arith.constant 0.000000e+00 : f32
    %128 = vector.broadcast %cst_25 : f32 to vector<32x64xf32>
    %129 = arith.cmpf oge, %127, %128 : vector<32x64xf32>
    %cst_26 = arith.constant 1.000000e+00 : f32
    %cst_27 = arith.constant -1.000000e+00 : f32
    %130 = vector.broadcast %cst_26 : f32 to vector<32x64xf32>
    %131 = vector.broadcast %cst_27 : f32 to vector<32x64xf32>
    %132 = arith.select %129, %130, %131 : vector<32x64xi1>, vector<32x64xf32>
    %133 = math.absf %127 : vector<32x64xf32>
    %cst_28 = arith.constant 0.327591091 : f32
    %134 = vector.broadcast %cst_28 : f32 to vector<32x64xf32>
    %135 = arith.mulf %134, %133 : vector<32x64xf32>
    %cst_29 = arith.constant 1.000000e+00 : f32
    %136 = vector.broadcast %cst_29 : f32 to vector<32x64xf32>
    %137 = arith.addf %136, %135 : vector<32x64xf32>
    %cst_30 = arith.constant 1.000000e+00 : f32
    %138 = vector.broadcast %cst_30 : f32 to vector<32x64xf32>
    %139 = arith.divf %138, %137 : vector<32x64xf32>
    %cst_31 = arith.constant 1.06140542 : f32
    %140 = vector.broadcast %cst_31 : f32 to vector<32x64xf32>
    %141 = arith.mulf %140, %139 : vector<32x64xf32>
    %cst_32 = arith.constant -1.45315206 : f32
    %142 = vector.broadcast %cst_32 : f32 to vector<32x64xf32>
    %143 = arith.addf %141, %142 : vector<32x64xf32>
    %144 = arith.mulf %143, %139 : vector<32x64xf32>
    %cst_33 = arith.constant 1.42141378 : f32
    %145 = vector.broadcast %cst_33 : f32 to vector<32x64xf32>
    %146 = arith.addf %144, %145 : vector<32x64xf32>
    %147 = arith.mulf %146, %139 : vector<32x64xf32>
    %cst_34 = arith.constant -0.284496725 : f32
    %148 = vector.broadcast %cst_34 : f32 to vector<32x64xf32>
    %149 = arith.addf %147, %148 : vector<32x64xf32>
    %150 = arith.mulf %149, %139 : vector<32x64xf32>
    %cst_35 = arith.constant 0.254829586 : f32
    %151 = vector.broadcast %cst_35 : f32 to vector<32x64xf32>
    %152 = arith.addf %150, %151 : vector<32x64xf32>
    %153 = arith.mulf %152, %139 : vector<32x64xf32>
    %cst_36 = arith.constant 0.000000e+00 : f32
    %154 = vector.broadcast %cst_36 : f32 to vector<32x64xf32>
    %155 = arith.subf %154, %133 : vector<32x64xf32>
    %156 = arith.mulf %155, %133 : vector<32x64xf32>
    %157 = math.exp %156 : vector<32x64xf32>
    %158 = arith.mulf %153, %157 : vector<32x64xf32>
    %cst_37 = arith.constant 1.000000e+00 : f32
    %159 = vector.broadcast %cst_37 : f32 to vector<32x64xf32>
    %160 = arith.subf %159, %158 : vector<32x64xf32>
    %161 = arith.mulf %132, %160 : vector<32x64xf32>
    %cst_38 = arith.constant 1.000000e+00 : f32
    %162 = vector.broadcast %cst_38 : f32 to vector<32x64xf32>
    %163 = arith.addf %162, %161 : vector<32x64xf32>
    %164 = arith.mulf %125, %163 : vector<32x64xf32>
    %165 = arith.truncf %164 : vector<32x64xf32> to vector<32x64xbf16>
    %c0_39 = arith.constant 0 : index
    %c0_40 = arith.constant 0 : index
    %166 = vector.load %arg7[%c0_39, %c0_40] : memref<64x256xbf16, #tpu.memory_space<vmem>>, vector<64x256xbf16>
    %cst_41 = arith.constant dense<0.000000e+00> : vector<32x256xf32>
    %167 = tpu.matmul %165, %166, %cst_41 {dimension_numbers = #tpu.dot_dimension_numbers<[1], [0], [0], [1], [0, 0, 1, 1], [], []>} : vector<32x64xbf16>, vector<64x256xbf16>, vector<32x256xf32> -> vector<32x256xf32>
    %c0_42 = arith.constant 0 : index
    %c0_43 = arith.constant 0 : index
    %168 = vector.load %arg8[%c0_42, %c0_43] : memref<1x256xf32, #tpu.memory_space<vmem>>, vector<1x256xf32>
    %169 = vector.broadcast %168 : vector<1x256xf32> to vector<32x256xf32>
    %170 = arith.addf %167, %169 : vector<32x256xf32>
    %c0_44 = arith.constant 0 : index
    %c0_45 = arith.constant 0 : index
    %171 = vector.load %arg9[%c0_44, %c0_45] : memref<1x256xf32, #tpu.memory_space<vmem>>, vector<1x256xf32>
    %c0_46 = arith.constant 0 : index
    %c0_47 = arith.constant 0 : index
    %172 = vector.load %arg10[%c0_46, %c0_47] : memref<1x256xf32, #tpu.memory_space<vmem>>, vector<1x256xf32>
    %cst_48 = arith.constant dense<0.000000e+00> : vector<32xf32>
    %173 = vector.multi_reduction <add>, %170, %cst_48 [1] : vector<32x256xf32> to vector<32xf32>
    %174 = vector.shape_cast %173 : vector<32xf32> to vector<32x1xf32>
    %cst_49 = arith.constant 2.560000e+02 : f32
    %175 = vector.broadcast %cst_49 : f32 to vector<32x1xf32>
    %176 = arith.divf %174, %175 : vector<32x1xf32>
    %177 = vector.broadcast %176 : vector<32x1xf32> to vector<32x256xf32>
    %178 = arith.subf %170, %177 : vector<32x256xf32>
    %179 = arith.mulf %178, %178 : vector<32x256xf32>
    %cst_50 = arith.constant dense<0.000000e+00> : vector<32xf32>
    %180 = vector.multi_reduction <add>, %179, %cst_50 [1] : vector<32x256xf32> to vector<32xf32>
    %181 = vector.shape_cast %180 : vector<32xf32> to vector<32x1xf32>
    %cst_51 = arith.constant 2.560000e+02 : f32
    %182 = vector.broadcast %cst_51 : f32 to vector<32x1xf32>
    %183 = arith.divf %181, %182 : vector<32x1xf32>
    %cst_52 = arith.constant 9.99999974E-6 : f32
    %184 = vector.broadcast %cst_52 : f32 to vector<32x1xf32>
    %185 = arith.addf %183, %184 : vector<32x1xf32>
    %186 = math.rsqrt %185 : vector<32x1xf32>
    %187 = vector.broadcast %186 : vector<32x1xf32> to vector<32x256xf32>
    %188 = arith.mulf %178, %187 : vector<32x256xf32>
    %189 = vector.broadcast %171 : vector<1x256xf32> to vector<32x256xf32>
    %190 = arith.mulf %188, %189 : vector<32x256xf32>
    %191 = vector.broadcast %172 : vector<1x256xf32> to vector<32x256xf32>
    %192 = arith.addf %190, %191 : vector<32x256xf32>
    %193 = arith.addf %192, %117 : vector<32x256xf32>
    %c0_53 = arith.constant 0 : index
    %c0_54 = arith.constant 0 : index
    %194 = vector.load %arg11[%c0_53, %c0_54] : memref<32x256xf32, #tpu.memory_space<vmem>>, vector<32x256xf32>
    tpu.vector_store %arg11[%c0_53, %c0_54], %193 {strides = array<i32>} : memref<32x256xf32, #tpu.memory_space<vmem>>, vector<32x256xf32>,
    return
  }
}

</mosaic_0001>

<bundles_post_ra>
// kernel: transformer_encoder_layer.1
= control target key start
LH: loop header
LB: loop body
LE: loop exit
PB: predicated region body
PF: predicated region fallthrough
CT: control target
= control target key end

     0   :  { %s5608_s0 = inlined_call_operand.vmem [shape: f32[32,256], index: 0, kind: input, shape index: {}]   ;;  %s5609_s1 = inlined_call_operand.vmem [shape: bf16[256,768], index: 1, kind: input, shape index: {}]   ;;  %s5610_s2 = inlined_call_operand.vmem [shape: f32[1,768], index: 2, kind: input, shape index: {}]   ;;  %s5611_s3 = inlined_call_operand.vmem [shape: f32[1,256], index: 3, kind: input, shape index: {}]   ;;  %s5612_s4 = inlined_call_operand.vmem [shape: f32[1,256], index: 4, kind: input, shape index: {}]   ;;  %s5613_s5 = inlined_call_operand.vmem [shape: bf16[256,64], index: 5, kind: input, shape index: {}]   ;;  %s5614_s6 = inlined_call_operand.vmem [shape: f32[1,64], index: 6, kind: input, shape index: {}]   ;;  %s5615_s7 = inlined_call_operand.vmem [shape: bf16[64,256], index: 7, kind: input, shape index: {}]   ;;  %s5616_s8 = inlined_call_operand.vmem [shape: f32[1,256], index: 8, kind: input, shape index: {}]   ;;  %s5617_s9 = inlined_call_operand.vmem [shape: f32[1,256], index: 9, kind: input, shape index: {}]   ;;  %s5618_s10 = inlined_call_operand.vmem [shape: f32[1,256], index: 10, kind: input, shape index: {}]   ;;  %s5619_s11 = inlined_call_operand.hbm [shape: f32[32,256], index: 11, kind: output, shape index: {}]  }
   0x1   :  { %v3263_v0 = vld [vmem:[%s5609_s1 + $0x150] sm:$0xf]  ;;  %v3654_v1 = vld [vmem:[%s5609_s1 + $0x164] sm:$0xf0]  ;;  %v3651_v5 = vld [vmem:[%s5609_s1 + $0x154] sm:$0xf] }
   0x2   :  { %v3455_v2 = vld [vmem:[%s5609_s1 + $0x2d0] sm:$0xf]  ;;  %v3264_v3 = vor.u32 %v3654_v1, %v3263_v0  ;;  %v3702_v4 = vld [vmem:[%s5609_s1 + $0x2e4] sm:$0xf0]  ;;  %v3265_v6 = vld [vmem:[%s5609_s1 + $0x168] sm:$0xf0] }
   0x3   :  { %v3456_v7 = vor.u32 %v3702_v4, %v3455_v2  ;;  %v3268_v8 = vor.u32 %v3651_v5, %v3265_v6  ;;  %v3699_v9 = vld [vmem:[%s5609_s1 + $0x2d4] sm:$0xf]  ;;  %v3457_v10 = vld [vmem:[%s5609_s1 + $0x2e8] sm:$0xf0]  ;;  %v3239_v11 = vld [vmem:[%s5609_s1 + $0x120] sm:$0xf] }
   0x4   :  { %642 = vmatpush.bf16.msra.mxu0 %v3264_v3  ;;  %v3460_v12 = vor.u32 %v3699_v9, %v3457_v10  ;;  %v3648_v13 = vld [vmem:[%s5609_s1 + $0x134] sm:$0xf0]  ;;  %v3431_v14 = vld [vmem:[%s5609_s1 + $0x2a0] sm:$0xf]  ;;  %v3645_v18 = vld [vmem:[%s5609_s1 + $0x124] sm:$0xf] }
   0x5   :  { %v3696_v15 = vld [vmem:[%s5609_s1 + $0x2b4] sm:$0xf0]  ;;  %661 = vmatpush.bf16.msra.mxu1 %v3456_v7  ;;  %680 = vmatpush.bf16.msra.mxu2 %v3268_v8  ;;  %v3240_v16 = vor.u32 %v3648_v13, %v3239_v11  ;;  %v3241_v19 = vld [vmem:[%s5609_s1 + $0x138] sm:$0xf0]  ;;  %v3693_v20 = vld [vmem:[%s5609_s1 + $0x2a4] sm:$0xf] }
   0x6   :  { %v3432_v17 = vor.u32 %v3696_v15, %v3431_v14  ;;  %699 = vmatpush.bf16.msra.mxu3 %v3460_v12  ;;  %v3244_v21 = vor.u32 %v3645_v18, %v3241_v19  ;;  %v3433_v22 = vld [vmem:[%s5609_s1 + $0x2b8] sm:$0xf0]  ;;  %v3215_v23 = vld [vmem:[%s5609_s1 + $0xf0] sm:$0xf]  ;;  %v3642_v24 = vld [vmem:[%s5609_s1 + $0x104] sm:$0xf0] }
   0x7   :  { %v3436_v25 = vor.u32 %v3693_v20, %v3433_v22  ;;  %v3407_v26 = vld [vmem:[%s5609_s1 + $0x270] sm:$0xf]  ;;  %v3690_v27 = vld [vmem:[%s5609_s1 + $0x284] sm:$0xf0]  ;;  %v3639_v28 = vld [vmem:[%s5609_s1 + $0xf4] sm:$0xf]  ;;  %v3216_v29 = vor.u32 %v3642_v24, %v3215_v23 }
   0x8   :  { %643 = vmatpush.bf16.msra.mxu0 %v3240_v16  ;;  %v3217_v30 = vld [vmem:[%s5609_s1 + $0x108] sm:$0xf0]  ;;  %v3687_v31 = vld [vmem:[%s5609_s1 + $0x274] sm:$0xf]  ;;  %v3408_v33 = vor.u32 %v3690_v27, %v3407_v26  ;;  %v3191_v35 = vld [vmem:[%s5609_s1 + $0xc0] sm:$0xf] }
   0x9   :  { %v3409_v32 = vld [vmem:[%s5609_s1 + $0x288] sm:$0xf0]  ;;  %662 = vmatpush.bf16.msra.mxu1 %v3432_v17  ;;  %681 = vmatpush.bf16.msra.mxu2 %v3244_v21  ;;  %v3220_v34 = vor.u32 %v3639_v28, %v3217_v30  ;;  %v3636_v36 = vld [vmem:[%s5609_s1 + $0xd4] sm:$0xf0]  ;;  %v3383_v37 = vld [vmem:[%s5609_s1 + $0x240] sm:$0xf] }
   0xa   :  { %700 = vmatpush.bf16.msra.mxu3 %v3436_v25  ;;  %v3412_v38 = vor.u32 %v3687_v31, %v3409_v32  ;;  %v3684_v39 = vld [vmem:[%s5609_s1 + $0x254] sm:$0xf0]  ;;  %v3633_v40 = vld [vmem:[%s5609_s1 + $0xc4] sm:$0xf]  ;;  %v3193_v41 = vld [vmem:[%s5609_s1 + $0xd8] sm:$0xf0]  ;;  %v3192_v44 = vor.u32 %v3636_v36, %v3191_v35 }
   0xb   :  { %v3681_v42 = vld [vmem:[%s5609_s1 + $0x244] sm:$0xf]  ;;  %v3385_v43 = vld [vmem:[%s5609_s1 + $0x258] sm:$0xf0]  ;;  %v3384_v45 = vor.u32 %v3684_v39, %v3383_v37  ;;  %v3196_v46 = vor.u32 %v3633_v40, %v3193_v41  ;;  %v3167_v47 = vld [vmem:[%s5609_s1 + $0x90] sm:$0xf] }
   0xc   :  { %644 = vmatpush.bf16.msra.mxu0 %v3216_v29  ;;  %v3630_v48 = vld [vmem:[%s5609_s1 + $0xa4] sm:$0xf0]  ;;  %v3359_v49 = vld [vmem:[%s5609_s1 + $0x210] sm:$0xf]  ;;  %v3388_v50 = vor.u32 %v3681_v42, %v3385_v43  ;;  %v3627_v52 = vld [vmem:[%s5609_s1 + $0x94] sm:$0xf] }
   0xd   :  { %663 = vmatpush.bf16.msra.mxu1 %v3408_v33  ;;  %682 = vmatpush.bf16.msra.mxu2 %v3220_v34  ;;  %v3678_v51 = vld [vmem:[%s5609_s1 + $0x224] sm:$0xf0]  ;;  %v3169_v53 = vld [vmem:[%s5609_s1 + $0xa8] sm:$0xf0]  ;;  %v3675_v54 = vld [vmem:[%s5609_s1 + $0x214] sm:$0xf]  ;;  %v3168_v56 = vor.u32 %v3630_v48, %v3167_v47 }
   0xe   :  { %701 = vmatpush.bf16.msra.mxu3 %v3412_v38  ;;  %v3361_v55 = vld [vmem:[%s5609_s1 + $0x228] sm:$0xf0]  ;;  %v3360_v57 = vor.u32 %v3678_v51, %v3359_v49  ;;  %v3172_v58 = vor.u32 %v3627_v52, %v3169_v53  ;;  %v3143_v59 = vld [vmem:[%s5609_s1 + $0x60] sm:$0xf]  ;;  %v3624_v60 = vld [vmem:[%s5609_s1 + $0x74] sm:$0xf0] }
   0xf   :  { %v3335_v61 = vld [vmem:[%s5609_s1 + $0x1e0] sm:$0xf]  ;;  %v3364_v62 = vor.u32 %v3675_v54, %v3361_v55  ;;  %v3672_v63 = vld [vmem:[%s5609_s1 + $0x1f4] sm:$0xf0]  ;;  %v3621_v0 = vld [vmem:[%s5609_s1 + $0x64] sm:$0xf]  ;;  %v3144_v4 = vor.u32 %v3624_v60, %v3143_v59 }
  0x10   :  { %645 = vmatpush.bf16.msra.mxu0 %v3192_v44  ;;  %v3145_v1 = vld [vmem:[%s5609_s1 + $0x78] sm:$0xf0]  ;;  %v3669_v2 = vld [vmem:[%s5609_s1 + $0x1e4] sm:$0xf]  ;;  %v3336_v5 = vor.u32 %v3672_v63, %v3335_v61  ;;  %v3119_v7 = vld [vmem:[%s5609_s1 + $0x30] sm:$0xf] }
  0x11   :  { %664 = vmatpush.bf16.msra.mxu1 %v3384_v45  ;;  %683 = vmatpush.bf16.msra.mxu2 %v3196_v46  ;;  %v3337_v3 = vld [vmem:[%s5609_s1 + $0x1f8] sm:$0xf0]  ;;  %v3148_v6 = vor.u32 %v3621_v0, %v3145_v1  ;;  %v3618_v8 = vld [vmem:[%s5609_s1 + $0x44] sm:$0xf0]  ;;  %v3311_v9 = vld [vmem:[%s5609_s1 + $0x1b0] sm:$0xf] }
  0x12   :  { %702 = vmatpush.bf16.msra.mxu3 %v3388_v50  ;;  %v3340_v10 = vor.u32 %v3669_v2, %v3337_v3  ;;  %v3666_v11 = vld [vmem:[%s5609_s1 + $0x1c4] sm:$0xf0]  ;;  %v3615_v12 = vld [vmem:[%s5609_s1 + $0x34] sm:$0xf]  ;;  %v3121_v13 = vld [vmem:[%s5609_s1 + $0x48] sm:$0xf0]  ;;  %v3120_v16 = vor.u32 %v3618_v8, %v3119_v7 }
  0x13   :  { %v3663_v14 = vld [vmem:[%s5609_s1 + $0x1b4] sm:$0xf]  ;;  %v3313_v15 = vld [vmem:[%s5609_s1 + $0x1c8] sm:$0xf0]  ;;  %v3095_v17 = vld [vmem:[%s5609_s1] sm:$0xf]  ;;  %v3312_v19 = vor.u32 %v3666_v11, %v3311_v9  ;;  %v3124_v20 = vor.u32 %v3615_v12, %v3121_v13 }
  0x14   :  { %646 = vmatpush.bf16.msra.mxu0 %v3168_v56  ;;  %v3612_v18 = vld [vmem:[%s5609_s1 + $0x14] sm:$0xf0]  ;;  %v3287_v21 = vld [vmem:[%s5609_s1 + $0x180] sm:$0xf]  ;;  %v3609_v23 = vld [vmem:[%s5609_s1 + $0x4] sm:$0xf]  ;;  %v3316_v24 = vor.u32 %v3663_v14, %v3313_v15 }
  0x15   :  { %665 = vmatpush.bf16.msra.mxu1 %v3360_v57  ;;  %684 = vmatpush.bf16.msra.mxu2 %v3172_v58  ;;  %v3660_v22 = vld [vmem:[%s5609_s1 + $0x194] sm:$0xf0]  ;;  %v3097_v25 = vld [vmem:[%s5609_s1 + $0x18] sm:$0xf0]  ;;  %v3657_v26 = vld [vmem:[%s5609_s1 + $0x184] sm:$0xf]  ;;  %v3096_v31 = vor.u32 %v3612_v18, %v3095_v17 }
  0x16   :  { %703 = vmatpush.bf16.msra.mxu3 %v3364_v62  ;;  %v3289_v27 = vld [vmem:[%s5609_s1 + $0x198] sm:$0xf0]  ;;  %v40_v28 = vld [vmem:[%s5608_s0] sm:$0xff]  ;;  %v3271_v29 = vld [vmem:[%s5609_s1 + $0x158] sm:$0xf]  ;;  %v3288_v35 = vor.u32 %v3660_v22, %v3287_v21  ;;  %v3100_v36 = vor.u32 %v3609_v23, %v3097_v25 }
  0x17   :  { %v3655_v30 = vld [vmem:[%s5609_s1 + $0x16c] sm:$0xf0]  ;;  %v3463_v33 = vld [vmem:[%s5609_s1 + $0x2d8] sm:$0xf]  ;;  %v41_v37 = vld [vmem:[%s5608_s0 + $0x8] sm:$0xff]  ;;  %v3292_v39 = vor.u32 %v3657_v26, %v3289_v27 }
  0x18   :  { %647 = vmatpush.bf16.msra.mxu0 %v3144_v4  ;;  %v42_v32 = vld [vmem:[%s5608_s0 + $0x10] sm:$0xff]  ;;  %v43_v38 = vld [vmem:[%s5608_s0 + $0x18] sm:$0xff]  ;;  %v3272_v40 = vor.u32 %v3655_v30, %v3271_v29  ;;  %v3247_v47 = vld [vmem:[%s5609_s1 + $0x128] sm:$0xf] }
  0x19   :  { %666 = vmatpush.bf16.msra.mxu1 %v3336_v5  ;;  %685 = vmatpush.bf16.msra.mxu2 %v3148_v6  ;;  %v3703_v34 = vld [vmem:[%s5609_s1 + $0x2ec] sm:$0xf0]  ;;  %v3652_v41 = vld [vmem:[%s5609_s1 + $0x15c] sm:$0xf]  ;;  %v3273_v42 = vld [vmem:[%s5609_s1 + $0x170] sm:$0xf0]  ;;  %v4219_v44 = vpack.c.bf16 %v42_v32, %v40_v28  ;;  %v4230_v49 = vpack.c.bf16 %v43_v38, %v41_v37 }
  0x1a   :  { %704 = vmatpush.bf16.msra.mxu3 %v3340_v10  ;;  %v3700_v43 = vld [vmem:[%s5609_s1 + $0x2dc] sm:$0xf]  ;;  %v3464_v45 = vor.u32 %v3703_v34, %v3463_v33  ;;  %v3465_v46 = vld [vmem:[%s5609_s1 + $0x2f0] sm:$0xf0]  ;;  %v3649_v48 = vld [vmem:[%s5609_s1 + $0x13c] sm:$0xf0]  ;;  %v3276_v52 = vor.u32 %v3652_v41, %v3273_v42 }
  0x1b   :  { %v3439_v50 = vld [vmem:[%s5609_s1 + $0x2a8] sm:$0xf]  ;;  %v3697_v51 = vld [vmem:[%s5609_s1 + $0x2bc] sm:$0xf0]  ;;  %v3468_v53 = vor.u32 %v3700_v43, %v3465_v46  ;;  %v3248_v54 = vor.u32 %v3649_v48, %v3247_v47  ;;  %v3646_v55 = vld [vmem:[%s5609_s1 + $0x12c] sm:$0xf] }
  0x1c   :  { %648 = vmatpush.bf16.msra.mxu0 %v3120_v16  ;;  %v3249_v56 = vld [vmem:[%s5609_s1 + $0x140] sm:$0xf0]  ;;  %v3694_v57 = vld [vmem:[%s5609_s1 + $0x2ac] sm:$0xf]  ;;  %v3440_v58 = vor.u32 %v3697_v51, %v3439_v50  ;;  %v3223_v60 = vld [vmem:[%s5609_s1 + $0xf8] sm:$0xf] }
  0x1d   :  { %667 = vmatpush.bf16.msra.mxu1 %v3312_v19  ;;  %686 = vmatpush.bf16.msra.mxu2 %v3124_v20  ;;  %v3441_v59 = vld [vmem:[%s5609_s1 + $0x2c0] sm:$0xf0]  ;;  %v3643_v61 = vld [vmem:[%s5609_s1 + $0x10c] sm:$0xf0]  ;;  %v3415_v62 = vld [vmem:[%s5609_s1 + $0x278] sm:$0xf]  ;;  %v3252_v0 = vor.u32 %v3646_v55, %v3249_v56 }
  0x1e   :  { %705 = vmatpush.bf16.msra.mxu3 %v3316_v24  ;;  %v3691_v63 = vld [vmem:[%s5609_s1 + $0x28c] sm:$0xf0]  ;;  %v3444_v1 = vor.u32 %v3694_v57, %v3441_v59  ;;  %v3224_v2 = vor.u32 %v3643_v61, %v3223_v60  ;;  %v3640_v3 = vld [vmem:[%s5609_s1 + $0xfc] sm:$0xf]  ;;  %v3225_v4 = vld [vmem:[%s5609_s1 + $0x110] sm:$0xf0] }
  0x1f   :  { %v3688_v5 = vld [vmem:[%s5609_s1 + $0x27c] sm:$0xf]  ;;  %v3416_v6 = vor.u32 %v3691_v63, %v3415_v62  ;;  %v3417_v7 = vld [vmem:[%s5609_s1 + $0x290] sm:$0xf0]  ;;  %v3199_v8 = vld [vmem:[%s5609_s1 + $0xc8] sm:$0xf]  ;;  %v3228_v12 = vor.u32 %v3640_v3, %v3225_v4 }
  0x20   :  { %649 = vmatpush.bf16.msra.mxu0 %v3096_v31  ;;  %v3637_v9 = vld [vmem:[%s5609_s1 + $0xdc] sm:$0xf0]  ;;  %v3391_v10 = vld [vmem:[%s5609_s1 + $0x248] sm:$0xf]  ;;  %v3634_v13 = vld [vmem:[%s5609_s1 + $0xcc] sm:$0xf]  ;;  %v3420_v15 = vor.u32 %v3688_v5, %v3417_v7 }
  0x21   :  { %668 = vmatpush.bf16.msra.mxu1 %v3288_v35  ;;  %687 = vmatpush.bf16.msra.mxu2 %v3100_v36  ;;  %v3685_v11 = vld [vmem:[%s5609_s1 + $0x25c] sm:$0xf0]  ;;  %v3201_v14 = vld [vmem:[%s5609_s1 + $0xe0] sm:$0xf0]  ;;  %v3200_v16 = vor.u32 %v3637_v9, %v3199_v8  ;;  %v3682_v17 = vld [vmem:[%s5609_s1 + $0x24c] sm:$0xf] }
  0x22   :  { %706 = vmatpush.bf16.msra.mxu3 %v3292_v39  ;;  %v3393_v18 = vld [vmem:[%s5609_s1 + $0x260] sm:$0xf0]  ;;  %v3392_v20 = vor.u32 %v3685_v11, %v3391_v10  ;;  %v46_v21 = vld [vmem:[%s5608_s0 + $0x30] sm:$0xff]  ;;  %v3175_v22 = vld [vmem:[%s5609_s1 + $0x98] sm:$0xf]  ;;  %v3204_v27 = vor.u32 %v3634_v13, %v3201_v14 }
  0x23   :  { %650 = vmatmul.bf16.vlgmr.msra.gmra.mxu0 %v4219_v44  ;;  %v44_v19 = vld [vmem:[%s5608_s0 + $0x20] sm:$0xff]  ;;  %v3631_v23 = vld [vmem:[%s5609_s1 + $0xac] sm:$0xf0]  ;;  %v45_v24 = vld [vmem:[%s5608_s0 + $0x28] sm:$0xff]  ;;  %v3396_v31 = vor.u32 %v3682_v17, %v3393_v18 }
  0x24   :  { %718 = vmatpush.bf16.msrb.mxu0 %v3272_v40  ;;  %669 = vmatmul.bf16.vlgmr.msra.gmra.mxu1 %v4230_v49  ;;  %v3367_v25 = vld [vmem:[%s5609_s1 + $0x218] sm:$0xf]  ;;  %v3679_v26 = vld [vmem:[%s5609_s1 + $0x22c] sm:$0xf0]  ;;  %v3628_v29 = vld [vmem:[%s5609_s1 + $0x9c] sm:$0xf]  ;;  %v3176_v32 = vor.u32 %v3631_v23, %v3175_v22  ;;  %v4338_v35 = vpack.c.bf16 %v46_v21, %v44_v19 }
  0x25   :  { %737 = vmatpush.bf16.msrb.mxu1 %v3464_v45  ;;  %688 = vmatmul.bf16.vlgmr.msra.gmra.mxu2 %v4219_v44  ;;  %v47_v28 = vld [vmem:[%s5608_s0 + $0x38] sm:$0xff]  ;;  %v3177_v30 = vld [vmem:[%s5609_s1 + $0xb0] sm:$0xf0]  ;;  %v3368_v36 = vor.u32 %v3679_v26, %v3367_v25  ;;  %v3151_v37 = vld [vmem:[%s5609_s1 + $0x68] sm:$0xf] }
  0x26   :  { %707 = vmatmul.bf16.vlgmr.msra.gmra.mxu3 %v4230_v49  ;;  %756 = vmatpush.bf16.msrb.mxu2 %v3276_v52  ;;  %v3676_v33 = vld [vmem:[%s5609_s1 + $0x21c] sm:$0xf]  ;;  %v3369_v34 = vld [vmem:[%s5609_s1 + $0x230] sm:$0xf0]  ;;  %v3625_v38 = vld [vmem:[%s5609_s1 + $0x7c] sm:$0xf0] }
  0x27   :  { %775 = vmatpush.bf16.msrb.mxu3 %v3468_v53 }
  0x28   :  { %719 = vmatpush.bf16.msrb.mxu0 %v3248_v54 }
  0x29   :  { %738 = vmatpush.bf16.msrb.mxu1 %v3440_v58 }
  0x2a   :  { %757 = vmatpush.bf16.msrb.mxu2 %v3252_v0 }
  0x2b   :  { %776 = vmatpush.bf16.msrb.mxu3 %v3444_v1 }
  0x2c   :  { %720 = vmatpush.bf16.msrb.mxu0 %v3224_v2 }
  0x2d   :  { %739 = vmatpush.bf16.msrb.mxu1 %v3416_v6 }
  0x2e   :  { %758 = vmatpush.bf16.msrb.mxu2 %v3228_v12 }
  0x2f   :  { %777 = vmatpush.bf16.msrb.mxu3 %v3420_v15 }
  0x30   :  { %721 = vmatpush.bf16.msrb.mxu0 %v3200_v16 }
  0x31   :  { %740 = vmatpush.bf16.msrb.mxu1 %v3392_v20 }
  0x32   :  { %16 = vsyncpa [#allocation3], 0  ;;  %v4346_v39 = vpack.c.bf16 %v47_v28, %v45_v24  ;;  %v3343_v40 = vld [vmem:[%s5609_s1 + $0x1e8] sm:$0xf]  ;;  %v3673_v41 = vld [vmem:[%s5609_s1 + $0x1fc] sm:$0xf0]  ;;  %759 = vmatpush.bf16.msrb.mxu2 %v3204_v27  ;;  %v3180_v42 = vor.u32 %v3628_v29, %v3177_v30  ;;  %v3372_v43 = vor.u32 %v3676_v33, %v3369_v34  ;;  %v3152_v45 = vor.u32 %v3625_v38, %v3151_v37 }
  0x33   :  { %778 = vmatpush.bf16.msrb.mxu3 %v3396_v31  ;;  %v3622_v46 = vld [vmem:[%s5609_s1 + $0x6c] sm:$0xf]  ;;  %v3153_v47 = vld [vmem:[%s5609_s1 + $0x80] sm:$0xf0]  ;;  %655 = vmatmul.bf16.gmra.mxu0 %v4338_v35  ;;  %v3344_v50 = vor.u32 %v3673_v41, %v3343_v40  ;;  %v3127_v52 = vld [vmem:[%s5609_s1 + $0x38] sm:$0xf] }
  0x34   :  { %722 = vmatpush.bf16.msrb.mxu0 %v3176_v32  ;;  %v3670_v48 = vld [vmem:[%s5609_s1 + $0x1ec] sm:$0xf]  ;;  %v3345_v51 = vld [vmem:[%s5609_s1 + $0x200] sm:$0xf0]  ;;  %v3619_v53 = vld [vmem:[%s5609_s1 + $0x4c] sm:$0xf0]  ;;  %674 = vmatmul.bf16.gmra.mxu1 %v4346_v39  ;;  %v3156_v56 = vor.u32 %v3622_v46, %v3153_v47 }
  0x35   :  { %741 = vmatpush.bf16.msrb.mxu1 %v3368_v36  ;;  %693 = vmatmul.bf16.gmra.mxu2 %v4338_v35  ;;  %v3319_v54 = vld [vmem:[%s5609_s1 + $0x1b8] sm:$0xf]  ;;  %v3667_v55 = vld [vmem:[%s5609_s1 + $0x1cc] sm:$0xf0]  ;;  %v3616_v57 = vld [vmem:[%s5609_s1 + $0x3c] sm:$0xf]  ;;  %v3348_v58 = vor.u32 %v3670_v48, %v3345_v51  ;;  %v3128_v59 = vor.u32 %v3619_v53, %v3127_v52 }
  0x36   :  { %712 = vmatmul.bf16.gmra.mxu3 %v4346_v39  ;;  %760 = vmatpush.bf16.msrb.mxu2 %v3180_v42  ;;  %v3129_v60 = vld [vmem:[%s5609_s1 + $0x50] sm:$0xf0]  ;;  %v3664_v61 = vld [vmem:[%s5609_s1 + $0x1bc] sm:$0xf]  ;;  %v3320_v63 = vor.u32 %v3667_v55, %v3319_v54  ;;  %v3103_v0 = vld [vmem:[%s5609_s1 + $0x8] sm:$0xf] }
  0x37   :  { %779 = vmatpush.bf16.msrb.mxu3 %v3372_v43  ;;  %v3321_v62 = vld [vmem:[%s5609_s1 + $0x1d0] sm:$0xf0]  ;;  %v3613_v1 = vld [vmem:[%s5609_s1 + $0x1c] sm:$0xf0]  ;;  %v3295_v2 = vld [vmem:[%s5609_s1 + $0x188] sm:$0xf]  ;;  %v3132_v6 = vor.u32 %v3616_v57, %v3129_v60 }
  0x38   :  { %723 = vmatpush.bf16.msrb.mxu0 %v3152_v45  ;;  %v3661_v3 = vld [vmem:[%s5609_s1 + $0x19c] sm:$0xf0]  ;;  %v3656_v5 = vld [vmem:[%s5609_s1 + $0x174] sm:$0xf0]  ;;  %v3324_v9 = vor.u32 %v3664_v61, %v3321_v62  ;;  %v3104_v10 = vor.u32 %v3613_v1, %v3103_v0  ;;  %v3610_v11 = vld [vmem:[%s5609_s1 + $0xc] sm:$0xf] }
  0x39   :  { %742 = vmatpush.bf16.msrb.mxu1 %v3344_v50  ;;  %v3279_v4 = vld [vmem:[%s5609_s1 + $0x160] sm:$0xf]  ;;  %v3704_v8 = vld [vmem:[%s5609_s1 + $0x2f4] sm:$0xf0]  ;;  %v3105_v12 = vld [vmem:[%s5609_s1 + $0x20] sm:$0xf0]  ;;  %v3296_v14 = vor.u32 %v3661_v3, %v3295_v2 }
  0x3a   :  { %761 = vmatpush.bf16.msrb.mxu2 %v3156_v56  ;;  %v3471_v7 = vld [vmem:[%s5609_s1 + $0x2e0] sm:$0xf]  ;;  %v3658_v13 = vld [vmem:[%s5609_s1 + $0x18c] sm:$0xf]  ;;  %v3297_v15 = vld [vmem:[%s5609_s1 + $0x1a0] sm:$0xf0]  ;;  %v3280_v18 = vor.u32 %v3656_v5, %v3279_v4  ;;  %v3108_v22 = vor.u32 %v3610_v11, %v3105_v12 }
  0x3b   :  { %780 = vmatpush.bf16.msrb.mxu3 %v3348_v58  ;;  %v3653_v16 = vld [vmem:[%s5609_s1 + $0x164] sm:$0xf]  ;;  %v3281_v17 = vld [vmem:[%s5609_s1 + $0x178] sm:$0xf0]  ;;  %v3472_v21 = vor.u32 %v3704_v8, %v3471_v7  ;;  %v3300_v23 = vor.u32 %v3658_v13, %v3297_v15  ;;  %v3647_v25 = vld [vmem:[%s5609_s1 + $0x134] sm:$0xf] }
  0x3c   :  { %724 = vmatpush.bf16.msrb.mxu0 %v3128_v59  ;;  %v3701_v19 = vld [vmem:[%s5609_s1 + $0x2e4] sm:$0xf]  ;;  %v3473_v20 = vld [vmem:[%s5609_s1 + $0x2f8] sm:$0xf0]  ;;  %v3284_v24 = vor.u32 %v3653_v16, %v3281_v17  ;;  %v3255_v26 = vld [vmem:[%s5609_s1 + $0x130] sm:$0xf] }
  0x3d   :  { %743 = vmatpush.bf16.msrb.mxu1 %v3320_v63  ;;  %v3650_v27 = vld [vmem:[%s5609_s1 + $0x144] sm:$0xf0]  ;;  %v3476_v28 = vor.u32 %v3701_v19, %v3473_v20  ;;  %v3257_v29 = vld [vmem:[%s5609_s1 + $0x148] sm:$0xf0]  ;;  %v3447_v30 = vld [vmem:[%s5609_s1 + $0x2b0] sm:$0xf] }
  0x3e   :  { %762 = vmatpush.bf16.msrb.mxu2 %v3132_v6  ;;  %v3698_v31 = vld [vmem:[%s5609_s1 + $0x2c4] sm:$0xf0]  ;;  %v3695_v32 = vld [vmem:[%s5609_s1 + $0x2b4] sm:$0xf]  ;;  %v3449_v33 = vld [vmem:[%s5609_s1 + $0x2c8] sm:$0xf0]  ;;  %v3256_v34 = vor.u32 %v3650_v27, %v3255_v26  ;;  %v3260_v36 = vor.u32 %v3647_v25, %v3257_v29 }
  0x3f   :  { %781 = vmatpush.bf16.msrb.mxu3 %v3324_v9  ;;  %v3641_v37 = vld [vmem:[%s5609_s1 + $0x104] sm:$0xf]  ;;  %v3448_v38 = vor.u32 %v3698_v31, %v3447_v30  ;;  %v3231_v40 = vld [vmem:[%s5609_s1 + $0x100] sm:$0xf]  ;;  %v3644_v41 = vld [vmem:[%s5609_s1 + $0x114] sm:$0xf0]  ;;  %v3452_v42 = vor.u32 %v3695_v32, %v3449_v33 }
  0x40   :  { %725 = vmatpush.bf16.msrb.mxu0 %v3104_v10  ;;  %v3233_v43 = vld [vmem:[%s5609_s1 + $0x118] sm:$0xf0]  ;;  %v3423_v45 = vld [vmem:[%s5609_s1 + $0x280] sm:$0xf]  ;;  %v3692_v46 = vld [vmem:[%s5609_s1 + $0x294] sm:$0xf0]  ;;  %v3232_v50 = vor.u32 %v3644_v41, %v3231_v40 }
  0x41   :  { %744 = vmatpush.bf16.msrb.mxu1 %v3296_v14  ;;  %v3689_v47 = vld [vmem:[%s5609_s1 + $0x284] sm:$0xf]  ;;  %v3425_v48 = vld [vmem:[%s5609_s1 + $0x298] sm:$0xf0]  ;;  %v3236_v51 = vor.u32 %v3641_v37, %v3233_v43  ;;  %v3635_v52 = vld [vmem:[%s5609_s1 + $0xd4] sm:$0xf]  ;;  %v3424_v53 = vor.u32 %v3692_v46, %v3423_v45 }
  0x42   :  { %763 = vmatpush.bf16.msrb.mxu2 %v3108_v22  ;;  %v3207_v54 = vld [vmem:[%s5609_s1 + $0xd0] sm:$0xf]  ;;  %v3638_v55 = vld [vmem:[%s5609_s1 + $0xe4] sm:$0xf0]  ;;  %v3428_v56 = vor.u32 %v3689_v47, %v3425_v48  ;;  %v3209_v57 = vld [vmem:[%s5609_s1 + $0xe8] sm:$0xf0] }
  0x43   :  { %782 = vmatpush.bf16.msrb.mxu3 %v3300_v23  ;;  %726 = vmatmul.bf16.vlgmr.msrb.gmra.mxu0 %v4219_v44  ;;  %v3399_v58 = vld [vmem:[%s5609_s1 + $0x250] sm:$0xf]  ;;  %v3686_v59 = vld [vmem:[%s5609_s1 + $0x264] sm:$0xf0]  ;;  %v3683_v60 = vld [vmem:[%s5609_s1 + $0x254] sm:$0xf]  ;;  %v3208_v62 = vor.u32 %v3638_v55, %v3207_v54  ;;  %v3212_v63 = vor.u32 %v3635_v52, %v3209_v57 }
  0x44   :  { %794 = vmatpush.bf16.msra.mxu0 %v3280_v18  ;;  %745 = vmatmul.bf16.vlgmr.msrb.gmra.mxu1 %v4230_v49  ;;  %v3401_v61 = vld [vmem:[%s5609_s1 + $0x268] sm:$0xf0]  ;;  %v3629_v0 = vld [vmem:[%s5609_s1 + $0xa4] sm:$0xf]  ;;  %v3400_v1 = vor.u32 %v3686_v59, %v3399_v58  ;;  %v3183_v2 = vld [vmem:[%s5609_s1 + $0xa0] sm:$0xf] }
  0x45   :  { %813 = vmatpush.bf16.msra.mxu1 %v3472_v21  ;;  %764 = vmatmul.bf16.vlgmr.msrb.gmra.mxu2 %v4219_v44  ;;  %v3632_v3 = vld [vmem:[%s5609_s1 + $0xb4] sm:$0xf0]  ;;  %v3404_v4 = vor.u32 %v3683_v60, %v3401_v61  ;;  %v3185_v5 = vld [vmem:[%s5609_s1 + $0xb8] sm:$0xf0]  ;;  %v3375_v6 = vld [vmem:[%s5609_s1 + $0x220] sm:$0xf] }
  0x46   :  { %832 = vmatpush.bf16.msra.mxu2 %v3284_v24  ;;  %783 = vmatmul.bf16.vlgmr.msrb.gmra.mxu3 %v4230_v49  ;;  %v3680_v7 = vld [vmem:[%s5609_s1 + $0x234] sm:$0xf0]  ;;  %v3677_v8 = vld [vmem:[%s5609_s1 + $0x224] sm:$0xf]  ;;  %v3377_v9 = vld [vmem:[%s5609_s1 + $0x238] sm:$0xf0]  ;;  %v3184_v10 = vor.u32 %v3632_v3, %v3183_v2  ;;  %v3188_v11 = vor.u32 %v3629_v0, %v3185_v5 }
  0x47   :  { %851 = vmatpush.bf16.msra.mxu3 %v3476_v28  ;;  %v3623_v12 = vld [vmem:[%s5609_s1 + $0x74] sm:$0xf]  ;;  %v3376_v13 = vor.u32 %v3680_v7, %v3375_v6  ;;  %v3159_v14 = vld [vmem:[%s5609_s1 + $0x70] sm:$0xf]  ;;  %v3626_v15 = vld [vmem:[%s5609_s1 + $0x84] sm:$0xf0]  ;;  %v3380_v16 = vor.u32 %v3677_v8, %v3377_v9 }
  0x48   :  { %795 = vmatpush.bf16.msra.mxu0 %v3256_v34  ;;  %v3161_v17 = vld [vmem:[%s5609_s1 + $0x88] sm:$0xf0]  ;;  %v3351_v18 = vld [vmem:[%s5609_s1 + $0x1f0] sm:$0xf]  ;;  %v3674_v19 = vld [vmem:[%s5609_s1 + $0x204] sm:$0xf0]  ;;  %v3160_v22 = vor.u32 %v3626_v15, %v3159_v14 }
  0x49   :  { %814 = vmatpush.bf16.msra.mxu1 %v3448_v38  ;;  %v3671_v20 = vld [vmem:[%s5609_s1 + $0x1f4] sm:$0xf]  ;;  %v3353_v21 = vld [vmem:[%s5609_s1 + $0x208] sm:$0xf0]  ;;  %v3164_v23 = vor.u32 %v3623_v12, %v3161_v17  ;;  %v3617_v24 = vld [vmem:[%s5609_s1 + $0x44] sm:$0xf]  ;;  %v3352_v25 = vor.u32 %v3674_v19, %v3351_v18 }
  0x4a   :  { %833 = vmatpush.bf16.msra.mxu2 %v3260_v36  ;;  %v3135_v26 = vld [vmem:[%s5609_s1 + $0x40] sm:$0xf]  ;;  %v3620_v27 = vld [vmem:[%s5609_s1 + $0x54] sm:$0xf0]  ;;  %v3356_v28 = vor.u32 %v3671_v20, %v3353_v21  ;;  %v3137_v29 = vld [vmem:[%s5609_s1 + $0x58] sm:$0xf0] }
  0x4b   :  { %852 = vmatpush.bf16.msra.mxu3 %v3452_v42  ;;  %v3327_v30 = vld [vmem:[%s5609_s1 + $0x1c0] sm:$0xf]  ;;  %v3668_v31 = vld [vmem:[%s5609_s1 + $0x1d4] sm:$0xf0]  ;;  %v3665_v32 = vld [vmem:[%s5609_s1 + $0x1c4] sm:$0xf]  ;;  %v3136_v34 = vor.u32 %v3620_v27, %v3135_v26  ;;  %v3140_v36 = vor.u32 %v3617_v24, %v3137_v29 }
  0x4c   :  { %796 = vmatpush.bf16.msra.mxu0 %v3232_v50  ;;  %v3329_v33 = vld [vmem:[%s5609_s1 + $0x1d8] sm:$0xf0]  ;;  %v3611_v37 = vld [vmem:[%s5609_s1 + $0x14] sm:$0xf]  ;;  %v3328_v38 = vor.u32 %v3668_v31, %v3327_v30  ;;  %v3111_v40 = vld [vmem:[%s5609_s1 + $0x10] sm:$0xf] }
  0x4d   :  { %815 = vmatpush.bf16.msra.mxu1 %v3424_v53  ;;  %v3614_v41 = vld [vmem:[%s5609_s1 + $0x24] sm:$0xf0]  ;;  %v3332_v42 = vor.u32 %v3665_v32, %v3329_v33  ;;  %v3113_v43 = vld [vmem:[%s5609_s1 + $0x28] sm:$0xf0]  ;;  %v3303_v45 = vld [vmem:[%s5609_s1 + $0x190] sm:$0xf] }
  0x4e   :  { %834 = vmatpush.bf16.msra.mxu2 %v3236_v51  ;;  %v3662_v46 = vld [vmem:[%s5609_s1 + $0x1a4] sm:$0xf0]  ;;  %v3659_v47 = vld [vmem:[%s5609_s1 + $0x194] sm:$0xf]  ;;  %v3305_v48 = vld [vmem:[%s5609_s1 + $0x1a8] sm:$0xf0]  ;;  %v3112_v50 = vor.u32 %v3614_v41, %v3111_v40  ;;  %v3116_v51 = vor.u32 %v3611_v37, %v3113_v43 }
  0x4f   :  { %853 = vmatpush.bf16.msra.mxu3 %v3428_v56  ;;  %v3304_v52 = vor.u32 %v3662_v46, %v3303_v45  ;;  %v3308_v53 = vor.u32 %v3659_v47, %v3305_v48  ;;  %v4629_v54 = vld [vmem:[%s5610_s2] sm:$0x3f]  ;;  %s3926_s2 = smov 32   ;;  %s3927_s29 = smov 64   ;;  %vm1020_vm0 = vcmask 261120   ;;  %vm1431_vm1 = vcmask 130048  }
  0x50   :  { %797 = vmatpush.bf16.msra.mxu0 %v3208_v62  ;;  %v4632_v55 = vperm.slane %v4629_v54, 0  ;;  %v4636_v57 = vperm.slane %v4629_v54, 1  ;;  %v152_v20 = vperm.slane %v4629_v54, 2  ;;  %v153_v24 = vperm.slane %v4629_v54, 3  ;;  %s3928_s30 = smov 96   ;;  %s3081_s13 = sshll.u32 %s5619_s11, 4  ;;  %s3082_s13 = int_to_ptr.hbm [resolvable:$true] %s3081_s13 }
  0x51   :  { %816 = vmatpush.bf16.msra.mxu1 %v3400_v1  ;;  %vm2332_vm2 = vcmask 523264   ;;  %vm2337_vm3 = vcmask 785408   ;;  %s3932_s14 = smov 256   ;;  %s3933_s15 = smov 16  }
  0x52   :  { %835 = vmatpush.bf16.msra.mxu2 %v3212_v63 }
  0x53   :  { %854 = vmatpush.bf16.msra.mxu3 %v3404_v4  ;;  %731 = vmatmul.bf16.gmra.mxu0 %v4338_v35 }
  0x54   :  { %798 = vmatpush.bf16.msra.mxu0 %v3184_v10  ;;  %750 = vmatmul.bf16.gmra.mxu1 %v4346_v39 }
  0x55   :  { %817 = vmatpush.bf16.msra.mxu1 %v3376_v13  ;;  %769 = vmatmul.bf16.gmra.mxu2 %v4338_v35 }
  0x56   :  { %836 = vmatpush.bf16.msra.mxu2 %v3188_v11  ;;  %788 = vmatmul.bf16.gmra.mxu3 %v4346_v39 }
  0x57   :  { %855 = vmatpush.bf16.msra.mxu3 %v3380_v16 }
  0x58   :  { %799 = vmatpush.bf16.msra.mxu0 %v3160_v22 }
  0x59   :  { %818 = vmatpush.bf16.msra.mxu1 %v3352_v25 }
  0x5a   :  { %837 = vmatpush.bf16.msra.mxu2 %v3164_v23 }
  0x5b   :  { %856 = vmatpush.bf16.msra.mxu3 %v3356_v28 }
  0x5c   :  { %800 = vmatpush.bf16.msra.mxu0 %v3136_v34 }
  0x5d   :  { %819 = vmatpush.bf16.msra.mxu1 %v3328_v38 }
  0x5e   :  { %838 = vmatpush.bf16.msra.mxu2 %v3140_v36 }
  0x5f   :  { %857 = vmatpush.bf16.msra.mxu3 %v3332_v42 }
  0x60   :  { %801 = vmatpush.bf16.msra.mxu0 %v3112_v50 }
  0x61   :  { %820 = vmatpush.bf16.msra.mxu1 %v3304_v52 }
  0x62   :  { %839 = vmatpush.bf16.msra.mxu2 %v3116_v51 }
  0x63   :  { %858 = vmatpush.bf16.msra.mxu3 %v3308_v53  ;;  %802 = vmatmul.bf16.vlgmr.msra.gmra.mxu0 %v4219_v44 }
  0x64   :  { %821 = vmatmul.bf16.vlgmr.msra.gmra.mxu1 %v4230_v49 }
  0x65   :  { %840 = vmatmul.bf16.vlgmr.msra.gmra.mxu2 %v4219_v44 }
  0x66   :  { %859 = vmatmul.bf16.vlgmr.msra.gmra.mxu3 %v4230_v49 }
  0x73   :  { %807 = vmatmul.bf16.gmra.mxu0 %v4338_v35 }
  0x74   :  { %826 = vmatmul.bf16.gmra.mxu1 %v4346_v39 }
  0x75   :  { %845 = vmatmul.bf16.gmra.mxu2 %v4338_v35 }
  0x76   :  { %864 = vmatmul.bf16.gmra.mxu3 %v4346_v39 }
  0xa0   :  { %v651_v44 = vpop.f32.mrf.mxu0 }
  0xa1   :  { %v670_v56 = vpop.f32.mrf.mxu1  ;;  %v652_v49 = vadd.f32 %v651_v44, %v4632_v55 }
  0xa3   :  { %v671_v58 = vadd.f32 %v670_v56, %v652_v49 }
  0xa8   :  { %v689_v35 = vpop.f32.mrf.mxu2  ;;  %v653_v60 = vpop.f32.mrf.mxu0 }
  0xa9   :  { %v690_v59 = vadd.f32 %v689_v35, %v4636_v57  ;;  %v708_v39 = vpop.f32.mrf.mxu3  ;;  %v672_v61 = vpop.f32.mrf.mxu1  ;;  %v654_v0 = vadd.f32 %v653_v60, %v4632_v55 }
  0xab   :  { %v709_v62 = vadd.f32 %v708_v39, %v690_v59  ;;  %v673_v6 = vadd.f32 %v672_v61, %v654_v0 }
  0xad   :  { %v4639_v63 = vpack.c.bf16 %v709_v62, %v671_v58 }
  0xaf   :  { %914 = vrot.lane.b32.xlu0 %v4639_v63, %s3926_s2  ;;  %902 = vrot.lane.b32.xlu2 %v4639_v63, %s3927_s29 }
  0xb0   :  { %v691_v1 = vpop.f32.mrf.mxu2  ;;  %v656_v4 = vpop.f32.mrf.mxu0 }
  0xb1   :  { %v692_v2 = vadd.f32 %v691_v1, %v4636_v57  ;;  %v710_v3 = vpop.f32.mrf.mxu3  ;;  %v675_v5 = vpop.f32.mrf.mxu1  ;;  %v657_v9 = vadd.f32 %v656_v4, %v4632_v55  ;;  %v1014_v4 = vunpack.c.l.b16 %v4639_v63 }
  0xb3   :  { %v711_v7 = vadd.f32 %v710_v3, %v692_v2  ;;  %v676_v11 = vadd.f32 %v675_v5, %v657_v9 }
  0xb5   :  { %v4647_v8 = vpack.c.bf16 %v711_v7, %v673_v6 }
  0xb7   :  { %904 = vrot.lane.b32.xlu2 %v4647_v8, %s3927_s29  ;;  %v1015_v0 = vunpack.c.l.b16 %v4647_v8 }
  0xb8   :  { %v694_v10 = vpop.f32.mrf.mxu2  ;;  %v4653_v14 = vpop.f32.mrf.mxu0 }
  0xb9   :  { %v695_v12 = vadd.f32 %v694_v10, %v4636_v57  ;;  %v713_v13 = vpop.f32.mrf.mxu3  ;;  %v4655_v15 = vpop.f32.mrf.mxu1  ;;  %v659_v5 = vadd.f32 %v4653_v14, %v4632_v55  ;;  %v1016_v7 = vpack.c.b16 %v1015_v0, %v1014_v4 }
  0xbb   :  { %v714_v16 = vadd.f32 %v713_v13, %v695_v12  ;;  %v678_v13 = vadd.f32 %v4655_v15, %v659_v5 }
  0xbd   :  { %v4657_v17 = vpack.c.bf16 %v714_v16, %v676_v11 }
  0xc0   :  { %v696_v18 = vpop.f32.mrf.mxu2  ;;  %v727_v21 = vpop.f32.mrf.mxu0 }
  0xc1   :  { %v4659_v19 = vpop.f32.mrf.mxu3  ;;  %v746_v22 = vpop.f32.mrf.mxu1  ;;  %v728_v23 = vadd.f32 %v727_v21, %v152_v20  ;;  %v697_v2 = vadd.f32 %v696_v18, %v4636_v57 }
  0xc3   :  { %v747_v26 = vadd.f32 %v746_v22, %v728_v23  ;;  %v716_v57 = vadd.f32 %v4659_v19, %v697_v2  ;;  %v887_v19 = vrot.slane %v4647_v8, 4 }
  0xc5   :  { %v4684_v21 = vpack.c.bf16 %v716_v57, %v678_v13 }
  0xc8   :  { %v765_v25 = vpop.f32.mrf.mxu2  ;;  %v729_v29 = vpop.f32.mrf.mxu0 }
  0xc9   :  { %v766_v27 = vadd.f32 %v765_v25, %v153_v24  ;;  %v784_v28 = vpop.f32.mrf.mxu3  ;;  %v748_v32 = vpop.f32.mrf.mxu1  ;;  %v730_v33 = vadd.f32 %v729_v29, %v152_v20 }
  0xcb   :  { %v785_v30 = vadd.f32 %v784_v28, %v766_v27  ;;  %v749_v40 = vadd.f32 %v748_v32, %v730_v33 }
  0xcd   :  { %v871_v31 = vpack.c.bf16 %v785_v30, %v747_v26  ;;  %v1120_v26 = vunpack.c.l.b16 %v887_v19 }
  0xcf   :  { %958 = vrot.lane.b32.xlu1 %v871_v31, %s3926_s2  ;;  %946 = vrot.lane.b32.xlu0 %v871_v31, %s3927_s29  ;;  %v930_v42 = vrot.slane %v871_v31, 4  ;;  %v1017_v47 = vunpack.c.l.b16 %v871_v31 }
  0xd0   :  { %934 = vrot.lane.b32.xlu2 %v871_v31, %s3928_s30  ;;  %v767_v34 = vpop.f32.mrf.mxu2  ;;  %v732_v38 = vpop.f32.mrf.mxu0  ;;  %v154_v31 = vperm.slane %v4629_v54, 4 }
  0xd1   :  { %v768_v36 = vadd.f32 %v767_v34, %v153_v24  ;;  %v786_v37 = vpop.f32.mrf.mxu3  ;;  %v733_v45 = vadd.f32 %v732_v38, %v152_v20  ;;  %v751_v46 = vpop.f32.mrf.mxu1  ;;  %v1122_v52 = vunpack.c.l.b16 %v930_v42  ;;  %v1224_v42 = vunpack.c.l.b16 %v4684_v21 }
  0xd3   :  { %v787_v41 = vadd.f32 %v786_v37, %v768_v36  ;;  %v752_v44 = vadd.f32 %v751_v46, %v733_v45  ;;  %v1223_v45 = vunpack.c.l.b16 %v4657_v17 }
  0xd5   :  { %v874_v43 = vpack.c.bf16 %v787_v41, %v749_v40 }
  0xd7   :  { %960 = vrot.lane.b32.xlu1 %v874_v43, %s3926_s2  ;;  %948 = vrot.lane.b32.xlu0 %v874_v43, %s3927_s29  ;;  %v1018_v48 = vunpack.c.l.b16 %v874_v43  ;;  %v931_v50 = vrot.slane %v874_v43, 4 }
  0xd8   :  { %892 = vrot.lane.b32.xlu2 %v4647_v8, %s3928_s30  ;;  %v770_v51 = vpop.f32.mrf.mxu2  ;;  %v734_v58 = vpop.f32.mrf.mxu0 }
  0xd9   :  { %v771_v53 = vadd.f32 %v770_v51, %v153_v24  ;;  %v789_v56 = vpop.f32.mrf.mxu3  ;;  %v1019_v49 = vpack.c.b16 %v1018_v48, %v1017_v47  ;;  %v1123_v35 = vunpack.c.l.b16 %v931_v50  ;;  %v735_v1 = vadd.f32 %v734_v58, %v152_v20  ;;  %v753_v3 = vpop.f32.mrf.mxu1 }
  0xda   :  { %v1225_v48 = vpack.c.b16 %v1224_v42, %v1223_v45 }
  0xdb   :  { %v790_v59 = vadd.f32 %v789_v56, %v771_v53  ;;  %v1025_v39 = vsel %vm1020_vm0, %v1019_v49, 0  ;;  %v1124_v60 = vpack.c.b16 %v1123_v35, %v1122_v52  ;;  %v754_v10 = vadd.f32 %v753_v3, %v735_v1 }
  0xdc   :  { %1034 = vmatpush.bf16.xpose.msrb.mxu0 %v1025_v39  ;;  %v889_v49 = vrot.slane %v4684_v21, 4 }
  0xdd   :  { %v877_v61 = vpack.c.bf16 %v790_v59, %v752_v44  ;;  %v1129_v62 = vsel %vm1020_vm0, %v1124_v60, 0  ;;  %v888_v60 = vrot.slane %v4657_v17, 4 }
  0xdf   :  { %916 = vrot.lane.b32.xlu1 %v4647_v8, %s3926_s2  ;;  %936 = vrot.lane.b32.xlu0 %v874_v43, %s3928_s30  ;;  %v1226_v18 = vunpack.c.l.b16 %v877_v61  ;;  %v932_v20 = vrot.slane %v877_v61, 4  ;;  %v1327_v2 = vunpack.c.l.b16 %v888_v60 }
  0xe0   :  { %962 = vrot.lane.b32.xlu2 %v877_v61, %s3926_s2  ;;  %v772_v6 = vpop.f32.mrf.mxu2  ;;  %v803_v30 = vpop.f32.mrf.mxu0 }
  0xe1   :  { %v773_v9 = vadd.f32 %v772_v6, %v153_v24  ;;  %v791_v11 = vpop.f32.mrf.mxu3  ;;  %v1330_v23 = vunpack.c.l.b16 %v932_v20  ;;  %v886_v24 = vrot.slane %v4639_v63, 4  ;;  %v822_v33 = vpop.f32.mrf.mxu1  ;;  %v804_v34 = vadd.f32 %v803_v30, %v154_v31 }
  0xe3   :  { %3477 = vmatmul.msk.bf16.vlgmr.msrb.gmra.mxu0 %vm1020_vm0, %v1016_v7  ;;  %v792_v12 = vadd.f32 %v791_v11, %v773_v9  ;;  %v1119_v28 = vunpack.c.l.b16 %v886_v24  ;;  %v823_v38 = vadd.f32 %v822_v33, %v804_v34 }
  0xe4   :  { %1138 = vmatpush.bf16.xpose.msra.mxu0 %v1129_v62  ;;  %v1328_v62 = vunpack.c.l.b16 %v889_v49 }
  0xe5   :  { %v880_v16 = vpack.c.bf16 %v792_v12, %v754_v10  ;;  %v1121_v29 = vpack.c.b16 %v1120_v26, %v1119_v28 }
  0xe6   :  { %v1329_v6 = vpack.c.b16 %v1328_v62, %v1327_v2 }
  0xe7   :  { %890 = vrot.lane.b32.xlu1 %v4639_v63, %s3928_s30  ;;  %950 = vrot.lane.b32.xlu0 %v877_v61, %s3927_s29  ;;  %v1227_v55 = vunpack.c.l.b16 %v880_v16  ;;  %v933_v14 = vrot.slane %v880_v16, 4  ;;  %v155_v63 = vperm.slane %v4629_v54, 5 }
  0xe8   :  { %908 = vrot.lane.b32.xlu2 %v4684_v21, %s3927_s29  ;;  %v841_v32 = vpop.f32.mrf.mxu2  ;;  %v805_v41 = vpop.f32.mrf.mxu0 }
  0xe9   :  { %v1228_v22 = vpack.c.b16 %v1227_v55, %v1226_v18  ;;  %v1331_v15 = vunpack.c.l.b16 %v933_v14  ;;  %v842_v36 = vadd.f32 %v841_v32, %v155_v63  ;;  %v860_v37 = vpop.f32.mrf.mxu3  ;;  %v824_v46 = vpop.f32.mrf.mxu1  ;;  %v806_v50 = vadd.f32 %v805_v41, %v154_v31 }
  0xeb   :  { %v1233_v25 = vsel %vm1020_vm0, %v1228_v22, 0  ;;  %v1332_v27 = vpack.c.b16 %v1331_v15, %v1330_v23  ;;  %v861_v40 = vadd.f32 %v860_v37, %v842_v36  ;;  %v825_v44 = vadd.f32 %v824_v46, %v806_v50 }
  0xec   :  { %1242 = vmatpush.bf16.xpose.msrb.mxu0 %v1233_v25 }
  0xed   :  { %v1337_v8 = vsel %vm1020_vm0, %v1332_v27, 0  ;;  %v872_v43 = vpack.c.bf16 %v861_v40, %v823_v38 }
  0xef   :  { %952 = vrot.lane.b32.xlu1 %v880_v16, %s3927_s29  ;;  %918 = vrot.lane.b32.xlu0 %v4657_v17, %s3926_s2  ;;  %v1821_v11 = vunpack.c.l.b16 %v872_v43  ;;  %v974_v12 = vrot.slane %v872_v43, 4 }
  0xf0   :  { %938 = vrot.lane.b32.xlu2 %v877_v61, %s3928_s30  ;;  %v843_v54 = vpop.f32.mrf.mxu2  ;;  %v808_v52 = vpop.f32.mrf.mxu0 }
  0xf1   :  { %v862_v47 = vpop.f32.mrf.mxu3  ;;  %v844_v51 = vadd.f32 %v843_v54, %v155_v63  ;;  %v809_v35 = vadd.f32 %v808_v52, %v154_v31  ;;  %v827_v59 = vpop.f32.mrf.mxu1 }
  0xf3   :  { %3481 = vmatmul.msk.bf16.vlgmr.msra.gmra.mxu0 %vm1020_vm0, %v1121_v29  ;;  %v863_v56 = vadd.f32 %v862_v47, %v844_v51  ;;  %v828_v0 = vadd.f32 %v827_v59, %v809_v35 }
  0xf4   :  { %1346 = vmatpush.bf16.xpose.msra.mxu0 %v1337_v8 }
  0xf5   :  { %v875_v61 = vpack.c.bf16 %v863_v56, %v825_v44 }
  0xf7   :  { %906 = vrot.lane.b32.xlu1 %v4657_v17, %s3927_s29  ;;  %964 = vrot.lane.b32.xlu0 %v880_v16, %s3926_s2  ;;  %v1822_v57 = vunpack.c.l.b16 %v875_v61  ;;  %v975_v13 = vrot.slane %v875_v61, 4 }
  0xf8   :  { %896 = vrot.lane.b32.xlu2 %v4684_v21, %s3928_s30  ;;  %v846_v53 = vpop.f32.mrf.mxu2  ;;  %v810_v4 = vpop.f32.mrf.mxu0 }
  0xf9   :  { %v847_v58 = vadd.f32 %v846_v53, %v155_v63  ;;  %v865_v39 = vpop.f32.mrf.mxu3  ;;  %v811_v7 = vadd.f32 %v810_v4, %v154_v31  ;;  %v829_v9 = vpop.f32.mrf.mxu1  ;;  %v1823_v20 = vpack.c.b16 %v1822_v57, %v1821_v11  ;;  %v1926_v55 = vunpack.c.l.b16 %v975_v13 }
  0xfb   :  { %v866_v1 = vadd.f32 %v865_v39, %v847_v58 }
  0xfd   :  { %v4720_v3 = vpack.c.bf16 %v866_v1, %v828_v0 }
  0xff   :  { %920 = vrot.lane.b32.xlu1 %v4684_v21, %s3926_s2  ;;  %940 = vrot.lane.b32.xlu0 %v880_v16, %s3928_s30  ;;  %v830_v16 = vadd.f32 %v829_v9, %v811_v7  ;;  %v1925_v21 = vunpack.c.l.b16 %v974_v12 }
 0x100   :  { %1002 = vrot.lane.b32.xlu2 %v872_v43, %s3926_s2  ;;  %v848_v5 = vpop.f32.mrf.mxu2 }
 0x101   :  { %v867_v10 = vpop.f32.mrf.mxu3  ;;  %v1927_v14 = vpack.c.b16 %v1926_v55, %v1925_v21 }
 0x103   :  { %3485 = vmatmul.msk.bf16.vlgmr.msrb.gmra.mxu0 %vm1020_vm0, %v1225_v48 }
 0x104   :  { %1835 = vmatpush.bf16.msrb.mxu0 %v1823_v20 }
 0x107   :  { %894 = vrot.lane.b32.xlu1 %v4657_v17, %s3928_s30  ;;  %990 = vrot.lane.b32.xlu0 %v872_v43, %s3927_s29  ;;  %v849_v17 = vadd.f32 %v848_v5, %v155_v63 }
 0x108   :  { %1006 = vrot.lane.b32.xlu2 %v4720_v3, %s3926_s2 }
 0x109   :  { %v868_v18 = vadd.f32 %v867_v10, %v849_v17  ;;  %v4736_v22 = vpop.permute.xlu2 %902 }
 0x10a   :  { %v1067_v53 = vunpack.c.l.b16 %v4736_v22  ;;  %v910_v13 = vrot.slane %v4736_v22, 4 }
 0x10b   :  { %v4728_v19 = vpack.c.bf16 %v868_v18, %v830_v16 }
 0x10f   :  { %1004 = vrot.lane.b32.xlu0 %v875_v61, %s3926_s2  ;;  %978 = vrot.lane.b32.xlu1 %v872_v43, %s3928_s30 }
 0x111   :  { %v4738_v23 = vpop.permute.xlu2 %904 }
 0x112   :  { %v1068_v48 = vunpack.c.l.b16 %v4738_v23  ;;  %v911_v11 = vrot.slane %v4738_v23, 4 }
 0x113   :  { %3489 = vmatmul.msk.bf16.vlgmr.msra.gmra.mxu0 %vm1020_vm0, %v1329_v6 }
 0x114   :  { %1939 = vmatpush.bf16.msra.mxu0 %v1927_v14  ;;  %v1069_v60 = vpack.c.b16 %v1068_v48, %v1067_v53  ;;  %v1172_v21 = vunpack.c.l.b16 %v911_v11 }
 0x117   :  { %980 = vrot.lane.b32.xlu0 %v875_v61, %s3928_s30  ;;  %992 = vrot.lane.b32.xlu1 %v875_v61, %s3927_s29 }
 0x11f   :  { %996 = vrot.lane.b32.xlu0 %v4728_v19, %s3927_s29  ;;  %994 = vrot.lane.b32.xlu1 %v4720_v3, %s3927_s29 }
 0x121   :  { %v4740_v15 = vpop.permute.xlu0 %914 }
 0x122   :  { %v1093_v44 = vunpack.c.l.b16 %v4740_v15  ;;  %v922_v16 = vrot.slane %v4740_v15, 4 }
 0x127   :  { %1008 = vrot.lane.b32.xlu0 %v4728_v19, %s3926_s2 }
 0x12a   :  { %v935_v24 = vpop.permute.xlu2 %934 }
 0x12b   :  { %v942_v50 = vrot.slane %v935_v24, 4  ;;  %v1044_v35 = vunpack.c.l.b16 %v935_v24 }
 0x12d   :  { %v1148_v61 = vunpack.c.l.b16 %v942_v50 }
 0x132   :  { %v4742_v63 = vpop.permute.xlu2 %892 }
 0x133   :  { %v1042_v9 = vunpack.c.l.b16 %v4742_v63 }
 0x13a   :  { %v4751_v62 = vpop.permute.xlu2 %962 }
 0x141   :  { %v959_v25 = vpop.permute.xlu1 %958  ;;  %v947_v26 = vpop.permute.xlu0 %946 }
 0x142   :  { %v966_v27 = vrot.slane %v959_v25, 4  ;;  %v954_v28 = vrot.slane %v947_v26, 4  ;;  %v1096_v29 = vunpack.c.l.b16 %v959_v25  ;;  %v1070_v8 = vunpack.c.l.b16 %v947_v26  ;;  %v4761_v18 = vpop.permute.xlu2 %908 }
 0x143   :  { %v1171_v25 = vunpack.c.l.b16 %v910_v13 }
 0x144   :  { %v1200_v37 = vunpack.c.l.b16 %v966_v27  ;;  %v1174_v38 = vunpack.c.l.b16 %v954_v28  ;;  %v1197_v27 = vunpack.c.l.b16 %v922_v16 }
 0x149   :  { %v961_v30 = vpop.permute.xlu1 %960  ;;  %v949_v31 = vpop.permute.xlu0 %948 }
 0x14a   :  { %v967_v32 = vrot.slane %v961_v30, 4  ;;  %v1097_v33 = vunpack.c.l.b16 %v961_v30  ;;  %v955_v34 = vrot.slane %v949_v31, 4  ;;  %v1071_v36 = vunpack.c.l.b16 %v949_v31 }
 0x14c   :  { %v1098_v40 = vpack.c.b16 %v1097_v33, %v1096_v29  ;;  %v1201_v41 = vunpack.c.l.b16 %v967_v32  ;;  %v1072_v54 = vpack.c.b16 %v1071_v36, %v1070_v8  ;;  %v1175_v42 = vunpack.c.l.b16 %v955_v34 }
 0x14d   :  { %v1173_v8 = vpack.c.b16 %v1172_v21, %v1171_v25  ;;  %v899_v34 = vrot.slane %v4742_v63, 4 }
 0x14e   :  { %v1202_v43 = vpack.c.b16 %v1201_v41, %v1200_v37  ;;  %v1176_v45 = vpack.c.b16 %v1175_v42, %v1174_v38  ;;  %v1077_v46 = vsel %vm1020_vm0, %v1072_v54, 0  ;;  %v1103_v47 = vsel %vm1020_vm0, %v1098_v40, 0  ;;  %v939_v40 = vpop.permute.xlu2 %938 }
 0x14f   :  { %1086 = vmatpush.bf16.xpose.msrb.mxu2 %v1077_v46  ;;  %1112 = vmatpush.bf16.xpose.msrb.mxu3 %v1103_v47  ;;  %v968_v38 = vrot.slane %v4751_v62, 4  ;;  %v1146_v46 = vunpack.c.l.b16 %v899_v34  ;;  %v1304_v47 = vunpack.c.l.b16 %v4751_v62 }
 0x150   :  { %v1207_v51 = vsel %vm1020_vm0, %v1202_v43, 0  ;;  %v1181_v52 = vsel %vm1020_vm0, %v1176_v45, 0 }
 0x151   :  { %v917_v56 = vpop.permute.xlu1 %916  ;;  %v937_v49 = vpop.permute.xlu0 %936 }
 0x152   :  { %v1094_v58 = vunpack.c.l.b16 %v917_v56  ;;  %v943_v59 = vrot.slane %v937_v49, 4  ;;  %v1045_v39 = vunpack.c.l.b16 %v937_v49  ;;  %v923_v57 = vrot.slane %v917_v56, 4 }
 0x154   :  { %v1095_v0 = vpack.c.b16 %v1094_v58, %v1093_v44  ;;  %v1046_v1 = vpack.c.b16 %v1045_v39, %v1044_v35  ;;  %v1149_v2 = vunpack.c.l.b16 %v943_v59  ;;  %v1198_v55 = vunpack.c.l.b16 %v923_v57 }
 0x155   :  { %v944_v35 = vrot.slane %v939_v40, 4 }
 0x156   :  { %v1150_v4 = vpack.c.b16 %v1149_v2, %v1148_v61  ;;  %3479 = vmatmul.msk.bf16.vlgmr.msrb.gmra.mxu2 %vm1020_vm0, %v1069_v60  ;;  %3480 = vmatmul.msk.bf16.vlgmr.msrb.gmra.mxu3 %vm1020_vm0, %v1095_v0  ;;  %v1051_v5 = vsel %vm1020_vm0, %v1046_v1, 0  ;;  %v1199_v30 = vpack.c.b16 %v1198_v55, %v1197_v27  ;;  %v1276_v60 = vunpack.c.l.b16 %v4761_v18 }
 0x157   :  { %1216 = vmatpush.bf16.xpose.msra.mxu3 %v1207_v51  ;;  %1190 = vmatpush.bf16.xpose.msra.mxu2 %v1181_v52  ;;  %v1408_v51 = vunpack.c.l.b16 %v968_v38  ;;  %v1252_v61 = vunpack.c.l.b16 %v939_v40 }
 0x158   :  { %1060 = vmatpush.bf16.xpose.msrb.mxu1 %v1051_v5  ;;  %v1155_v6 = vsel %vm1020_vm0, %v1150_v4, 0 }
 0x159   :  { %v891_v7 = vpop.permute.xlu1 %890  ;;  %v951_v17 = vpop.permute.xlu0 %950 }
 0x15a   :  { %v1041_v10 = vunpack.c.l.b16 %v891_v7  ;;  %v956_v20 = vrot.slane %v951_v17, 4  ;;  %v1278_v14 = vunpack.c.l.b16 %v951_v17  ;;  %v898_v31 = vrot.slane %v891_v7, 4  ;;  %v897_v17 = vpop.permute.xlu2 %896 }
 0x15b   :  { %v1356_v7 = vunpack.c.l.b16 %v944_v35  ;;  %v1250_v25 = vunpack.c.l.b16 %v897_v17 }
 0x15c   :  { %v1043_v12 = vpack.c.b16 %v1042_v9, %v1041_v10  ;;  %v1382_v15 = vunpack.c.l.b16 %v956_v20  ;;  %v1145_v41 = vunpack.c.l.b16 %v898_v31 }
 0x15e   :  { %v1147_v52 = vpack.c.b16 %v1146_v46, %v1145_v41 }
 0x15f   :  { %3478 = vmatmul.msk.bf16.vlgmr.msrb.gmra.mxu1 %vm1020_vm0, %v1043_v12 }
 0x160   :  { %1164 = vmatpush.bf16.xpose.msra.mxu1 %v1155_v6  ;;  %v4764_v24 = vpop.f32.mrf.mxu0 }
 0x161   :  { %v953_v26 = vpop.permute.xlu1 %952  ;;  %v4766_v23 = vpop.permute.xlu0 %918  ;;  %v1432_v22 = vsel %vm1431_vm1, %v4764_v24, -inf }
 0x162   :  { %v957_v28 = vrot.slane %v953_v26, 4  ;;  %v1279_v29 = vunpack.c.l.b16 %v953_v26  ;;  %1433 = vmax.xlane.f32.xlu2 %v1432_v22  ;;  %v1301_v2 = vunpack.c.l.b16 %v4766_v23  ;;  %v1003_v22 = vpop.permute.xlu2 %1002 }
 0x163   :  { %v1899_v34 = vunpack.c.l.b16 %v1003_v22 }
 0x164   :  { %v1280_v32 = vpack.c.b16 %v1279_v29, %v1278_v14  ;;  %v1383_v33 = vunpack.c.l.b16 %v957_v28  ;;  %v913_v29 = vrot.slane %v4761_v18, 4 }
 0x166   :  { %v1384_v36 = vpack.c.b16 %v1383_v33, %v1382_v15  ;;  %3483 = vmatmul.msk.bf16.vlgmr.msra.gmra.mxu2 %vm1020_vm0, %v1173_v8  ;;  %3484 = vmatmul.msk.bf16.vlgmr.msra.gmra.mxu3 %vm1020_vm0, %v1199_v30  ;;  %v1285_v37 = vsel %vm1020_vm0, %v1280_v32, 0  ;;  %v924_v8 = vrot.slane %v4766_v23, 4  ;;  %v1010_v30 = vrot.slane %v1003_v22, 4 }
 0x167   :  { %1294 = vmatpush.bf16.xpose.msrb.mxu2 %v1285_v37 }
 0x168   :  { %v4775_v54 = vpop.f32.mrf.mxu0  ;;  %v1389_v42 = vsel %vm1020_vm0, %v1384_v36, 0  ;;  %v1380_v36 = vunpack.c.l.b16 %v913_v29  ;;  %v1405_v41 = vunpack.c.l.b16 %v924_v8 }
 0x169   :  { %v907_v43 = vpop.permute.xlu1 %906  ;;  %v965_v45 = vpop.permute.xlu0 %964  ;;  %v1435_v63 = vsel %vm1431_vm1, %v4775_v54, -inf }
 0x16a   :  { %v969_v48 = vrot.slane %v965_v45, 4  ;;  %v1305_v50 = vunpack.c.l.b16 %v965_v45  ;;  %1436 = vmax.xlane.f32.xlu0 %v1435_v63  ;;  %v1275_v58 = vunpack.c.l.b16 %v907_v43  ;;  %v912_v27 = vrot.slane %v907_v43, 4 }
 0x16b   :  { %v2003_v43 = vunpack.c.l.b16 %v1010_v30 }
 0x16c   :  { %v1306_v53 = vpack.c.b16 %v1305_v50, %v1304_v47  ;;  %v1409_v44 = vunpack.c.l.b16 %v969_v48  ;;  %v1277_v9 = vpack.c.b16 %v1276_v60, %v1275_v58  ;;  %v1379_v31 = vunpack.c.l.b16 %v912_v27 }
 0x16d   :  { %v901_v48 = vrot.slane %v897_v17, 4 }
 0x16e   :  { %v1410_v56 = vpack.c.b16 %v1409_v44, %v1408_v51  ;;  %v1311_v49 = vsel %vm1020_vm0, %v1306_v53, 0  ;;  %v1381_v45 = vpack.c.b16 %v1380_v36, %v1379_v31 }
 0x16f   :  { %1398 = vmatpush.bf16.xpose.msra.mxu2 %v1389_v42  ;;  %3482 = vmatmul.msk.bf16.vlgmr.msra.gmra.mxu1 %vm1020_vm0, %v1147_v52  ;;  %v1354_v35 = vunpack.c.l.b16 %v901_v48 }
 0x170   :  { %1320 = vmatpush.bf16.xpose.msrb.mxu3 %v1311_v49  ;;  %v4783_v59 = vpop.f32.mrf.mxu0  ;;  %v1415_v39 = vsel %vm1020_vm0, %v1410_v56, 0 }
 0x171   :  { %v921_v62 = vpop.permute.xlu1 %920  ;;  %v941_v0 = vpop.permute.xlu0 %940  ;;  %v1456_v1 = vsel %vm1431_vm1, %v4783_v59, -inf }
 0x172   :  { %v1302_v4 = vunpack.c.l.b16 %v921_v62  ;;  %v945_v5 = vrot.slane %v941_v0, 4  ;;  %v1253_v6 = vunpack.c.l.b16 %v941_v0  ;;  %1457 = vmax.xlane.f32.xlu1 %v1456_v1  ;;  %v925_v15 = vrot.slane %v921_v62, 4 }
 0x174   :  { %v1303_v10 = vpack.c.b16 %v1302_v4, %v1301_v2  ;;  %v1254_v11 = vpack.c.b16 %v1253_v6, %v1252_v61  ;;  %v1357_v57 = vunpack.c.l.b16 %v945_v5  ;;  %v1406_v32 = vunpack.c.l.b16 %v925_v15 }
 0x176   :  { %v1358_v12 = vpack.c.b16 %v1357_v57, %v1356_v7  ;;  %3487 = vmatmul.msk.bf16.vlgmr.msrb.gmra.mxu2 %vm1020_vm0, %v1277_v9  ;;  %v1259_v13 = vsel %vm1020_vm0, %v1254_v11, 0  ;;  %v1407_v63 = vpack.c.b16 %v1406_v32, %v1405_v41 }
 0x177   :  { %3488 = vmatmul.msk.bf16.vlgmr.msrb.gmra.mxu3 %vm1020_vm0, %v1303_v10  ;;  %1268 = vmatpush.bf16.xpose.msrb.mxu1 %v1259_v13 }
 0x178   :  { %1424 = vmatpush.bf16.xpose.msra.mxu3 %v1415_v39  ;;  %v4793_v16 = vpop.f32.mrf.mxu0  ;;  %v1363_v20 = vsel %vm1020_vm0, %v1358_v12, 0 }
 0x179   :  { %v895_v21 = vpop.permute.xlu1 %894  ;;  %v1459_v55 = vsel %vm1431_vm1, %v4793_v16, -inf  ;;  %v991_v14 = vpop.permute.xlu0 %990 }
 0x17a   :  { %v1249_v26 = vunpack.c.l.b16 %v895_v21  ;;  %1460 = vmax.xlane.f32.xlu2 %v1459_v55  ;;  %v900_v23 = vrot.slane %v895_v21, 4  ;;  %v998_v50 = vrot.slane %v991_v14, 4  ;;  %v1873_v56 = vunpack.c.l.b16 %v991_v14  ;;  %v4820_v21 = vpop.permute.xlu2 %1006 }
 0x17c   :  { %v1251_v28 = vpack.c.b16 %v1250_v25, %v1249_v26  ;;  %v1353_v53 = vunpack.c.l.b16 %v900_v23  ;;  %v1977_v39 = vunpack.c.l.b16 %v998_v50 }
 0x17e   :  { %v1355_v5 = vpack.c.b16 %v1354_v35, %v1353_v53 }
 0x17f   :  { %1372 = vmatpush.bf16.xpose.msra.mxu1 %v1363_v20 }
 0x180   :  { %3486 = vmatmul.msk.bf16.vlgmr.msrb.gmra.mxu1 %vm1020_vm0, %v1251_v28  ;;  %v4801_v33 = vpop.f32.mrf.mxu0 }
 0x181   :  { %v1480_v37 = vsel %vm1431_vm1, %v4801_v33, -inf  ;;  %v1005_v38 = vpop.permute.xlu0 %1004  ;;  %v979_v40 = vpop.permute.xlu1 %978 }
 0x182   :  { %1481 = vmax.xlane.f32.xlu2 %v1480_v37  ;;  %v1011_v42 = vrot.slane %v1005_v38, 4  ;;  %v1900_v18 = vunpack.c.l.b16 %v1005_v38  ;;  %v986_v51 = vrot.slane %v979_v40, 4  ;;  %v1847_v49 = vunpack.c.l.b16 %v979_v40 }
 0x184   :  { %v2004_v46 = vunpack.c.l.b16 %v1011_v42  ;;  %v1901_v47 = vpack.c.b16 %v1900_v18, %v1899_v34  ;;  %v1951_v61 = vunpack.c.l.b16 %v986_v51 }
 0x186   :  { %3491 = vmatmul.msk.bf16.vlgmr.msra.gmra.mxu2 %vm1020_vm0, %v1381_v45  ;;  %v2005_v52 = vpack.c.b16 %v2004_v46, %v2003_v43  ;;  %1913 = vmatpush.bf16.msrb.mxu3 %v1901_v47 }
 0x187   :  { %3492 = vmatmul.msk.bf16.vlgmr.msra.gmra.mxu3 %vm1020_vm0, %v1407_v63 }
 0x188   :  { %v4807_v44 = vpop.f32.mrf.mxu0 }
 0x189   :  { %v1483_v58 = vsel %vm1431_vm1, %v4807_v44, -inf  ;;  %v981_v60 = vpop.permute.xlu0 %980  ;;  %v993_v62 = vpop.permute.xlu1 %992 }
 0x18a   :  { %2017 = vmatpush.bf16.msra.mxu3 %v2005_v52  ;;  %1484 = vmax.xlane.f32.xlu1 %v1483_v58  ;;  %v987_v0 = vrot.slane %v981_v60, 4  ;;  %v1848_v1 = vunpack.c.l.b16 %v981_v60  ;;  %v999_v2 = vrot.slane %v993_v62, 4  ;;  %v1874_v4 = vunpack.c.l.b16 %v993_v62 }
 0x18c   :  { %v1952_v6 = vunpack.c.l.b16 %v987_v0  ;;  %v1849_v7 = vpack.c.b16 %v1848_v1, %v1847_v49  ;;  %v1875_v17 = vpack.c.b16 %v1874_v4, %v1873_v56  ;;  %v1978_v9 = vunpack.c.l.b16 %v999_v2 }
 0x18e   :  { %v1953_v10 = vpack.c.b16 %v1952_v6, %v1951_v61  ;;  %v1979_v11 = vpack.c.b16 %v1978_v9, %v1977_v39  ;;  %1887 = vmatpush.bf16.msrb.mxu2 %v1875_v17  ;;  %1861 = vmatpush.bf16.msrb.mxu1 %v1849_v7 }
 0x190   :  { %3490 = vmatmul.msk.bf16.vlgmr.msra.gmra.mxu1 %vm1020_vm0, %v1355_v5  ;;  %v4812_v57 = vpop.f32.mrf.mxu0 }
 0x191   :  { %v1504_v12 = vsel %vm1431_vm1, %v4812_v57, -inf }
 0x192   :  { %1965 = vmatpush.bf16.msra.mxu1 %v1953_v10  ;;  %1991 = vmatpush.bf16.msra.mxu2 %v1979_v11 }
 0x193   :  { %1505 = vmax.xlane.f32.xlu0 %v1504_v12 }
 0x198   :  { %v4816_v13 = vpop.f32.mrf.mxu0 }
 0x199   :  { %v1507_v20 = vsel %vm1431_vm1, %v4816_v13, -inf }
 0x19a   :  { %1508 = vmax.xlane.f32.xlu2 %v1507_v20  ;;  %v4923_v20 = vpop.permute.xlu0 %996 }
 0x1d5   :  { %v1434_v55 = vpop.xlane.xlu2 %1433 }
 0x1d6   :  { %v1528_v22 = vsub.f32 %v4764_v24, %v1434_v55 }
 0x1d8   :  { %v1560_v28 = vmul.f32 1.442695, %v1528_v22 }
 0x1d9   :  { %v4822_v14 = vpop.f32.mrf.mxu2  ;;  %v4824_v25 = vpop.f32.mrf.mxu3 }
 0x1da   :  { %v1450_v26 = vsel %vm1431_vm1, %v4824_v25, -inf  ;;  %3738 = vpow2.f32 %v1560_v28  ;;  %v1444_v32 = vsel %vm1431_vm1, %v4822_v14, -inf }
 0x1db   :  { %1451 = vmax.xlane.f32.xlu2 %v1450_v26  ;;  %v4927_v26 = vpop.permute.xlu0 %1008 }
 0x1dc   :  { %v4829_v27 = vpop.f32.mrf.mxu1 }
 0x1dd   :  { %v1438_v15 = vsel %vm1431_vm1, %v4829_v27, -inf }
 0x1de   :  { %1439 = vmax.xlane.f32.xlu0 %v1438_v15  ;;  %v4931_v15 = vpop.permute.xlu1 %994 }
 0x1e0   :  { %v4845_v34 = vpop.eup %3738 }
 0x1e1   :  { %v4833_v29 = vpop.f32.mrf.mxu2  ;;  %v4835_v8 = vpop.f32.mrf.mxu3  ;;  %v1624_v41 = vsel %vm1431_vm1, %v4845_v34, 0.0 }
 0x1e2   :  { %v1453_v30 = vsel %vm1431_vm1, %v4835_v8, -inf  ;;  %v1447_v63 = vsel %vm1431_vm1, %v4833_v29, -inf }
 0x1e3   :  { %1454 = vmax.xlane.f32.xlu2 %v1453_v30  ;;  %v4933_v28 = vpop.xlane.xlu0 %1436 }
 0x1e4   :  { %v4839_v31 = vpop.f32.mrf.mxu1 }
 0x1e5   :  { %v1441_v24 = vsel %vm1431_vm1, %v4839_v31, -inf }
 0x1e6   :  { %1442 = vmax.xlane.f32.xlu1 %v1441_v24  ;;  %1445 = vmax.xlane.f32.xlu0 %v1444_v32  ;;  %v4937_v24 = vpop.xlane.xlu1 %1457 }
 0x1e9   :  { %v4847_v36 = vpop.f32.mrf.mxu2  ;;  %v4849_v37 = vpop.f32.mrf.mxu3 }
 0x1ea   :  { %v1468_v38 = vsel %vm1431_vm1, %v4847_v36, -inf  ;;  %v1474_v52 = vsel %vm1431_vm1, %v4849_v37, -inf }
 0x1eb   :  { %1469 = vmax.xlane.f32.xlu2 %v1468_v38 }
 0x1ec   :  { %v4853_v40 = vpop.f32.mrf.mxu1 }
 0x1ed   :  { %v1462_v42 = vsel %vm1431_vm1, %v4853_v40, -inf  ;;  %v4925_v55 = vpop.xlane.xlu2 %1460 }
 0x1ee   :  { %1625 = vadd.xlane.f32.xlu1 %v1624_v41  ;;  %1463 = vmax.xlane.f32.xlu0 %v1462_v42 }
 0x1f1   :  { %v4859_v18 = vpop.f32.mrf.mxu2  ;;  %v4861_v43 = vpop.f32.mrf.mxu3 }
 0x1f2   :  { %v1477_v23 = vsel %vm1431_vm1, %v4861_v43, -inf  ;;  %v1471_v46 = vsel %vm1431_vm1, %v4859_v18, -inf }
 0x1f3   :  { %1478 = vmax.xlane.f32.xlu2 %v1477_v23 }
 0x1f4   :  { %v4865_v45 = vpop.f32.mrf.mxu1 }
 0x1f5   :  { %v1465_v39 = vsel %vm1431_vm1, %v4865_v45, -inf  ;;  %v4929_v22 = vpop.xlane.xlu2 %1481 }
 0x1f6   :  { %1448 = vmax.xlane.f32.xlu1 %v1447_v63  ;;  %1472 = vmax.xlane.f32.xlu0 %v1471_v46 }
 0x1f9   :  { %v4871_v47 = vpop.f32.mrf.mxu2 }
 0x1fa   :  { %v4873_v48 = vpop.f32.mrf.mxu3  ;;  %v1492_v50 = vsel %vm1431_vm1, %v4871_v47, -inf }
 0x1fb   :  { %1493 = vmax.xlane.f32.xlu2 %v1492_v50  ;;  %v1498_v0 = vsel %vm1431_vm1, %v4873_v48, -inf }
 0x1fd   :  { %v4877_v51 = vpop.f32.mrf.mxu1  ;;  %v4942_v42 = vpop.xlane.xlu1 %1484 }
 0x1fe   :  { %v1486_v53 = vsel %vm1431_vm1, %v4877_v51, -inf  ;;  %1475 = vmax.xlane.f32.xlu1 %v1474_v52 }
 0x1ff   :  { %1487 = vmax.xlane.f32.xlu0 %v1486_v53 }
 0x201   :  { %v4883_v56 = vpop.f32.mrf.mxu2 }
 0x202   :  { %v4885_v49 = vpop.f32.mrf.mxu3  ;;  %v1495_v60 = vsel %vm1431_vm1, %v4883_v56, -inf }
 0x203   :  { %v1501_v35 = vsel %vm1431_vm1, %v4885_v49, -inf }
 0x204   :  { %1502 = vmax.xlane.f32.xlu2 %v1501_v35 }
 0x205   :  { %v4889_v58 = vpop.f32.mrf.mxu1 }
 0x206   :  { %1466 = vmax.xlane.f32.xlu1 %v1465_v39  ;;  %v1489_v5 = vsel %vm1431_vm1, %v4889_v58, -inf  ;;  %v4939_v32 = vpop.xlane.xlu0 %1505 }
 0x207   :  { %1496 = vmax.xlane.f32.xlu0 %v1495_v60 }
 0x209   :  { %v4903_v2 = vpop.f32.mrf.mxu2 }
 0x20a   :  { %v4895_v61 = vpop.f32.mrf.mxu3  ;;  %v1516_v10 = vsel %vm1431_vm1, %v4903_v2, -inf }
 0x20b   :  { %v1522_v1 = vsel %vm1431_vm1, %v4895_v61, -inf }
 0x20d   :  { %v4897_v62 = vpop.f32.mrf.mxu1  ;;  %v4935_v30 = vpop.xlane.xlu2 %1508 }
 0x20e   :  { %1499 = vmax.xlane.f32.xlu1 %v1498_v0  ;;  %v1510_v17 = vsel %vm1431_vm1, %v4897_v62, -inf }
 0x20f   :  { %1523 = vmax.xlane.f32.xlu0 %v1522_v1 }
 0x211   :  { %v4911_v7 = vpop.f32.mrf.mxu2 }
 0x212   :  { %v1519_v9 = vsel %vm1431_vm1, %v4911_v7, -inf  ;;  %v4919_v11 = vpop.f32.mrf.mxu3 }
 0x213   :  { %v1525_v12 = vsel %vm1431_vm1, %v4919_v11, -inf }
 0x215   :  { %v4905_v4 = vpop.f32.mrf.mxu1 }
 0x216   :  { %v1513_v6 = vsel %vm1431_vm1, %v4905_v4, -inf  ;;  %1490 = vmax.xlane.f32.xlu1 %v1489_v5 }
 0x217   :  { %1514 = vmax.xlane.f32.xlu2 %v1513_v6 }
 0x21e   :  { %1511 = vmax.xlane.f32.xlu1 %v1510_v17 }
 0x21f   :  { %1520 = vmax.xlane.f32.xlu2 %v1519_v9 }
 0x226   :  { %1517 = vmax.xlane.f32.xlu1 %v1516_v10 }
 0x22e   :  { %1526 = vmax.xlane.f32.xlu1 %v1525_v12 }
 0x24e   :  { %v1452_v38 = vpop.xlane.xlu2 %1451 }
 0x24f   :  { %v1534_v41 = vsub.f32 %v4824_v25, %v1452_v38 }
 0x251   :  { %v1440_v23 = vpop.xlane.xlu0 %1439  ;;  %v1572_v63 = vmul.f32 1.442695, %v1534_v41 }
 0x252   :  { %v1530_v46 = vsub.f32 %v4829_v27, %v1440_v23 }
 0x253   :  { %3740 = vpow2.f32 %v1572_v63 }
 0x254   :  { %v1564_v50 = vmul.f32 1.442695, %v1530_v46 }
 0x256   :  { %3742 = vpow2.f32 %v1564_v50  ;;  %v1455_v52 = vpop.xlane.xlu2 %1454 }
 0x257   :  { %v1535_v53 = vsub.f32 %v4835_v8, %v1455_v52 }
 0x259   :  { %v1443_v35 = vpop.xlane.xlu1 %1442  ;;  %v1446_v39 = vpop.xlane.xlu0 %1445  ;;  %v1574_v0 = vmul.f32 1.442695, %v1535_v53 }
 0x25a   :  { %v4946_v60 = vpop.eup %3740  ;;  %v1531_v1 = vsub.f32 %v4839_v31, %v1443_v35  ;;  %v1532_v25 = vsub.f32 %v4822_v14, %v1446_v39 }
 0x25b   :  { %v1642_v5 = vsel %vm1431_vm1, %v4946_v60, 0.0  ;;  %3744 = vpow2.f32 %v1574_v0 }
 0x25c   :  { %v4952_v6 = vpop.eup %3742  ;;  %v1566_v27 = vmul.f32 1.442695, %v1531_v1  ;;  %v1568_v17 = vmul.f32 1.442695, %v1532_v25  ;;  %1643 = vadd.xlane.f32.xlu0 %v1642_v5 }
 0x25d   :  { %v1630_v8 = vsel %vm1431_vm1, %v4952_v6, 0.0 }
 0x25e   :  { %3746 = vpow2.f32 %v1566_v27  ;;  %1631 = vadd.xlane.f32.xlu2 %v1630_v8  ;;  %v1470_v9 = vpop.xlane.xlu2 %1469 }
 0x25f   :  { %3748 = vpow2.f32 %v1568_v17  ;;  %v1540_v31 = vsub.f32 %v4847_v36, %v1470_v9 }
 0x261   :  { %v4957_v10 = vpop.xlane.xlu1 %1625  ;;  %v1464_v14 = vpop.xlane.xlu0 %1463  ;;  %v1584_v38 = vmul.f32 1.442695, %v1540_v31 }
 0x262   :  { %v4959_v12 = vpop.eup %3744  ;;  %v1538_v41 = vsub.f32 %v4853_v40, %v1464_v14 }
 0x263   :  { %v1645_v23 = vsel %vm1431_vm1, %v4959_v12, 0.0  ;;  %3750 = vpow2.f32 %v1584_v38 }
 0x264   :  { %v4964_v63 = vpop.eup %3746  ;;  %v1580_v46 = vmul.f32 1.442695, %v1538_v41  ;;  %1646 = vadd.xlane.f32.xlu1 %v1645_v23 }
 0x265   :  { %v4966_v50 = vpop.eup %3748  ;;  %v1633_v36 = vsel %vm1431_vm1, %v4964_v63, 0.0 }
 0x266   :  { %3752 = vpow2.f32 %v1580_v46  ;;  %v1636_v52 = vsel %vm1431_vm1, %v4966_v50, 0.0  ;;  %1634 = vadd.xlane.f32.xlu0 %v1633_v36  ;;  %v1479_v40 = vpop.xlane.xlu2 %1478 }
 0x267   :  { %1637 = vadd.xlane.f32.xlu2 %v1636_v52  ;;  %v1543_v53 = vsub.f32 %v4861_v43, %v1479_v40 }
 0x269   :  { %v1449_v35 = vpop.xlane.xlu1 %1448  ;;  %v1473_v39 = vpop.xlane.xlu0 %1472  ;;  %v1590_v0 = vmul.f32 1.442695, %v1543_v53 }
 0x26a   :  { %v1533_v1 = vsub.f32 %v4833_v29, %v1449_v35  ;;  %v1541_v25 = vsub.f32 %v4859_v18, %v1473_v39  ;;  %v4975_v5 = vpop.eup %3750 }
 0x26b   :  { %3754 = vpow2.f32 %v1590_v0  ;;  %v1660_v43 = vsel %vm1431_vm1, %v4975_v5, 0.0 }
 0x26c   :  { %v4977_v27 = vpop.eup %3752  ;;  %v1570_v17 = vmul.f32 1.442695, %v1533_v1  ;;  %v1586_v8 = vmul.f32 1.442695, %v1541_v25 }
 0x26d   :  { %v1654_v9 = vsel %vm1431_vm1, %v4977_v27, 0.0 }
 0x26e   :  { %3756 = vpow2.f32 %v1570_v17  ;;  %1655 = vadd.xlane.f32.xlu1 %v1654_v9 }
 0x26f   :  { %3758 = vpow2.f32 %v1586_v8  ;;  %1661 = vadd.xlane.f32.xlu2 %v1660_v43  ;;  %v1529_v43 = vsub.f32 %v4775_v54, %v4933_v28 }
 0x271   :  { %v1476_v29 = vpop.xlane.xlu1 %1475  ;;  %v4985_v38 = vpop.eup %3754 }
 0x272   :  { %v1488_v31 = vpop.xlane.xlu0 %1487  ;;  %v1542_v18 = vsub.f32 %v4849_v37, %v1476_v29  ;;  %v1669_v37 = vsel %vm1431_vm1, %v4985_v38, 0.0 }
 0x273   :  { %v1546_v14 = vsub.f32 %v4877_v51, %v1488_v31  ;;  %v1494_v51 = vpop.xlane.xlu2 %1493  ;;  %v1562_v31 = vmul.f32 1.442695, %v1529_v43 }
 0x274   :  { %v4987_v41 = vpop.eup %3756  ;;  %v1588_v23 = vmul.f32 1.442695, %v1542_v18  ;;  %v1548_v25 = vsub.f32 %v4871_v47, %v1494_v51 }
 0x275   :  { %v1596_v46 = vmul.f32 1.442695, %v1546_v14  ;;  %v4989_v36 = vpop.eup %3758  ;;  %v1639_v52 = vsel %vm1431_vm1, %v4987_v41, 0.0 }
 0x276   :  { %3760 = vpow2.f32 %v1588_v23  ;;  %1640 = vadd.xlane.f32.xlu0 %v1639_v52  ;;  %v1663_v40 = vsel %vm1431_vm1, %v4989_v36, 0.0 }
 0x277   :  { %3762 = vpow2.f32 %v1596_v46  ;;  %1664 = vadd.xlane.f32.xlu1 %v1663_v40  ;;  %1670 = vadd.xlane.f32.xlu2 %v1669_v37 }
 0x279   :  { %v1467_v53 = vpop.xlane.xlu1 %1466 }
 0x27a   :  { %v1497_v35 = vpop.xlane.xlu0 %1496  ;;  %v1539_v39 = vsub.f32 %v4865_v45, %v1467_v53 }
 0x27b   :  { %v1549_v0 = vsub.f32 %v4883_v56, %v1497_v35  ;;  %v1600_v56 = vmul.f32 1.442695, %v1548_v25  ;;  %v5010_v47 = vpop.xlane.xlu2 %1502 }
 0x27c   :  { %v4999_v1 = vpop.eup %3760  ;;  %v1582_v17 = vmul.f32 1.442695, %v1539_v39 }
 0x27d   :  { %v1602_v8 = vmul.f32 1.442695, %v1549_v0  ;;  %v5002_v9 = vpop.eup %3762  ;;  %v1666_v29 = vsel %vm1431_vm1, %v4999_v1, 0.0 }
 0x27e   :  { %3764 = vpow2.f32 %v1582_v17  ;;  %1667 = vadd.xlane.f32.xlu0 %v1666_v29  ;;  %v1678_v45 = vsel %vm1431_vm1, %v5002_v9, 0.0 }
 0x27f   :  { %3766 = vpow2.f32 %v1602_v8  ;;  %1679 = vadd.xlane.f32.xlu2 %v1678_v45 }
 0x280   :  { %3768 = vpow2.f32 %v1600_v56 }
 0x281   :  { %v1500_v18 = vpop.xlane.xlu1 %1499  ;;  %3770 = vpow2.f32 %v1562_v31 }
 0x282   :  { %v1550_v14 = vsub.f32 %v4873_v48, %v1500_v18  ;;  %v1524_v23 = vpop.xlane.xlu0 %1523 }
 0x283   :  { %v1558_v52 = vsub.f32 %v4895_v61, %v1524_v23 }
 0x284   :  { %v5013_v46 = vpop.eup %3764  ;;  %v1604_v54 = vmul.f32 1.442695, %v1550_v14 }
 0x285   :  { %v5015_v28 = vpop.eup %3766  ;;  %v1657_v40 = vsel %vm1431_vm1, %v5013_v46, 0.0  ;;  %v1620_v48 = vmul.f32 1.442695, %v1558_v52 }
 0x286   :  { %3772 = vpow2.f32 %v1604_v54  ;;  %1658 = vadd.xlane.f32.xlu0 %v1657_v40  ;;  %v1687_v37 = vsel %vm1431_vm1, %v5015_v28, 0.0  ;;  %v5022_v35 = vpop.eup %3768  ;;  %v1536_v54 = vsub.f32 %v4783_v59, %v4937_v24  ;;  %v1545_v59 = vsub.f32 %v4807_v44, %v4942_v42 }
 0x287   :  { %1688 = vadd.xlane.f32.xlu2 %v1687_v37  ;;  %v5025_v0 = vpop.eup %3770  ;;  %3774 = vpow2.f32 %v1620_v48  ;;  %v1684_v8 = vsel %vm1431_vm1, %v5022_v35, 0.0 }
 0x288   :  { %v1627_v43 = vsel %vm1431_vm1, %v5025_v0, 0.0 }
 0x289   :  { %v1491_v51 = vpop.xlane.xlu1 %1490 }
 0x28a   :  { %v1515_v53 = vpop.xlane.xlu2 %1514  ;;  %v1547_v39 = vsub.f32 %v4889_v58, %v1491_v51 }
 0x28c   :  { %v5027_v25 = vpop.eup %3772  ;;  %v1598_v61 = vmul.f32 1.442695, %v1547_v39  ;;  %v1594_v39 = vmul.f32 1.442695, %v1545_v59 }
 0x28d   :  { %v1690_v17 = vsel %vm1431_vm1, %v5027_v25, 0.0  ;;  %v5037_v31 = vpop.eup %3774 }
 0x28e   :  { %3776 = vpow2.f32 %v1598_v61  ;;  %1691 = vadd.xlane.f32.xlu1 %v1690_v17  ;;  %1685 = vadd.xlane.f32.xlu0 %v1684_v8  ;;  %v1714_v40 = vsel %vm1431_vm1, %v5037_v31, 0.0 }
 0x28f   :  { %1628 = vadd.xlane.f32.xlu2 %v1627_v43  ;;  %v1555_v43 = vsub.f32 %v4905_v4, %v1515_v53 }
 0x291   :  { %v1512_v58 = vpop.xlane.xlu1 %1511 }
 0x292   :  { %v1521_v29 = vpop.xlane.xlu2 %1520  ;;  %v1554_v45 = vsub.f32 %v4897_v62, %v1512_v58  ;;  %v1576_v62 = vmul.f32 1.442695, %v1536_v54  ;;  %v1614_v58 = vmul.f32 1.442695, %v1555_v43 }
 0x293   :  { %v1557_v56 = vsub.f32 %v4911_v7, %v1521_v29 }
 0x294   :  { %v5039_v18 = vpop.eup %3776  ;;  %v1612_v14 = vmul.f32 1.442695, %v1554_v45 }
 0x295   :  { %v1618_v23 = vmul.f32 1.442695, %v1557_v56  ;;  %v1681_v52 = vsel %vm1431_vm1, %v5039_v18, 0.0 }
 0x296   :  { %3778 = vpow2.f32 %v1612_v14  ;;  %1682 = vadd.xlane.f32.xlu1 %v1681_v52  ;;  %v1551_v52 = vsub.f32 %v4885_v49, %v5010_v47 }
 0x297   :  { %3780 = vpow2.f32 %v1618_v23  ;;  %1715 = vadd.xlane.f32.xlu2 %v1714_v40  ;;  %v1553_v23 = vsub.f32 %v4816_v13, %v4935_v30 }
 0x298   :  { %3782 = vpow2.f32 %v1576_v62  ;;  %v1606_v62 = vmul.f32 1.442695, %v1551_v52  ;;  %v2107_v52 = vunpack.c.l.b16 %v4820_v21 }
 0x299   :  { %v5047_v7 = vpop.xlane.xlu1 %1517  ;;  %3784 = vpow2.f32 %v1594_v39 }
 0x29c   :  { %v5049_v37 = vpop.eup %3778 }
 0x29d   :  { %v5051_v48 = vpop.eup %3780  ;;  %v1702_v24 = vsel %vm1431_vm1, %v5049_v37, 0.0 }
 0x29e   :  { %v1711_v51 = vsel %vm1431_vm1, %v5051_v48, 0.0  ;;  %v5062_v8 = vpop.eup %3782 }
 0x29f   :  { %1703 = vadd.xlane.f32.xlu2 %v1702_v24  ;;  %1712 = vadd.xlane.f32.xlu1 %v1711_v51  ;;  %v1648_v42 = vsel %vm1431_vm1, %v5062_v8, 0.0  ;;  %v5067_v29 = vpop.eup %3784 }
 0x2a0   :  { %v1675_v4 = vsel %vm1431_vm1, %v5067_v29, 0.0 }
 0x2a1   :  { %v1527_v61 = vpop.xlane.xlu1 %1526 }
 0x2a2   :  { %v1559_v17 = vsub.f32 %v4919_v11, %v1527_v61  ;;  %982 = vrot.lane.b32.xlu0 %v4720_v3, %s3928_s30  ;;  %v1544_v11 = vsub.f32 %v4801_v33, %v4929_v22  ;;  %v1610_v33 = vmul.f32 1.442695, %v1553_v23 }
 0x2a4   :  { %v1622_v44 = vmul.f32 1.442695, %v1559_v17  ;;  %v1592_v53 = vmul.f32 1.442695, %v1544_v11 }
 0x2a6   :  { %3786 = vpow2.f32 %v1622_v44 }
 0x2a7   :  { %1649 = vadd.xlane.f32.xlu2 %v1648_v42  ;;  %3788 = vpow2.f32 %v1614_v58 }
 0x2a8   :  { %3790 = vpow2.f32 %v1592_v53 }
 0x2a9   :  { %3792 = vpow2.f32 %v1610_v33  ;;  %v2108_v33 = vunpack.c.l.b16 %v4927_v26 }
 0x2aa   :  { %3794 = vpow2.f32 %v1606_v62 }
 0x2ac   :  { %v5069_v45 = vpop.eup %3786 }
 0x2ad   :  { %v1717_v56 = vsel %vm1431_vm1, %v5069_v45, 0.0  ;;  %v5077_v14 = vpop.eup %3788 }
 0x2ae   :  { %1718 = vadd.xlane.f32.xlu1 %v1717_v56  ;;  %v1705_v54 = vsel %vm1431_vm1, %v5077_v14, 0.0  ;;  %v5083_v22 = vpop.eup %3790 }
 0x2af   :  { %1676 = vadd.xlane.f32.xlu2 %v1675_v4  ;;  %v1672_v40 = vsel %vm1431_vm1, %v5083_v22, 0.0  ;;  %v5089_v59 = vpop.eup %3792 }
 0x2b0   :  { %v1699_v13 = vsel %vm1431_vm1, %v5089_v59, 0.0  ;;  %v5093_v30 = vpop.eup %3794 }
 0x2b1   :  { %v1693_v24 = vsel %vm1431_vm1, %v5093_v30, 0.0 }
 0x2b6   :  { %1706 = vadd.xlane.f32.xlu1 %v1705_v54 }
 0x2be   :  { %1673 = vadd.xlane.f32.xlu1 %v1672_v40 }
 0x2c6   :  { %1700 = vadd.xlane.f32.xlu1 %v1699_v13 }
 0x2cc   :  { %1694 = vadd.xlane.f32.xlu0 %v1693_v24 }
 0x2cf   :  { %v1644_v49 = vpop.xlane.xlu0 %1643 }
 0x2d0   :  { %3796 = vrcp.f32 %v1644_v49 }
 0x2d1   :  { %v1632_v47 = vpop.xlane.xlu2 %1631 }
 0x2d2   :  { %3798 = vrcp.f32 %v1632_v47  ;;  %v2109_v47 = vpack.c.b16 %v2108_v33, %v2107_v52 }
 0x2d6   :  { %v3797_v39 = vpop.eup %3796 }
 0x2d7   :  { %v1647_v51 = vpop.xlane.xlu1 %1646  ;;  %v1758_v44 = vmul.f32 %v3797_v39, %v4946_v60 }
 0x2d8   :  { %3800 = vrcp.f32 %v1647_v51  ;;  %v3799_v17 = vpop.eup %3798 }
 0x2d9   :  { %v1635_v61 = vpop.xlane.xlu0 %1634  ;;  %v1754_v42 = vmul.f32 %v3799_v17, %v4952_v6  ;;  %v1790_v11 = vpack.c.bf16 %v1758_v44, %v1758_v44 }
 0x2da   :  { %3802 = vrcp.f32 %v1635_v61  ;;  %v1638_v43 = vpop.xlane.xlu2 %1637 }
 0x2db   :  { %v1786_v53 = vpack.c.bf16 %v1754_v42, %v1754_v42  ;;  %v1896_v60 = vunpack.c.l.b16 %v1790_v11  ;;  %3804 = vrcp.f32 %v1638_v43 }
 0x2dd   :  { %v1844_v24 = vunpack.c.l.b16 %v1786_v53 }
 0x2de   :  { %v3801_v58 = vpop.eup %3800 }
 0x2df   :  { %v1759_v56 = vmul.f32 %v3801_v58, %v4959_v12 }
 0x2e0   :  { %v3803_v4 = vpop.eup %3802  ;;  %984 = vrot.lane.b32.xlu0 %v4728_v19, %s3928_s30 }
 0x2e1   :  { %v1791_v23 = vpack.c.bf16 %v1759_v56, %v1759_v56  ;;  %v1755_v54 = vmul.f32 %v3803_v4, %v4964_v63  ;;  %v1656_v13 = vpop.xlane.xlu1 %1655  ;;  %v3805_v63 = vpop.eup %3804 }
 0x2e2   :  { %v1662_v40 = vpop.xlane.xlu2 %1661  ;;  %v1756_v17 = vmul.f32 %v3805_v63, %v4966_v50 }
 0x2e3   :  { %v1897_v62 = vunpack.c.l.b16 %v1791_v23  ;;  %v1787_v6 = vpack.c.bf16 %v1755_v54, %v1755_v54  ;;  %v2082_v23 = vunpack.c.l.b16 %v4923_v20  ;;  %v2081_v54 = vunpack.c.l.b16 %v4931_v15 }
 0x2e4   :  { %v1788_v42 = vpack.c.bf16 %v1756_v17, %v1756_v17 }
 0x2e5   :  { %v1898_v12 = vpack.c.b16 %v1897_v62, %v1896_v60  ;;  %v1845_v49 = vunpack.c.l.b16 %v1787_v6  ;;  %v1013_v6 = vrot.slane %v4927_v26, 4 }
 0x2e6   :  { %v1870_v33 = vunpack.c.l.b16 %v1788_v42 }
 0x2e7   :  { %v1846_v51 = vpack.c.b16 %v1845_v49, %v1844_v24  ;;  %3496 = vmatmul.msk.bf16.vlgmr.msrb.gmra.mxu3 %vm1431_vm1, %v1898_v12  ;;  %v1012_v24 = vrot.slane %v4820_v21, 4  ;;  %v2083_v12 = vpack.c.b16 %v2082_v23, %v2081_v54 }
 0x2e8   :  { %2121 = vmatpush.bf16.msrb.mxu3 %v2109_v47 }
 0x2e9   :  { %v1641_v39 = vpop.xlane.xlu0 %1640  ;;  %3494 = vmatmul.msk.bf16.vlgmr.msrb.gmra.mxu1 %vm1431_vm1, %v1846_v51  ;;  %v2211_v21 = vunpack.c.l.b16 %v1012_v24 }
 0x2ea   :  { %3806 = vrcp.f32 %v1641_v39  ;;  %v1671_v61 = vpop.xlane.xlu2 %1670  ;;  %v1665_v44 = vpop.xlane.xlu1 %1664 }
 0x2eb   :  { %3808 = vrcp.f32 %v1671_v61  ;;  %v2212_v61 = vunpack.c.l.b16 %v1013_v6 }
 0x2ec   :  { %3810 = vrcp.f32 %v1665_v44 }
 0x2f0   :  { %v3807_v43 = vpop.eup %3806 }
 0x2f1   :  { %v1757_v58 = vmul.f32 %v3807_v43, %v4987_v41  ;;  %v1668_v11 = vpop.xlane.xlu0 %1667  ;;  %v3809_v56 = vpop.eup %3808 }
 0x2f2   :  { %3812 = vrcp.f32 %v1668_v11  ;;  %v5109_v4 = vpop.xlane.xlu2 %1679  ;;  %v1767_v52 = vmul.f32 %v3809_v56, %v4985_v38  ;;  %v3811_v60 = vpop.eup %3810  ;;  %v2213_v56 = vpack.c.b16 %v2212_v61, %v2211_v21  ;;  %v2029_v61 = vunpack.c.l.b16 %v4720_v3 }
 0x2f3   :  { %3814 = vrcp.f32 %v1656_v13  ;;  %v1789_v53 = vpack.c.bf16 %v1757_v58, %v1757_v58  ;;  %v1556_v13 = vsub.f32 %v4903_v2, %v5047_v7  ;;  %v1765_v63 = vmul.f32 %v3811_v60, %v4989_v36 }
 0x2f4   :  { %3816 = vrcp.f32 %v1662_v40  ;;  %v1799_v47 = vpack.c.bf16 %v1767_v52, %v1767_v52  ;;  %v1000_v36 = vrot.slane %v4931_v15, 4  ;;  %v2030_v21 = vunpack.c.l.b16 %v4728_v19 }
 0x2f5   :  { %v1871_v50 = vunpack.c.l.b16 %v1789_v53  ;;  %v1616_v17 = vmul.f32 1.442695, %v1556_v13  ;;  %v1797_v42 = vpack.c.bf16 %v1765_v63, %v1765_v63  ;;  %v1537_v53 = vsub.f32 %v4793_v16, %v4925_v55 }
 0x2f6   :  { %v2001_v7 = vunpack.c.l.b16 %v1799_v47  ;;  %v2185_v15 = vunpack.c.l.b16 %v1000_v36 }
 0x2f7   :  { %v1872_v62 = vpack.c.b16 %v1871_v50, %v1870_v33  ;;  %v1578_v60 = vmul.f32 1.442695, %v1537_v53 }
 0x2f8   :  { %v3813_v41 = vpop.eup %3812 }
 0x2f9   :  { %v3815_v49 = vpop.eup %3814  ;;  %v1766_v51 = vmul.f32 %v3813_v41, %v4999_v1  ;;  %v1659_v40 = vpop.xlane.xlu0 %1658  ;;  %3495 = vmatmul.msk.bf16.vlgmr.msrb.gmra.mxu2 %vm1431_vm1, %v1872_v62  ;;  %v1001_v1 = vrot.slane %v4923_v20, 4 }
 0x2fa   :  { %v3817_v39 = vpop.eup %3816  ;;  %3818 = vrcp.f32 %v1659_v40  ;;  %2095 = vmatpush.bf16.msrb.mxu2 %v2083_v12  ;;  %v1689_v38 = vpop.xlane.xlu2 %1688  ;;  %v1762_v44 = vmul.f32 %v3815_v49, %v4977_v27  ;;  %v1552_v49 = vsub.f32 %v4812_v57, %v4939_v32 }
 0x2fb   :  { %v1798_v26 = vpack.c.bf16 %v1766_v51, %v1766_v51  ;;  %v1764_v2 = vmul.f32 %v3817_v39, %v4975_v5  ;;  %3820 = vrcp.f32 %v4957_v10  ;;  %v1975_v10 = vunpack.c.l.b16 %v1797_v42 }
 0x2fc   :  { %3822 = vpow2.f32 %v1616_v17  ;;  %v1794_v23 = vpack.c.bf16 %v1762_v44, %v1762_v44  ;;  %v2186_v52 = vunpack.c.l.b16 %v1001_v1  ;;  %v1608_v63 = vmul.f32 1.442695, %v1552_v49 }
 0x2fd   :  { %v2000_v43 = vunpack.c.l.b16 %v1798_v26  ;;  %v1796_v27 = vpack.c.bf16 %v1764_v2, %v1764_v2  ;;  %3824 = vrcp.f32 %v1689_v38 }
 0x2fe   :  { %v1948_v16 = vunpack.c.l.b16 %v1794_v23  ;;  %v2187_v13 = vpack.c.b16 %v2186_v52, %v2185_v15 }
 0x2ff   :  { %v2002_v58 = vpack.c.b16 %v2001_v7, %v2000_v43  ;;  %v1974_v55 = vunpack.c.l.b16 %v1796_v27 }
 0x300   :  { %v3819_v11 = vpop.eup %3818 }
 0x301   :  { %v1763_v5 = vmul.f32 %v3819_v11, %v5013_v46  ;;  %v1686_v54 = vpop.xlane.xlu0 %1685  ;;  %3500 = vmatmul.msk.bf16.vlgmr.msra.gmra.mxu3 %vm1431_vm1, %v2002_v58  ;;  %v3821_v50 = vpop.eup %3820  ;;  %v1976_v6 = vpack.c.b16 %v1975_v10, %v1974_v55 }
 0x302   :  { %2225 = vmatpush.bf16.msra.mxu3 %v2213_v56  ;;  %v1629_v20 = vpop.xlane.xlu2 %1628  ;;  %3826 = vrcp.f32 %v1686_v54  ;;  %v5130_v41 = vpop.eup %3822  ;;  %v1752_v46 = vmul.f32 %v3821_v50, %v4845_v34 }
 0x303   :  { %v1795_v33 = vpack.c.bf16 %v1763_v5, %v1763_v5  ;;  %3828 = vrcp.f32 %v1629_v20  ;;  %v3825_v12 = vpop.eup %3824  ;;  %v1708_v51 = vsel %vm1431_vm1, %v5130_v41, 0.0  ;;  %v1692_v56 = vpop.xlane.xlu1 %1691 }
 0x304   :  { %3830 = vpow2.f32 %v1578_v60  ;;  %v1784_v34 = vpack.c.bf16 %v1752_v46, %v1752_v46  ;;  %v1773_v26 = vmul.f32 %v3825_v12, %v5015_v28 }
 0x305   :  { %v1949_v62 = vunpack.c.l.b16 %v1795_v33  ;;  %3832 = vpow2.f32 %v1608_v63 }
 0x306   :  { %v1818_v17 = vunpack.c.l.b16 %v1784_v34  ;;  %v1805_v7 = vpack.c.bf16 %v1773_v26, %v1773_v26  ;;  %3834 = vrcp.f32 %v1692_v56 }
 0x307   :  { %v1950_v24 = vpack.c.b16 %v1949_v62, %v1948_v16 }
 0x308   :  { %v3827_v47 = vpop.eup %3826  ;;  %v2079_v28 = vunpack.c.l.b16 %v1805_v7 }
 0x309   :  { %3498 = vmatmul.msk.bf16.vlgmr.msra.gmra.mxu1 %vm1431_vm1, %v1950_v24  ;;  %3499 = vmatmul.msk.bf16.vlgmr.msra.gmra.mxu2 %vm1431_vm1, %v1976_v6  ;;  %v3829_v40 = vpop.eup %3828  ;;  %v1772_v39 = vmul.f32 %v3827_v47, %v5022_v35 }
 0x30a   :  { %2199 = vmatpush.bf16.msra.mxu2 %v2187_v13  ;;  %1709 = vadd.xlane.f32.xlu0 %v1708_v51  ;;  %v1753_v38 = vmul.f32 %v3829_v40, %v5025_v0  ;;  %v5142_v32 = vpop.eup %3830  ;;  %v2031_v0 = vpack.c.b16 %v2030_v21, %v2029_v61  ;;  %v1716_v33 = vpop.xlane.xlu2 %1715 }
 0x30b   :  { %v1804_v44 = vpack.c.bf16 %v1772_v39, %v1772_v39  ;;  %v1651_v35 = vsel %vm1431_vm1, %v5142_v32, 0.0  ;;  %v5149_v42 = vpop.eup %3832  ;;  %v1683_v36 = vpop.xlane.xlu1 %1682 }
 0x30c   :  { %v1785_v57 = vpack.c.bf16 %v1753_v38, %v1753_v38  ;;  %v1696_v11 = vsel %vm1431_vm1, %v5149_v42, 0.0  ;;  %v3835_v5 = vpop.eup %3834 }
 0x30d   :  { %v2078_v1 = vunpack.c.l.b16 %v1804_v44  ;;  %v1774_v54 = vmul.f32 %v3835_v5, %v5027_v25 }
 0x30e   :  { %v1819_v2 = vunpack.c.l.b16 %v1785_v57 }
 0x30f   :  { %v2080_v58 = vpack.c.b16 %v2079_v28, %v2078_v1  ;;  %v1806_v50 = vpack.c.bf16 %v1774_v54, %v1774_v54 }
 0x310   :  { %v1820_v43 = vpack.c.b16 %v1819_v2, %v1818_v17 }
 0x311   :  { %v2104_v55 = vunpack.c.l.b16 %v1806_v50 }
 0x312   :  { %1652 = vadd.xlane.f32.xlu0 %v1651_v35  ;;  %3493 = vmatmul.msk.bf16.vlgmr.msrb.gmra.mxu0 %vm1431_vm1, %v1820_v43  ;;  %v1704_v49 = vpop.xlane.xlu2 %1703 }
 0x313   :  { %2043 = vmatpush.bf16.msrb.mxu0 %v2031_v0  ;;  %v5154_v23 = vpop.xlane.xlu1 %1712 }
 0x314   :  { %v983_v53 = vpop.permute.xlu0 %982 }
 0x315   :  { %v2055_v39 = vunpack.c.l.b16 %v983_v53 }
 0x319   :  { %3503 = vmatmul.msk.bf16.vlgmr.msrb.gmra.mxu2 %vm1431_vm1, %v2080_v58 }
 0x31a   :  { %1697 = vadd.xlane.f32.xlu0 %v1696_v11  ;;  %v1650_v54 = vpop.xlane.xlu2 %1649 }
 0x321   :  { %v1719_v20 = vpop.xlane.xlu1 %1718 }
 0x329   :  { %v1707_v13 = vpop.xlane.xlu1 %1706 }
 0x33f   :  { %v1695_v27 = vpop.xlane.xlu0 %1694 }
 0x340   :  { %3836 = vrcp.f32 %v1695_v27 }
 0x341   :  { %3838 = vrcp.f32 %v1683_v36 }
 0x342   :  { %3840 = vrcp.f32 %v5109_v4 }
 0x343   :  { %3842 = vrcp.f32 %v1719_v20 }
 0x344   :  { %3844 = vrcp.f32 %v1716_v33 }
 0x345   :  { %3846 = vrcp.f32 %v1707_v13 }
 0x346   :  { %v3837_v10 = vpop.eup %3836  ;;  %3848 = vrcp.f32 %v1704_v49  ;;  %v976_v49 = vrot.slane %v4720_v3, 4 }
 0x347   :  { %v1775_v52 = vmul.f32 %v3837_v10, %v5093_v30  ;;  %v3839_v15 = vpop.eup %3838  ;;  %v988_v30 = vrot.slane %v983_v53, 4  ;;  %3850 = vrcp.f32 %v5154_v23 }
 0x348   :  { %v3841_v16 = vpop.eup %3840  ;;  %v1771_v46 = vmul.f32 %v3839_v15, %v5039_v18 }
 0x349   :  { %v1807_v60 = vpack.c.bf16 %v1775_v52, %v1775_v52  ;;  %v3843_v25 = vpop.eup %3842  ;;  %v1770_v24 = vmul.f32 %v3841_v16, %v5002_v9  ;;  %v2159_v9 = vunpack.c.l.b16 %v988_v30 }
 0x34a   :  { %v3845_v4 = vpop.eup %3844  ;;  %v1803_v12 = vpack.c.bf16 %v1771_v46, %v1771_v46  ;;  %v1783_v47 = vmul.f32 %v3843_v25, %v5069_v45 }
 0x34b   :  { %v2105_v62 = vunpack.c.l.b16 %v1807_v60  ;;  %v1802_v51 = vpack.c.bf16 %v1770_v24, %v1770_v24  ;;  %v1782_v40 = vmul.f32 %v3845_v4, %v5037_v31  ;;  %v3847_v45 = vpop.eup %3846 }
 0x34c   :  { %v2053_v63 = vunpack.c.l.b16 %v1803_v12  ;;  %v1815_v26 = vpack.c.bf16 %v1783_v47, %v1783_v47  ;;  %v3849_v31 = vpop.eup %3848  ;;  %v1779_v35 = vmul.f32 %v3847_v45, %v5077_v14  ;;  %v1677_v47 = vpop.xlane.xlu2 %1676 }
 0x34d   :  { %v2106_v6 = vpack.c.b16 %v2105_v62, %v2104_v55  ;;  %v2052_v21 = vunpack.c.l.b16 %v1802_v51  ;;  %v1814_v17 = vpack.c.bf16 %v1782_v40, %v1782_v40  ;;  %v1778_v1 = vmul.f32 %v3849_v31, %v5049_v37  ;;  %v3851_v10 = vpop.eup %3850 }
 0x34e   :  { %v2209_v7 = vunpack.c.l.b16 %v1815_v26  ;;  %v1811_v28 = vpack.c.bf16 %v1779_v35, %v1779_v35  ;;  %v1781_v33 = vmul.f32 %v3851_v10, %v5051_v48  ;;  %v1674_v48 = vpop.xlane.xlu1 %1673 }
 0x34f   :  { %3504 = vmatmul.msk.bf16.vlgmr.msrb.gmra.mxu3 %vm1431_vm1, %v2106_v6  ;;  %v2054_v2 = vpack.c.b16 %v2053_v63, %v2052_v21  ;;  %v2208_v43 = vunpack.c.l.b16 %v1814_v17  ;;  %v1810_v58 = vpack.c.bf16 %v1778_v1, %v1778_v1 }
 0x350   :  { %v2157_v11 = vunpack.c.l.b16 %v1811_v28  ;;  %v1813_v60 = vpack.c.bf16 %v1781_v33, %v1781_v33 }
 0x351   :  { %v2210_v0 = vpack.c.b16 %v2209_v7, %v2208_v43  ;;  %v2156_v56 = vunpack.c.l.b16 %v1810_v58 }
 0x352   :  { %v985_v34 = vpop.permute.xlu0 %984  ;;  %v2183_v6 = vunpack.c.l.b16 %v1813_v60 }
 0x353   :  { %v989_v18 = vrot.slane %v985_v34, 4  ;;  %v2056_v38 = vunpack.c.l.b16 %v985_v34  ;;  %v2158_v53 = vpack.c.b16 %v2157_v11, %v2156_v56 }
 0x355   :  { %v2057_v57 = vpack.c.b16 %v2056_v38, %v2055_v39  ;;  %v2160_v61 = vunpack.c.l.b16 %v989_v18 }
 0x357   :  { %v2161_v44 = vpack.c.b16 %v2160_v61, %v2159_v9  ;;  %2069 = vmatpush.bf16.msrb.mxu1 %v2057_v57 }
 0x35a   :  { %3502 = vmatmul.msk.bf16.vlgmr.msrb.gmra.mxu1 %vm1431_vm1, %v2054_v2  ;;  %v1701_v2 = vpop.xlane.xlu1 %1700 }
 0x35b   :  { %2173 = vmatpush.bf16.msra.mxu1 %v2161_v44 }
 0x35f   :  { %3508 = vmatmul.msk.bf16.vlgmr.msra.gmra.mxu3 %vm1431_vm1, %v2210_v0 }
 0x366   :  { %v1863_v36 = vpop.f32.mrf.mxu1 }
 0x367   :  { %2236 = vrot.lane.b32.xlu2 %v1863_v36, %s3926_s2 }
 0x36a   :  { %v1915_v27 = vpop.f32.mrf.mxu3  ;;  %3506 = vmatmul.msk.bf16.vlgmr.msra.gmra.mxu1 %vm1431_vm1, %v2158_v53 }
 0x36b   :  { %2268 = vrot.lane.b32.xlu1 %v1915_v27, %s3928_s30 }
 0x36e   :  { %v1865_v5 = vpop.f32.mrf.mxu1 }
 0x36f   :  { %2238 = vrot.lane.b32.xlu0 %v1865_v5, %s3926_s2 }
 0x372   :  { %v1917_v14 = vpop.f32.mrf.mxu3 }
 0x377   :  { %2270 = vrot.lane.b32.xlu0 %v1917_v14, %s3928_s30 }
 0x37c   :  { %v1889_v37 = vpop.f32.mrf.mxu2 }
 0x37d   :  { %v1710_v20 = vpop.xlane.xlu0 %1709  ;;  %2252 = vrot.lane.b32.xlu2 %v1889_v37, %s3927_s29 }
 0x37e   :  { %3852 = vrcp.f32 %v1710_v20 }
 0x37f   :  { %3854 = vrcp.f32 %v1650_v54 }
 0x384   :  { %v3853_v50 = vpop.eup %3852  ;;  %v1891_v52 = vpop.f32.mrf.mxu2 }
 0x385   :  { %v2019_v15 = vpop.f32.mrf.mxu3  ;;  %v1780_v16 = vmul.f32 %v3853_v50, %v5130_v41  ;;  %v1653_v55 = vpop.xlane.xlu0 %1652  ;;  %v977_v41 = vrot.slane %v4728_v19, 4 }
 0x386   :  { %2316 = vrot.lane.b32.xlu2 %v2019_v15, %s3928_s30  ;;  %v3855_v23 = vpop.eup %3854  ;;  %3856 = vrcp.f32 %v1653_v55  ;;  %v1967_v62 = vpop.f32.mrf.mxu1 }
 0x387   :  { %v1812_v46 = vpack.c.bf16 %v1780_v16, %v1780_v16  ;;  %2284 = vrot.lane.b32.xlu1 %v1967_v62, %s3926_s2  ;;  %v1760_v25 = vmul.f32 %v3855_v23, %v5062_v8  ;;  %3858 = vrcp.f32 %v1674_v48  ;;  %v2133_v8 = vunpack.c.l.b16 %v976_v49 }
 0x388   :  { %3860 = vrcp.f32 %v1677_v47  ;;  %v2134_v39 = vunpack.c.l.b16 %v977_v41 }
 0x389   :  { %v2182_v24 = vunpack.c.l.b16 %v1812_v46  ;;  %v1792_v30 = vpack.c.bf16 %v1760_v25, %v1760_v25 }
 0x38a   :  { %v2135_v9 = vpack.c.b16 %v2134_v39, %v2133_v8 }
 0x38b   :  { %v2184_v4 = vpack.c.b16 %v2183_v6, %v2182_v24  ;;  %v1922_v18 = vunpack.c.l.b16 %v1792_v30 }
 0x38c   :  { %v3857_v12 = vpop.eup %3856  ;;  %v1993_v13 = vpop.f32.mrf.mxu2 }
 0x38d   :  { %v1761_v51 = vmul.f32 %v3857_v12, %v5142_v32  ;;  %3507 = vmatmul.msk.bf16.vlgmr.msra.gmra.mxu2 %vm1431_vm1, %v2184_v4  ;;  %v3859_v19 = vpop.eup %3858  ;;  %v2021_v26 = vpop.f32.mrf.mxu3 }
 0x38e   :  { %v1969_v40 = vpop.f32.mrf.mxu1  ;;  %v3861_v32 = vpop.eup %3860  ;;  %v1768_v57 = vmul.f32 %v3859_v19, %v5083_v22 }
 0x38f   :  { %v1793_v34 = vpack.c.bf16 %v1761_v51, %v1761_v51  ;;  %2286 = vrot.lane.b32.xlu0 %v1969_v40, %s3926_s2  ;;  %2254 = vrot.lane.b32.xlu1 %v1891_v52, %s3927_s29  ;;  %v1769_v61 = vmul.f32 %v3861_v32, %v5067_v29  ;;  %v1698_v17 = vpop.xlane.xlu0 %1697  ;;  %v1837_v50 = vpop.f32.mrf.mxu0 }
 0x390   :  { %v1800_v21 = vpack.c.bf16 %v1768_v57, %v1768_v57  ;;  %3862 = vrcp.f32 %v1698_v17 }
 0x391   :  { %v1923_v3 = vunpack.c.l.b16 %v1793_v34  ;;  %v1801_v44 = vpack.c.bf16 %v1769_v61, %v1769_v61  ;;  %3864 = vrcp.f32 %v1701_v2 }
 0x392   :  { %v2026_v45 = vunpack.c.l.b16 %v1800_v21 }
 0x393   :  { %v1924_v38 = vpack.c.b16 %v1923_v3, %v1922_v18  ;;  %v2027_v7 = vunpack.c.l.b16 %v1801_v44 }
 0x394   :  { %v1995_v63 = vpop.f32.mrf.mxu2 }
 0x395   :  { %2302 = vrot.lane.b32.xlu2 %v1995_v63, %s3927_s29  ;;  %3497 = vmatmul.msk.bf16.vlgmr.msra.gmra.mxu0 %vm1431_vm1, %v1924_v38  ;;  %v2028_v31 = vpack.c.b16 %v2027_v7, %v2026_v45 }
 0x396   :  { %2147 = vmatpush.bf16.msra.mxu0 %v2135_v9  ;;  %v3863_v43 = vpop.eup %3862 }
 0x397   :  { %2300 = vrot.lane.b32.xlu0 %v1993_v13, %s3927_s29  ;;  %2318 = vrot.lane.b32.xlu1 %v2021_v26, %s3928_s30  ;;  %v3865_v35 = vpop.eup %3864  ;;  %v1776_v22 = vmul.f32 %v3863_v43, %v5149_v42  ;;  %v1839_v16 = vpop.f32.mrf.mxu0 }
 0x398   :  { %v1777_v0 = vmul.f32 %v3865_v35, %v5089_v59 }
 0x399   :  { %v1808_v1 = vpack.c.bf16 %v1776_v22, %v1776_v22 }
 0x39a   :  { %v1809_v28 = vpack.c.bf16 %v1777_v0, %v1777_v0 }
 0x39b   :  { %v2130_v29 = vunpack.c.l.b16 %v1808_v1 }
 0x39c   :  { %v2131_v58 = vunpack.c.l.b16 %v1809_v28  ;;  %v2097_v42 = vpop.f32.mrf.mxu2 }
 0x39e   :  { %v2132_v11 = vpack.c.b16 %v2131_v58, %v2130_v29 }
 0x3a4   :  { %v2099_v14 = vpop.f32.mrf.mxu2 }
 0x3a5   :  { %3501 = vmatmul.msk.bf16.vlgmr.msrb.gmra.mxu0 %vm1431_vm1, %v2028_v31 }
 0x3b5   :  { %3505 = vmatmul.msk.bf16.vlgmr.msra.gmra.mxu0 %vm1431_vm1, %v2132_v11 }
 0x3c1   :  { %v2237_v52 = vpop.permute.xlu2 %2236 }
 0x3c2   :  { %v2328_v13 = vsel %vm1020_vm0, %v1837_v50, %v2237_v52 }
 0x3d2   :  { %v2123_v56 = vpop.f32.mrf.mxu3 }
 0x3d3   :  { %2272 = vrot.lane.b32.xlu1 %v2123_v56, %s3928_s30 }
 0x3d7   :  { %v2071_v36 = vpop.f32.mrf.mxu1  ;;  %v2253_v55 = vpop.permute.xlu2 %2252 }
 0x3d8   :  { %2240 = vrot.lane.b32.xlu0 %v2071_v36, %s3926_s2  ;;  %v2333_v41 = vsel %vm2332_vm2, %v2328_v13, %v2253_v55 }
 0x3da   :  { %v2125_v27 = vpop.f32.mrf.mxu3 }
 0x3dd   :  { %v2269_v15 = vpop.permute.xlu1 %2268 }
 0x3de   :  { %v5217_v47 = vsel %vm2337_vm3, %v2333_v41, %v2269_v15 }
 0x3df   :  { %v2073_v53 = vpop.f32.mrf.mxu1 }
 0x3e0   :  { %2242 = vrot.lane.b32.xlu2 %v2073_v53, %s3926_s2  ;;  %v2317_v25 = vpop.permute.xlu2 %2316 }
 0x3e1   :  { %v2239_v33 = vpop.permute.xlu0 %2238 }
 0x3e2   :  { %v2227_v59 = vpop.f32.mrf.mxu3  ;;  %v2329_v8 = vsel %vm1020_vm0, %v1839_v16, %v2239_v33 }
 0x3e7   :  { %v2175_v5 = vpop.f32.mrf.mxu1 }
 0x3e8   :  { %2256 = vrot.lane.b32.xlu2 %v2097_v42, %s3927_s29  ;;  %2288 = vrot.lane.b32.xlu1 %v2175_v5, %s3926_s2 }
 0x3e9   :  { %v2271_v60 = vpop.permute.xlu0 %2270 }
 0x3ea   :  { %v2229_v54 = vpop.f32.mrf.mxu3 }
 0x3ef   :  { %v2177_v37 = vpop.f32.mrf.mxu1  ;;  %v2303_v51 = vpop.permute.xlu2 %2302 }
 0x3f0   :  { %2258 = vrot.lane.b32.xlu1 %v2099_v14, %s3927_s29  ;;  %2290 = vrot.lane.b32.xlu0 %v2177_v37, %s3926_s2  ;;  %v3929_v37 = vmov 256.0  }
 0x3f1   :  { %3866 = vrcp.f32 %v3929_v37 }
 0x3f8   :  { %2322 = vrot.lane.b32.xlu1 %v2229_v54, %s3928_s30  ;;  %v3867_v54 = vpop.eup %3866 }
 0x3f9   :  { %v2285_v23 = vpop.permute.xlu1 %2284  ;;  %vm2373_vm4 = vweird.f32 %v3867_v54 }
 0x401   :  { %v2287_v62 = vpop.permute.xlu0 %2286  ;;  %v2255_v24 = vpop.permute.xlu1 %2254 }
 0x402   :  { %v2334_v39 = vsel %vm2332_vm2, %v2329_v8, %v2255_v24 }
 0x403   :  { %v5228_v38 = vsel %vm2337_vm3, %v2334_v39, %v2271_v60 }
 0x409   :  { %v2301_v48 = vpop.permute.xlu0 %2300  ;;  %v2319_v18 = vpop.permute.xlu1 %2318 }
 0x410   :  { %v2201_v20 = vpop.f32.mrf.mxu2 }
 0x411   :  { %2304 = vrot.lane.b32.xlu0 %v2201_v20, %s3927_s29  ;;  %v2369_v20 = vmul.f32 256.0, %v3867_v54 }
 0x412   :  { %v1941_v46 = vpop.f32.mrf.mxu0 }
 0x413   :  { %v2342_v6 = vsel %vm1020_vm0, %v1941_v46, %v2285_v23 }
 0x414   :  { %v2346_v4 = vsel %vm2332_vm2, %v2342_v6, %v2301_v48 }
 0x415   :  { %v5212_v49 = vsel %vm2337_vm3, %v2346_v4, %v2317_v25 }
 0x416   :  { %v2356_v40 = vadd.f32 %v5212_v49, %v5217_v47 }
 0x418   :  { %v2203_v10 = vpop.f32.mrf.mxu2 }
 0x419   :  { %2306 = vrot.lane.b32.xlu2 %v2203_v10, %s3927_s29  ;;  %2274 = vrot.lane.b32.xlu0 %v2125_v27, %s3928_s30  ;;  %v2370_v10 = vsub.f32 1.0, %v2369_v20 }
 0x41a   :  { %v1943_v12 = vpop.f32.mrf.mxu0 }
 0x41b   :  { %v2343_v30 = vsel %vm1020_vm0, %v1943_v12, %v2287_v62  ;;  %v2371_v33 = vmul.f32 %v3867_v54, %v2370_v10 }
 0x41c   :  { %v2347_v34 = vsel %vm2332_vm2, %v2343_v30, %v2303_v51 }
 0x41d   :  { %v5225_v3 = vsel %vm2337_vm3, %v2347_v34, %v2319_v18  ;;  %v2372_v50 = vadd.f32 %v3867_v54, %v2371_v33 }
 0x41e   :  { %v2359_v19 = vadd.f32 %v5225_v3, %v5228_v38 }
 0x41f   :  { %v5256_v52 = vsel %vm2373_vm4, %v3867_v54, %v2372_v50 }
 0x421   :  { %2320 = vrot.lane.b32.xlu2 %v2227_v59, %s3928_s30 }
 0x422   :  { %v2045_v9 = vpop.f32.mrf.mxu0 }
 0x42a   :  { %v2047_v57 = vpop.f32.mrf.mxu0 }
 0x432   :  { %v2149_v2 = vpop.f32.mrf.mxu0 }
 0x43a   :  { %v2243_v63 = vpop.permute.xlu2 %2242  ;;  %v2151_v58 = vpop.f32.mrf.mxu0 }
 0x43b   :  { %v2331_v36 = vsel %vm1020_vm0, %v2047_v57, %v2243_v63 }
 0x442   :  { %v2257_v26 = vpop.permute.xlu2 %2256 }
 0x443   :  { %2357 = vadd.xlane.f32.xlu0 %v2356_v40 }
 0x445   :  { %v2273_v32 = vpop.permute.xlu1 %2272 }
 0x44a   :  { %2360 = vadd.xlane.f32.xlu2 %v2359_v19  ;;  %v2241_v61 = vpop.permute.xlu0 %2240 }
 0x44b   :  { %v2330_v45 = vsel %vm1020_vm0, %v2045_v9, %v2241_v61  ;;  %v3712_v61 = vld [vmem:[%s5613_s5 + $0x38] sm:$0xff] }
 0x44c   :  { %v2335_v31 = vsel %vm2332_vm2, %v2330_v45, %v2257_v26  ;;  %2633 = vmatpush.bf16.msrb.mxu0 %v3712_v61  ;;  %v3718_v45 = vld [vmem:[%s5613_s5 + $0x68] sm:$0xff] }
 0x44d   :  { %v5237_v1 = vsel %vm2337_vm3, %v2335_v31, %v2273_v32  ;;  %v3717_v31 = vld [vmem:[%s5613_s5 + $0x60] sm:$0xff] }
 0x45a   :  { %v2289_v21 = vpop.permute.xlu1 %2288 }
 0x45b   :  { %v2344_v43 = vsel %vm1020_vm0, %v2149_v2, %v2289_v21  ;;  %v3720_v21 = vld [vmem:[%s5613_s5 + $0x78] sm:$0xff]  ;;  %v3710_v2 = vld [vmem:[%s5613_s5 + $0x28] sm:$0xff] }
 0x45c   :  { %2652 = vmatpush.bf16.msrb.mxu1 %v3720_v21 }
 0x462   :  { %v2291_v44 = vpop.permute.xlu0 %2290  ;;  %v2259_v7 = vpop.permute.xlu1 %2258 }
 0x463   :  { %v2345_v11 = vsel %vm1020_vm0, %v2151_v58, %v2291_v44  ;;  %v2336_v53 = vsel %vm2332_vm2, %v2331_v36, %v2259_v7  ;;  %v3719_v44 = vld [vmem:[%s5613_s5 + $0x70] sm:$0xff]  ;;  %v3709_v7 = vld [vmem:[%s5613_s5 + $0x20] sm:$0xff] }
 0x464   :  { %2653 = vmatpush.bf16.msrb.mxu1 %v3719_v44 }
 0x468   :  { %2654 = vmatpush.bf16.msrb.mxu1 %v3718_v45 }
 0x46a   :  { %v2323_v27 = vpop.permute.xlu1 %2322 }
 0x46c   :  { %2655 = vmatpush.bf16.msrb.mxu1 %v3717_v31 }
 0x473   :  { %v2307_v17 = vpop.permute.xlu2 %2306 }
 0x474   :  { %v2349_v56 = vsel %vm2332_vm2, %v2345_v11, %v2307_v17  ;;  %v3711_v17 = vld [vmem:[%s5613_s5 + $0x30] sm:$0xff]  ;;  %v3706_v11 = vld [vmem:[%s5613_s5 + $0x8] sm:$0xff] }
 0x475   :  { %v5252_v59 = vsel %vm2337_vm3, %v2349_v56, %v2323_v27  ;;  %2634 = vmatpush.bf16.msrb.mxu0 %v3711_v17  ;;  %v3714_v56 = vld [vmem:[%s5613_s5 + $0x48] sm:$0xff]  ;;  %v3713_v27 = vld [vmem:[%s5613_s5 + $0x40] sm:$0xff] }
 0x479   :  { %2635 = vmatpush.bf16.msrb.mxu0 %v3710_v2 }
 0x47b   :  { %v2321_v22 = vpop.permute.xlu2 %2320 }
 0x47d   :  { %2636 = vmatpush.bf16.msrb.mxu0 %v3709_v7 }
 0x483   :  { %v2305_v35 = vpop.permute.xlu0 %2304 }
 0x484   :  { %v2348_v0 = vsel %vm2332_vm2, %v2344_v43, %v2305_v35  ;;  %v3708_v43 = vld [vmem:[%s5613_s5 + $0x18] sm:$0xff] }
 0x485   :  { %v5240_v28 = vsel %vm2337_vm3, %v2348_v0, %v2321_v22  ;;  %v3716_v35 = vld [vmem:[%s5613_s5 + $0x58] sm:$0xff]  ;;  %2637 = vmatpush.bf16.msrb.mxu0 %v3708_v43  ;;  %v3707_v22 = vld [vmem:[%s5613_s5 + $0x10] sm:$0xff] }
 0x486   :  { %v2362_v29 = vadd.f32 %v5240_v28, %v5237_v1  ;;  %2656 = vmatpush.bf16.msrb.mxu1 %v3716_v35  ;;  %v3715_v0 = vld [vmem:[%s5613_s5 + $0x50] sm:$0xff] }
 0x488   :  { %2363 = vadd.xlane.f32.xlu1 %v2362_v29 }
 0x489   :  { %2638 = vmatpush.bf16.msrb.mxu0 %v3707_v22 }
 0x48a   :  { %2657 = vmatpush.bf16.msrb.mxu1 %v3715_v0 }
 0x48b   :  { %v2275_v42 = vpop.permute.xlu0 %2274 }
 0x48c   :  { %v5249_v5 = vsel %vm2337_vm3, %v2336_v53, %v2275_v42  ;;  %v3705_v53 = vld [vmem:[%s5613_s5] sm:$0xff] }
 0x48d   :  { %v2365_v14 = vadd.f32 %v5252_v59, %v5249_v5  ;;  %2639 = vmatpush.bf16.msrb.mxu0 %v3706_v11 }
 0x48e   :  { %2658 = vmatpush.bf16.msrb.mxu1 %v3714_v56 }
 0x48f   :  { %2366 = vadd.xlane.f32.xlu0 %v2365_v14 }
 0x491   :  { %2640 = vmatpush.bf16.msrb.mxu0 %v3705_v53 }
 0x492   :  { %2659 = vmatpush.bf16.msrb.mxu1 %v3713_v27 }
 0x4b6   :  { %v2358_v15 = vpop.xlane.xlu0 %2357 }
 0x4b7   :  { %v2375_v60 = vmul.f32 %v5256_v52, %v2358_v15 }
 0x4b9   :  { %v5260_v16 = vsub.f32 %v5217_v47, %v2375_v60  ;;  %v5263_v55 = vsub.f32 %v5212_v49, %v2375_v60 }
 0x4bb   :  { %v2387_v23 = vmul.f32 %v5260_v16, %v5260_v16  ;;  %v2388_v62 = vmul.f32 %v5263_v55, %v5263_v55 }
 0x4bd   :  { %v2361_v46 = vpop.xlane.xlu2 %2360  ;;  %v2395_v6 = vadd.f32 %v2388_v62, %v2387_v23  ;;  %v2354_v62 = vld [vmem:[%s5611_s3] sm:$0x3] }
 0x4be   :  { %v2376_v25 = vmul.f32 %v5256_v52, %v2361_v46 }
 0x4bf   :  { %2396 = vadd.xlane.f32.xlu2 %v2395_v6 }
 0x4c0   :  { %v5271_v24 = vsub.f32 %v5228_v38, %v2376_v25  ;;  %v5274_v48 = vsub.f32 %v5225_v3, %v2376_v25 }
 0x4c2   :  { %v2389_v4 = vmul.f32 %v5271_v24, %v5271_v24  ;;  %v2390_v12 = vmul.f32 %v5274_v48, %v5274_v48 }
 0x4c4   :  { %v2398_v13 = vadd.f32 %v2390_v12, %v2389_v4  ;;  %v5355_v4 = vperm.slane %v2354_v62, 0  ;;  %v5357_v12 = vperm.slane %v2354_v62, 1 }
 0x4c6   :  { %2399 = vadd.xlane.f32.xlu1 %v2398_v13 }
 0x4fb   :  { %v2364_v41 = vpop.xlane.xlu1 %2363 }
 0x4fc   :  { %v2377_v30 = vmul.f32 %v5256_v52, %v2364_v41 }
 0x4fe   :  { %v5282_v51 = vsub.f32 %v5237_v1, %v2377_v30  ;;  %v5285_v40 = vsub.f32 %v5240_v28, %v2377_v30  ;;  %v2355_v30 = vld [vmem:[%s5612_s4] sm:$0x3] }
 0x500   :  { %v2391_v34 = vmul.f32 %v5282_v51, %v5282_v51  ;;  %v2392_v8 = vmul.f32 %v5285_v40, %v5285_v40 }
 0x502   :  { %v2367_v39 = vpop.xlane.xlu0 %2366  ;;  %v2401_v18 = vadd.f32 %v2392_v8, %v2391_v34 }
 0x503   :  { %v2378_v19 = vmul.f32 %v5256_v52, %v2367_v39  ;;  %v2477_v39 = vperm.slane %v2355_v30, 0 }
 0x504   :  { %2402 = vadd.xlane.f32.xlu0 %v2401_v18  ;;  %v2478_v18 = vperm.slane %v2355_v30, 1 }
 0x505   :  { %v5293_v63 = vsub.f32 %v5249_v5, %v2378_v19  ;;  %v5296_v9 = vsub.f32 %v5252_v59, %v2378_v19 }
 0x507   :  { %v2393_v32 = vmul.f32 %v5293_v63, %v5293_v63  ;;  %v2394_v26 = vmul.f32 %v5296_v9, %v5296_v9 }
 0x509   :  { %v2404_v57 = vadd.f32 %v2394_v26, %v2393_v32 }
 0x50b   :  { %2405 = vadd.xlane.f32.xlu2 %v2404_v57 }
 0x532   :  { %v2397_v29 = vpop.xlane.xlu2 %2396 }
 0x533   :  { %v2407_v58 = vmul.f32 %v2397_v29, %v5256_v52 }
 0x535   :  { %v2411_v36 = vadd.f32 1e-05, %v2407_v58 }
 0x537   :  { %3868 = vrsqrt.f32 %v2411_v36  ;;  %vm2421_vm6 = vweird.f32 %v2411_v36 }
 0x539   :  { %v2400_v42 = vpop.xlane.xlu1 %2399 }
 0x53a   :  { %v2408_v14 = vmul.f32 %v2400_v42, %v5256_v52 }
 0x53c   :  { %v2412_v37 = vadd.f32 1e-05, %v2408_v14 }
 0x53d   :  { %v3869_v54 = vpop.eup %3868 }
 0x53e   :  { %v2416_v20 = vmul.f32 %v3869_v54, %v2411_v36  ;;  %3870 = vrsqrt.f32 %v2412_v37  ;;  %vm2422_vm5 = vweird.f32 %v3869_v54  ;;  %vm2431_vm9 = vweird.f32 %v2412_v37 }
 0x53f   :  { %vm2423_vm7 = vmor %vm2421_vm6, %vm2422_vm5 }
 0x540   :  { %v2417_v10 = vmul.f32 %v3869_v54, %v2416_v20 }
 0x542   :  { %v2418_v33 = vmul.f32 0.5, %v2417_v10 }
 0x544   :  { %v3871_v50 = vpop.eup %3870  ;;  %v2419_v15 = vsub.f32 1.5, %v2418_v33 }
 0x545   :  { %v2426_v60 = vmul.f32 %v3871_v50, %v2412_v37  ;;  %vm2432_vm8 = vweird.f32 %v3871_v50 }
 0x546   :  { %v2420_v23 = vmul.f32 %v3869_v54, %v2419_v15  ;;  %vm2433_vm10 = vmor %vm2431_vm9, %vm2432_vm8 }
 0x547   :  { %v2427_v46 = vmul.f32 %v3871_v50, %v2426_v60 }
 0x548   :  { %v2424_v6 = vsel %vm2423_vm7, %v3869_v54, %v2420_v23 }
 0x549   :  { %v2428_v25 = vmul.f32 0.5, %v2427_v46  ;;  %v2455_v13 = vmul.f32 %v2424_v6, %v5260_v16  ;;  %v2456_v41 = vmul.f32 %v2424_v6, %v5263_v55 }
 0x54b   :  { %v2429_v34 = vsub.f32 1.5, %v2428_v25  ;;  %v2468_v19 = vmul.f32 %v5355_v4, %v2455_v13  ;;  %v2469_v32 = vmul.f32 %v5357_v12, %v2456_v41 }
 0x54d   :  { %v2430_v8 = vmul.f32 %v3871_v50, %v2429_v34  ;;  %v2481_v57 = vadd.f32 %v2477_v39, %v2468_v19  ;;  %v2482_v61 = vadd.f32 %v2478_v18, %v2469_v32 }
 0x54f   :  { %v2434_v26 = vsel %vm2433_vm10, %v3871_v50, %v2430_v8  ;;  %v5371_v45 = vadd.f32 %v2481_v57, %v5217_v47  ;;  %v5377_v31 = vadd.f32 %v2482_v61, %v5212_v49 }
 0x550   :  { %v2457_v16 = vmul.f32 %v2434_v26, %v5271_v24  ;;  %v2458_v55 = vmul.f32 %v2434_v26, %v5274_v48 }
 0x552   :  { %v2470_v21 = vmul.f32 %v5355_v4, %v2457_v16  ;;  %v2471_v17 = vmul.f32 %v5357_v12, %v2458_v55 }
 0x554   :  { %v2483_v44 = vadd.f32 %v2477_v39, %v2470_v21  ;;  %v2484_v2 = vadd.f32 %v2478_v18, %v2471_v17 }
 0x556   :  { %v5374_v7 = vadd.f32 %v2483_v44, %v5228_v38  ;;  %v5380_v24 = vadd.f32 %v2484_v2, %v5225_v3 }
 0x558   :  { %v2497_v48 = vpack.c.bf16 %v5374_v7, %v5371_v45  ;;  %v2498_v43 = vpack.c.bf16 %v5380_v24, %v5377_v31 }
 0x55a   :  { %2641 = vmatmul.bf16.vlgmr.msrb.gmra.mxu0 %v2497_v48  ;;  %2660 = vmatmul.bf16.vlgmr.msrb.gmra.mxu1 %v2498_v43  ;;  %v3599_v48 = vld [vmem:[%s5615_s7 + $0x30] sm:$0xf]  ;;  %v3728_v43 = vld [vmem:[%s5615_s7 + $0x34] sm:$0xf0] }
 0x577   :  { %v2403_v35 = vpop.xlane.xlu0 %2402 }
 0x578   :  { %v2409_v47 = vmul.f32 %v2403_v35, %v5256_v52 }
 0x57a   :  { %v2413_v22 = vadd.f32 1e-05, %v2409_v47  ;;  %v3727_v47 = vld [vmem:[%s5615_s7 + $0x34] sm:$0xf] }
 0x57c   :  { %3872 = vrsqrt.f32 %v2413_v22  ;;  %vm2441_vm12 = vweird.f32 %v2413_v22 }
 0x57e   :  { %v2406_v38 = vpop.xlane.xlu2 %2405 }
 0x57f   :  { %v2410_v49 = vmul.f32 %v2406_v38, %v5256_v52  ;;  %v3600_v38 = vor.u32 %v3728_v43, %v3599_v48 }
 0x581   :  { %v2414_v0 = vadd.f32 1e-05, %v2410_v49  ;;  %v3601_v49 = vld [vmem:[%s5615_s7 + $0x38] sm:$0xf0]  ;;  %2897 = vmatpush.bf16.msrb.mxu2 %v3600_v38 }
 0x582   :  { %v3873_v29 = vpop.eup %3872 }
 0x583   :  { %v2436_v3 = vmul.f32 %v3873_v29, %v2413_v22  ;;  %3874 = vrsqrt.f32 %v2414_v0  ;;  %vm2442_vm11 = vweird.f32 %v3873_v29  ;;  %vm2451_vm15 = vweird.f32 %v2414_v0 }
 0x584   :  { %vm2443_vm13 = vmor %vm2441_vm12, %vm2442_vm11 }
 0x585   :  { %v2437_v58 = vmul.f32 %v3873_v29, %v2436_v3  ;;  %v3604_v3 = vor.u32 %v3727_v47, %v3601_v49 }
 0x587   :  { %v2438_v11 = vmul.f32 0.5, %v2437_v58  ;;  %v3591_v58 = vld [vmem:[%s5615_s7 + $0x20] sm:$0xf]  ;;  %2916 = vmatpush.bf16.msrb.mxu3 %v3604_v3 }
 0x589   :  { %v3875_v56 = vpop.eup %3874  ;;  %v2439_v36 = vsub.f32 1.5, %v2438_v11  ;;  %v3726_v11 = vld [vmem:[%s5615_s7 + $0x24] sm:$0xf0] }
 0x58a   :  { %v2446_v53 = vmul.f32 %v3875_v56, %v2414_v0  ;;  %vm2452_vm14 = vweird.f32 %v3875_v56 }
 0x58b   :  { %v2440_v27 = vmul.f32 %v3873_v29, %v2439_v36  ;;  %vm2453_vm0 = vmor %vm2451_vm15, %vm2452_vm14  ;;  %v3592_v36 = vor.u32 %v3726_v11, %v3591_v58 }
 0x58c   :  { %v2447_v42 = vmul.f32 %v3875_v56, %v2446_v53  ;;  %v3725_v53 = vld [vmem:[%s5615_s7 + $0x24] sm:$0xf] }
 0x58d   :  { %v2444_v14 = vsel %vm2443_vm13, %v3873_v29, %v2440_v27  ;;  %v3593_v27 = vld [vmem:[%s5615_s7 + $0x28] sm:$0xf0]  ;;  %2898 = vmatpush.bf16.msrb.mxu2 %v3592_v36 }
 0x58e   :  { %v2448_v37 = vmul.f32 0.5, %v2447_v42  ;;  %v2459_v54 = vmul.f32 %v2444_v14, %v5282_v51  ;;  %v2460_v20 = vmul.f32 %v2444_v14, %v5285_v40  ;;  %v3596_v14 = vor.u32 %v3725_v53, %v3593_v27 }
 0x590   :  { %v2449_v10 = vsub.f32 1.5, %v2448_v37  ;;  %v2472_v50 = vmul.f32 %v5355_v4, %v2459_v54  ;;  %v2473_v15 = vmul.f32 %v5357_v12, %v2460_v20  ;;  %2917 = vmatpush.bf16.msrb.mxu3 %v3596_v14 }
 0x592   :  { %v2450_v33 = vmul.f32 %v3875_v56, %v2449_v10  ;;  %v2485_v6 = vadd.f32 %v2477_v39, %v2472_v50  ;;  %v2486_v40 = vadd.f32 %v2478_v18, %v2473_v15  ;;  %v3724_v50 = vld [vmem:[%s5615_s7 + $0x14] sm:$0xf0]  ;;  %v3723_v15 = vld [vmem:[%s5615_s7 + $0x14] sm:$0xf] }
 0x594   :  { %v2454_v60 = vsel %vm2453_vm0, %v3875_v56, %v2450_v33  ;;  %v5397_v41 = vadd.f32 %v2485_v6, %v5237_v1  ;;  %v5403_v34 = vadd.f32 %v2486_v40, %v5240_v28  ;;  %v5415_v1 = vld [vmem:[%s5614_s6] ss:$0 sm:$0xff]  ;;  %v3583_v33 = vld [vmem:[%s5615_s7 + $0x10] sm:$0xf] }
 0x595   :  { %v2461_v23 = vmul.f32 %v2454_v60, %v5293_v63  ;;  %v2462_v62 = vmul.f32 %v2454_v60, %v5296_v9 }
 0x597   :  { %v2474_v46 = vmul.f32 %v5355_v4, %v2461_v23  ;;  %v2475_v51 = vmul.f32 %v5357_v12, %v2462_v62  ;;  %v3584_v62 = vor.u32 %v3724_v50, %v3583_v33  ;;  %v3930_v33 = vmov -1.0  }
 0x599   :  { %v2487_v25 = vadd.f32 %v2477_v39, %v2474_v46  ;;  %v2488_v13 = vadd.f32 %v2478_v18, %v2475_v51  ;;  %v3585_v46 = vld [vmem:[%s5615_s7 + $0x18] sm:$0xf0]  ;;  %2899 = vmatpush.bf16.msrb.mxu2 %v3584_v62 }
 0x59a   :  { %v3588_v51 = vor.u32 %v3723_v15, %v3585_v46 }
 0x59b   :  { %v5400_v30 = vadd.f32 %v2487_v25, %v5249_v5  ;;  %v5406_v63 = vadd.f32 %v2488_v13, %v5252_v59 }
 0x59c   :  { %2918 = vmatpush.bf16.msrb.mxu3 %v3588_v51 }
 0x59d   :  { %v2499_v9 = vpack.c.bf16 %v5400_v30, %v5397_v41  ;;  %v2500_v4 = vpack.c.bf16 %v5406_v63, %v5403_v34 }
 0x59f   :  { %2646 = vmatmul.bf16.gmra.mxu0 %v2499_v9  ;;  %2665 = vmatmul.bf16.gmra.mxu1 %v2500_v4  ;;  %v3575_v4 = vld [vmem:[%s5615_s7] sm:$0xf] }
 0x5d7   :  { %v2642_v5 = vpop.f32.mrf.mxu0  ;;  %v2661_v12 = vpop.f32.mrf.mxu1 }
 0x5d8   :  { %v2643_v28 = vadd.f32 %v5415_v1, %v2642_v5  ;;  %v3722_v5 = vld [vmem:[%s5615_s7 + $0x4] sm:$0xf0] }
 0x5da   :  { %v5418_v8 = vadd.f32 %v2661_v12, %v2643_v28  ;;  %v3721_v12 = vld [vmem:[%s5615_s7 + $0x4] sm:$0xf] }
 0x5dc   :  { %v5421_v59 = vmul.f32 0.70710677, %v5418_v8  ;;  %v2671_v46 = vmul.f32 0.5, %v5418_v8 }
 0x5de   :  { %v5424_v39 = vand.u32 2147483647, %v5421_v59  ;;  %vm2679_vm10 = vcmp.ge.f32.partialorder %v5421_v59, 0.0 }
 0x5df   :  { %v2644_v18 = vpop.f32.mrf.mxu0  ;;  %v2663_v26 = vpop.f32.mrf.mxu1 }
 0x5e0   :  { %v2691_v19 = vmul.f32 0.3275911, %v5424_v39  ;;  %v2645_v32 = vadd.f32 %v5415_v1, %v2644_v18  ;;  %v2795_v23 = vsub.f32 0.0, %v5424_v39 }
 0x5e2   :  { %v2695_v16 = vadd.f32 1.0, %v2691_v19  ;;  %v5428_v55 = vadd.f32 %v2663_v26, %v2645_v32  ;;  %v2799_v18 = vmul.f32 %v2795_v23, %v5424_v39  ;;  %v3576_v19 = vor.u32 %v3722_v5, %v3575_v4  ;;  %v3577_v32 = vld [vmem:[%s5615_s7 + $0x8] sm:$0xf0] }
 0x5e4   :  { %3876 = vrcp.f32 %v2695_v16  ;;  %v5431_v57 = vmul.f32 0.70710677, %v5428_v55  ;;  %v2710_v22 = vand.u32 2147483648, %v2695_v16  ;;  %v2708_v29 = vand.u32 2147483647, %v2695_v16  ;;  %2900 = vmatpush.bf16.msrb.mxu2 %v3576_v19 }
 0x5e5   :  { %vm2704_vm3 = vweird.f32 %v2695_v16  ;;  %v2803_v43 = vmul.f32 1.442695, %v2799_v18  ;;  %v2672_v59 = vmul.f32 0.5, %v5428_v55 }
 0x5e6   :  { %v5434_v61 = vand.u32 2147483647, %v5431_v57  ;;  %v2711_v42 = vor.u32 1.1754944e-38, %v2710_v22  ;;  %vm2709_vm5 = vcmp.eq.f32.partialorder %v2708_v29, 8.507059e+37  ;;  %vm2680_vm11 = vcmp.ge.f32.partialorder %v5431_v57, 0.0 }
 0x5e8   :  { %v2692_v21 = vmul.f32 0.3275911, %v5434_v61  ;;  %v2796_v39 = vsub.f32 0.0, %v5434_v61 }
 0x5ea   :  { %v3877_v17 = vpop.eup %3876  ;;  %v5437_v2 = vadd.f32 1.0, %v2692_v21 }
 0x5eb   :  { %v2700_v44 = vmul.f32 %v3877_v17, %v2695_v16  ;;  %vm2705_vm1 = vweird.f32 %v3877_v17  ;;  %v3580_v16 = vor.u32 %v3721_v12, %v3577_v32 }
 0x5ec   :  { %3878 = vrcp.f32 %v5437_v2  ;;  %vm2706_vm4 = vmor %vm2704_vm3, %vm2705_vm1  ;;  %v2723_v25 = vand.u32 2147483647, %v5437_v2  ;;  %v2725_v13 = vand.u32 2147483648, %v5437_v2  ;;  %vm2719_vm7 = vweird.f32 %v5437_v2 }
 0x5ed   :  { %v2701_v35 = vsub.f32 1.0, %v2700_v44  ;;  %2919 = vmatpush.bf16.msrb.mxu3 %v3580_v16  ;;  %3880 = vpow2.f32 %v2803_v43 }
 0x5ee   :  { %vm2724_vm9 = vcmp.eq.f32.partialorder %v2723_v25, 8.507059e+37 }
 0x5ef   :  { %v2702_v0 = vmul.f32 %v3877_v17, %v2701_v35 }
 0x5f1   :  { %v2703_v56 = vadd.f32 %v3877_v17, %v2702_v0 }
 0x5f2   :  { %v3879_v37 = vpop.eup %3878 }
 0x5f3   :  { %v2707_v54 = vsel %vm2706_vm4, %v3877_v17, %v2703_v56  ;;  %v2715_v10 = vmul.f32 %v3879_v37, %v5437_v2  ;;  %vm2720_vm6 = vweird.f32 %v3879_v37  ;;  %v2726_v17 = vor.u32 1.1754944e-38, %v2725_v13  ;;  %v3881_v36 = vpop.eup %3880 }
 0x5f4   :  { %v2712_v20 = vsel %vm2709_vm5, %v2711_v42, %v2707_v54  ;;  %vm2721_vm8 = vmor %vm2719_vm7, %vm2720_vm6  ;;  %v2800_v2 = vmul.f32 %v2796_v39, %v5434_v61  ;;  %v2683_v61 = vsel %vm2679_vm10, 1.0, %v3930_v33 }
 0x5f5   :  { %v2759_v60 = vmul.f32 1.0614054, %v2712_v20  ;;  %v2716_v6 = vsub.f32 1.0, %v2715_v10 }
 0x5f6   :  { %v2805_v11 = vmul.f32 1.442695, %v2800_v2 }
 0x5f7   :  { %v2763_v40 = vadd.f32 -1.4531521, %v2759_v60  ;;  %v2717_v9 = vmul.f32 %v3879_v37, %v2716_v6  ;;  %v2684_v60 = vsel %vm2680_vm11, 1.0, %v3930_v33 }
 0x5f8   :  { %3882 = vpow2.f32 %v2805_v11 }
 0x5f9   :  { %v2767_v28 = vmul.f32 %v2763_v40, %v2712_v20  ;;  %v2718_v26 = vadd.f32 %v3879_v37, %v2717_v9 }
 0x5fb   :  { %v2771_v21 = vadd.f32 1.4214138, %v2767_v28  ;;  %v2722_v44 = vsel %vm2721_vm8, %v3879_v37, %v2718_v26 }
 0x5fc   :  { %v2727_v35 = vsel %vm2724_vm9, %v2726_v17, %v2722_v44 }
 0x5fd   :  { %v2775_v48 = vmul.f32 %v2771_v21, %v2712_v20  ;;  %v2760_v47 = vmul.f32 1.0614054, %v2727_v35 }
 0x5fe   :  { %v3883_v10 = vpop.eup %3882 }
 0x5ff   :  { %v2779_v22 = vadd.f32 -0.28449672, %v2775_v48  ;;  %v2764_v38 = vadd.f32 -1.4531521, %v2760_v47 }
 0x601   :  { %v2783_v49 = vmul.f32 %v2779_v22, %v2712_v20  ;;  %v2768_v0 = vmul.f32 %v2764_v38, %v2727_v35 }
 0x603   :  { %v2787_v29 = vadd.f32 0.2548296, %v2783_v49  ;;  %v2772_v3 = vadd.f32 1.4214138, %v2768_v0 }
 0x605   :  { %v2791_v58 = vmul.f32 %v2787_v29, %v2712_v20  ;;  %v2776_v56 = vmul.f32 %v2772_v3, %v2727_v35 }
 0x607   :  { %v2811_v53 = vmul.f32 %v3881_v36, %v2791_v58  ;;  %v2780_v27 = vadd.f32 -0.28449672, %v2776_v56 }
 0x609   :  { %v2784_v42 = vmul.f32 %v2780_v27, %v2727_v35  ;;  %v2815_v14 = vsub.f32 1.0, %v2811_v53 }
 0x60b   :  { %v2788_v37 = vadd.f32 0.2548296, %v2784_v42  ;;  %v2819_v50 = vmul.f32 %v2815_v14, %v2683_v61 }
 0x60d   :  { %v2792_v54 = vmul.f32 %v2788_v37, %v2727_v35  ;;  %v2823_v23 = vadd.f32 1.0, %v2819_v50 }
 0x60f   :  { %v2812_v20 = vmul.f32 %v3883_v10, %v2792_v54  ;;  %v2827_v51 = vmul.f32 %v2823_v23, %v2671_v46 }
 0x611   :  { %v2816_v15 = vsub.f32 1.0, %v2812_v20 }
 0x613   :  { %v2820_v62 = vmul.f32 %v2816_v15, %v2684_v60 }
 0x615   :  { %v2824_v6 = vadd.f32 1.0, %v2820_v62 }
 0x617   :  { %v2828_v40 = vmul.f32 %v2824_v6, %v2672_v59 }
 0x619   :  { %v2831_v25 = vpack.c.bf16 %v2828_v40, %v2827_v51 }
 0x61b   :  { %3605 = vmatmul.msk.bf16.vlgmr.msrb.gmra.mxu2 %vm2332_vm2, %v2831_v25  ;;  %3607 = vmatmul.msk.bf16.vlgmr.msrb.gmra.mxu3 %vm2332_vm2, %v2831_v25 }
 0x61c   :  { %v2647_v13 = vpop.f32.mrf.mxu0  ;;  %v2666_v57 = vpop.f32.mrf.mxu1 }
 0x61d   :  { %v2648_v9 = vadd.f32 %v5415_v1, %v2647_v13 }
 0x61f   :  { %v5505_v4 = vadd.f32 %v2666_v57, %v2648_v9 }
 0x621   :  { %v5508_v5 = vmul.f32 0.70710677, %v5505_v4 }
 0x623   :  { %v2689_v8 = vand.u32 2147483647, %v5508_v5  ;;  %vm2681_vm5 = vcmp.ge.f32.partialorder %v5508_v5, 0.0 }
 0x624   :  { %v2649_v55 = vpop.f32.mrf.mxu0  ;;  %v2668_v18 = vpop.f32.mrf.mxu1 }
 0x625   :  { %v2693_v12 = vmul.f32 0.3275911, %v2689_v8  ;;  %v2650_v28 = vadd.f32 %v5415_v1, %v2649_v55  ;;  %v2797_v3 = vsub.f32 0.0, %v2689_v8 }
 0x627   :  { %v2697_v19 = vadd.f32 1.0, %v2693_v12  ;;  %v5512_v32 = vadd.f32 %v2668_v18, %v2650_v28  ;;  %v2801_v42 = vmul.f32 %v2797_v3, %v2689_v8 }
 0x629   :  { %3884 = vrcp.f32 %v2697_v19  ;;  %v5515_v26 = vmul.f32 0.70710677, %v5512_v32  ;;  %v2740_v35 = vand.u32 2147483648, %v2697_v19  ;;  %v2738_v1 = vand.u32 2147483647, %v2697_v19 }
 0x62a   :  { %vm2734_vm13 = vweird.f32 %v2697_v19  ;;  %v2807_v50 = vmul.f32 1.442695, %v2801_v42 }
 0x62b   :  { %v2690_v16 = vand.u32 2147483647, %v5515_v26  ;;  %v2741_v22 = vor.u32 1.1754944e-38, %v2740_v35  ;;  %vm2739_vm15 = vcmp.eq.f32.partialorder %v2738_v1, 8.507059e+37  ;;  %vm2682_vm6 = vcmp.ge.f32.partialorder %v5515_v26, 0.0 }
 0x62c   :  { %v2673_v1 = vmul.f32 0.5, %v5505_v4  ;;  %v2841_v26 = vld [vmem:[%s5616_s8] sm:$0x3] }
 0x62d   :  { %v2694_v21 = vmul.f32 0.3275911, %v2690_v16  ;;  %v2798_v15 = vsub.f32 0.0, %v2690_v16 }
 0x62f   :  { %v3885_v17 = vpop.eup %3884  ;;  %v2698_v48 = vadd.f32 1.0, %v2694_v21  ;;  %v2802_v59 = vmul.f32 %v2798_v15, %v2690_v16 }
 0x630   :  { %v2730_v44 = vmul.f32 %v3885_v17, %v2697_v19  ;;  %vm2735_vm12 = vweird.f32 %v3885_v17 }
 0x631   :  { %3886 = vrcp.f32 %v2698_v48  ;;  %vm2736_vm14 = vmor %vm2734_vm13, %vm2735_vm12  ;;  %v2755_v56 = vand.u32 2147483648, %v2698_v48  ;;  %v2753_v53 = vand.u32 2147483647, %v2698_v48  ;;  %vm2749_vm1 = vweird.f32 %v2698_v48 }
 0x632   :  { %v2731_v43 = vsub.f32 1.0, %v2730_v44  ;;  %3888 = vpow2.f32 %v2807_v50  ;;  %v2809_v13 = vmul.f32 1.442695, %v2802_v59 }
 0x633   :  { %v2756_v54 = vor.u32 1.1754944e-38, %v2755_v56  ;;  %vm2754_vm4 = vcmp.eq.f32.partialorder %v2753_v53, 8.507059e+37 }
 0x634   :  { %v2732_v39 = vmul.f32 %v3885_v17, %v2731_v43  ;;  %3890 = vpow2.f32 %v2809_v13  ;;  %v2686_v43 = vsel %vm2682_vm6, 1.0, %v3930_v33 }
 0x636   :  { %v2733_v47 = vadd.f32 %v3885_v17, %v2732_v39 }
 0x637   :  { %v3887_v38 = vpop.eup %3886 }
 0x638   :  { %v2737_v49 = vsel %vm2736_vm14, %v3885_v17, %v2733_v47  ;;  %v2745_v0 = vmul.f32 %v3887_v38, %v2698_v48  ;;  %vm2750_vm0 = vweird.f32 %v3887_v38  ;;  %v3889_v9 = vpop.eup %3888  ;;  %v2685_v17 = vsel %vm2681_vm5, 1.0, %v3930_v33 }
 0x639   :  { %v2742_v2 = vsel %vm2739_vm15, %v2741_v22, %v2737_v49  ;;  %vm2751_vm3 = vmor %vm2749_vm1, %vm2750_vm0  ;;  %v2674_v47 = vmul.f32 0.5, %v5512_v32  ;;  %v2844_v33 = vperm.slane %v2841_v26, 1 }
 0x63a   :  { %v2761_v29 = vmul.f32 1.0614054, %v2742_v2  ;;  %v2746_v58 = vsub.f32 1.0, %v2745_v0  ;;  %v3891_v21 = vpop.eup %3890 }
 0x63c   :  { %v2765_v11 = vadd.f32 -1.4531521, %v2761_v29  ;;  %v2747_v36 = vmul.f32 %v3887_v38, %v2746_v58 }
 0x63e   :  { %v2769_v27 = vmul.f32 %v2765_v11, %v2742_v2  ;;  %v2748_v14 = vadd.f32 %v3887_v38, %v2747_v36 }
 0x640   :  { %v2773_v37 = vadd.f32 1.4214138, %v2769_v27  ;;  %v2752_v10 = vsel %vm2751_vm3, %v3887_v38, %v2748_v14 }
 0x641   :  { %v2757_v20 = vsel %vm2754_vm4, %v2756_v54, %v2752_v10 }
 0x642   :  { %v2777_v61 = vmul.f32 %v2773_v37, %v2742_v2  ;;  %v2762_v60 = vmul.f32 1.0614054, %v2757_v20 }
 0x644   :  { %v2781_v23 = vadd.f32 -0.28449672, %v2777_v61  ;;  %v2766_v62 = vadd.f32 -1.4531521, %v2762_v60 }
 0x646   :  { %v2785_v46 = vmul.f32 %v2781_v23, %v2742_v2  ;;  %v2770_v6 = vmul.f32 %v2766_v62, %v2757_v20 }
 0x648   :  { %v2789_v51 = vadd.f32 0.2548296, %v2785_v46  ;;  %v2774_v40 = vadd.f32 1.4214138, %v2770_v6 }
 0x64a   :  { %v2793_v25 = vmul.f32 %v2789_v51, %v2742_v2  ;;  %v2778_v57 = vmul.f32 %v2774_v40, %v2757_v20  ;;  %v2843_v2 = vperm.slane %v2841_v26, 0 }
 0x64c   :  { %v2813_v8 = vmul.f32 %v3889_v9, %v2793_v25  ;;  %v2782_v55 = vadd.f32 -0.28449672, %v2778_v57 }
 0x64e   :  { %v2786_v12 = vmul.f32 %v2782_v55, %v2757_v20  ;;  %v2817_v28 = vsub.f32 1.0, %v2813_v8 }
 0x650   :  { %v2790_v18 = vadd.f32 0.2548296, %v2786_v12  ;;  %v2821_v16 = vmul.f32 %v2817_v28, %v2685_v17 }
 0x652   :  { %v2794_v19 = vmul.f32 %v2790_v18, %v2757_v20  ;;  %v2825_v35 = vadd.f32 1.0, %v2821_v16 }
 0x654   :  { %v2814_v44 = vmul.f32 %v3891_v21, %v2794_v19  ;;  %v2829_v22 = vmul.f32 %v2825_v35, %v2673_v1 }
 0x656   :  { %v2818_v48 = vsub.f32 1.0, %v2814_v44 }
 0x658   :  { %v2822_v39 = vmul.f32 %v2818_v48, %v2686_v43 }
 0x65a   :  { %v2826_v5 = vadd.f32 1.0, %v2822_v39 }
 0x65c   :  { %v2830_v38 = vmul.f32 %v2826_v5, %v2674_v47 }
 0x65e   :  { %v2832_v49 = vpack.c.bf16 %v2830_v38, %v2829_v22 }
 0x660   :  { %3606 = vmatmul.msk.bf16.gmra.mxu2 %vm2332_vm2, %v2832_v49  ;;  %3608 = vmatmul.msk.bf16.gmra.mxu3 %vm2332_vm2, %v2832_v49 }
 0x69e   :  { %v2902_v0 = vpop.f32.mrf.mxu2  ;;  %v2921_v29 = vpop.f32.mrf.mxu3 }
 0x69f   :  { %v2903_v3 = vadd.f32 %v2902_v0, %v2843_v2  ;;  %v2922_v4 = vadd.f32 %v2921_v29, %v2844_v33 }
 0x6a1   :  { %v2933_v58 = vadd.f32 %v2922_v4, %v2903_v3 }
 0x6a3   :  { %2934 = vadd.xlane.f32.xlu1 %v2933_v58 }
 0x6a6   :  { %v2904_v32 = vpop.f32.mrf.mxu2  ;;  %v2923_v11 = vpop.f32.mrf.mxu3 }
 0x6a7   :  { %v2905_v56 = vadd.f32 %v2904_v32, %v2843_v2  ;;  %v2924_v36 = vadd.f32 %v2923_v11, %v2844_v33  ;;  %v2932_v11 = vld [vmem:[%s5618_s10] sm:$0x3] }
 0x6a9   :  { %v2936_v53 = vadd.f32 %v2924_v36, %v2905_v56 }
 0x6ab   :  { %2937 = vadd.xlane.f32.xlu0 %v2936_v53 }
 0x6e3   :  { %v2907_v27 = vpop.f32.mrf.mxu2  ;;  %v2926_v42 = vpop.f32.mrf.mxu3 }
 0x6e4   :  { %v2908_v14 = vadd.f32 %v2907_v27, %v2843_v2  ;;  %v2927_v37 = vadd.f32 %v2926_v42, %v2844_v33 }
 0x6e6   :  { %v2939_v54 = vadd.f32 %v2927_v37, %v2908_v14 }
 0x6e8   :  { %2940 = vadd.xlane.f32.xlu2 %v2939_v54  ;;  %v5571_v54 = vperm.slane %v2932_v11, 1 }
 0x6eb   :  { %v2909_v10 = vpop.f32.mrf.mxu2  ;;  %v2928_v61 = vpop.f32.mrf.mxu3 }
 0x6ec   :  { %v2910_v50 = vadd.f32 %v2909_v10, %v2843_v2  ;;  %v2929_v20 = vadd.f32 %v2928_v61, %v2844_v33 }
 0x6ee   :  { %v2942_v15 = vadd.f32 %v2929_v20, %v2910_v50 }
 0x6f0   :  { %2943 = vadd.xlane.f32.xlu1 %v2942_v15 }
 0x716   :  { %v2935_v60 = vpop.xlane.xlu1 %2934 }
 0x717   :  { %v2945_v23 = vmul.f32 %v2935_v60, %v5256_v52 }
 0x719   :  { %v2949_v62 = vsub.f32 %v2903_v3, %v2945_v23  ;;  %v2950_v46 = vsub.f32 %v2922_v4, %v2945_v23  ;;  %v2931_v4 = vld [vmem:[%s5617_s9] sm:$0x3]  ;;  %s3931_s9 = smov [#allocation2]  }
 0x71a   :  { %v5565_v53 = vperm.slane %v2931_v4, 0  ;;  %v5567_v27 = vperm.slane %v2931_v4, 1  ;;  %s3079_s10 = sshll.u32 %s3931_s9, 4  ;;  %s3080_s10 = int_to_ptr.vmem [resolvable:$true] %s3079_s10 }
 0x71b   :  { %v2957_v59 = vmul.f32 %v2949_v62, %v2949_v62  ;;  %v2958_v6 = vmul.f32 %v2950_v46, %v2950_v46 }
 0x71d   :  { %v2965_v51 = vadd.f32 %v2958_v6, %v2957_v59 }
 0x71e   :  { %v2938_v40 = vpop.xlane.xlu0 %2937 }
 0x71f   :  { %v2946_v25 = vmul.f32 %v2938_v40, %v5256_v52  ;;  %2966 = vadd.xlane.f32.xlu0 %v2965_v51 }
 0x721   :  { %v5531_v13 = vsub.f32 %v2905_v56, %v2946_v25  ;;  %v5533_v57 = vsub.f32 %v2924_v36, %v2946_v25 }
 0x723   :  { %v2959_v9 = vmul.f32 %v5531_v13, %v5531_v13  ;;  %v2960_v8 = vmul.f32 %v5533_v57, %v5533_v57 }
 0x725   :  { %v2968_v55 = vadd.f32 %v2960_v8, %v2959_v9 }
 0x727   :  { %2969 = vadd.xlane.f32.xlu2 %v2968_v55 }
 0x75b   :  { %v2941_v12 = vpop.xlane.xlu2 %2940 }
 0x75c   :  { %v2947_v28 = vmul.f32 %v2941_v12, %v5256_v52 }
 0x75e   :  { %v5540_v18 = vsub.f32 %v2908_v14, %v2947_v28  ;;  %v5542_v19 = vsub.f32 %v2927_v37, %v2947_v28  ;;  %v5569_v37 = vperm.slane %v2932_v11, 0 }
 0x760   :  { %v2961_v21 = vmul.f32 %v5540_v18, %v5540_v18  ;;  %v2962_v17 = vmul.f32 %v5542_v19, %v5542_v19 }
 0x762   :  { %v2971_v16 = vadd.f32 %v2962_v17, %v2961_v21 }
 0x763   :  { %v2944_v44 = vpop.xlane.xlu1 %2943 }
 0x764   :  { %v2948_v48 = vmul.f32 %v2944_v44, %v5256_v52  ;;  %2972 = vadd.xlane.f32.xlu1 %v2971_v16 }
 0x766   :  { %v5549_v43 = vsub.f32 %v2910_v50, %v2948_v48  ;;  %v5551_v35 = vsub.f32 %v2929_v20, %v2948_v48 }
 0x768   :  { %v2963_v39 = vmul.f32 %v5549_v43, %v5549_v43  ;;  %v2964_v1 = vmul.f32 %v5551_v35, %v5551_v35 }
 0x76a   :  { %v2974_v47 = vadd.f32 %v2964_v1, %v2963_v39 }
 0x76c   :  { %2975 = vadd.xlane.f32.xlu0 %v2974_v47 }
 0x792   :  { %v2967_v5 = vpop.xlane.xlu0 %2966 }
 0x793   :  { %v2977_v22 = vmul.f32 %v2967_v5, %v5256_v52 }
 0x795   :  { %v2981_v38 = vadd.f32 1e-05, %v2977_v22 }
 0x797   :  { %3892 = vrsqrt.f32 %v2981_v38  ;;  %vm2991_vm7 = vweird.f32 %v2981_v38 }
 0x79a   :  { %v2970_v49 = vpop.xlane.xlu2 %2969 }
 0x79b   :  { %v2978_v26 = vmul.f32 %v2970_v49, %v5256_v52 }
 0x79d   :  { %v3893_v2 = vpop.eup %3892  ;;  %v2982_v33 = vadd.f32 1e-05, %v2978_v26 }
 0x79e   :  { %v2986_v0 = vmul.f32 %v3893_v2, %v2981_v38  ;;  %vm2992_vm2 = vweird.f32 %v3893_v2 }
 0x79f   :  { %3894 = vrsqrt.f32 %v2982_v33  ;;  %vm2993_vm8 = vmor %vm2991_vm7, %vm2992_vm2  ;;  %vm3001_vm10 = vweird.f32 %v2982_v33 }
 0x7a0   :  { %v2987_v29 = vmul.f32 %v3893_v2, %v2986_v0 }
 0x7a2   :  { %v2988_v3 = vmul.f32 0.5, %v2987_v29 }
 0x7a4   :  { %v2989_v58 = vsub.f32 1.5, %v2988_v3 }
 0x7a5   :  { %v3895_v32 = vpop.eup %3894 }
 0x7a6   :  { %v2990_v56 = vmul.f32 %v3893_v2, %v2989_v58  ;;  %v2996_v36 = vmul.f32 %v3895_v32, %v2982_v33  ;;  %vm3002_vm9 = vweird.f32 %v3895_v32 }
 0x7a7   :  { %vm3003_vm11 = vmor %vm3001_vm10, %vm3002_vm9 }
 0x7a8   :  { %v2994_v42 = vsel %vm2993_vm8, %v3893_v2, %v2990_v56  ;;  %v2997_v14 = vmul.f32 %v3895_v32, %v2996_v36 }
 0x7a9   :  { %v3025_v10 = vmul.f32 %v2994_v42, %v2949_v62  ;;  %v3026_v61 = vmul.f32 %v2994_v42, %v2950_v46 }
 0x7aa   :  { %v2998_v50 = vmul.f32 0.5, %v2997_v14 }
 0x7ab   :  { %v3038_v20 = vmul.f32 %v5565_v53, %v3025_v10  ;;  %v3039_v15 = vmul.f32 %v5567_v27, %v3026_v61 }
 0x7ac   :  { %v2999_v60 = vsub.f32 1.5, %v2998_v50 }
 0x7ad   :  { %v3051_v23 = vadd.f32 %v5569_v37, %v3038_v20  ;;  %v3052_v59 = vadd.f32 %v5571_v54, %v3039_v15 }
 0x7ae   :  { %v3000_v6 = vmul.f32 %v3895_v32, %v2999_v60 }
 0x7af   :  { %v3059_v51 = vadd.f32 %v3051_v23, %v5371_v45  ;;  %v3060_v40 = vadd.f32 %v3052_v59, %v5377_v31 }
 0x7b0   :  { %v3004_v62 = vsel %vm3003_vm11, %v3895_v32, %v3000_v6 }
 0x7b1   :  { %3067 = vst [vmem:[#allocation2] sm:$0xff] %v3059_v51  ;;  %v3027_v46 = vmul.f32 %v3004_v62, %v5531_v13  ;;  %v3028_v25 = vmul.f32 %v3004_v62, %v5533_v57 }
 0x7b2   :  { %3068 = vst [vmem:[#allocation2 + $0x8] sm:$0xff] %v3060_v40 }
 0x7b3   :  { %v3040_v9 = vmul.f32 %v5565_v53, %v3027_v46  ;;  %v3041_v8 = vmul.f32 %v5567_v27, %v3028_v25 }
 0x7b5   :  { %v3053_v55 = vadd.f32 %v5569_v37, %v3040_v9  ;;  %v3054_v12 = vadd.f32 %v5571_v54, %v3041_v8 }
 0x7b7   :  { %v3061_v45 = vadd.f32 %v3053_v55, %v5374_v7  ;;  %v3062_v31 = vadd.f32 %v3054_v12, %v5380_v24 }
 0x7b9   :  { %3069 = vst [vmem:[#allocation2 + $0x10] sm:$0xff] %v3061_v45 }
 0x7ba   :  { %3070 = vst [vmem:[#allocation2 + $0x18] sm:$0xff] %v3062_v31 }
 0x7d7   :  { %v2973_v28 = vpop.xlane.xlu1 %2972 }
 0x7d8   :  { %v2979_v13 = vmul.f32 %v2973_v28, %v5256_v52 }
 0x7da   :  { %v2983_v21 = vadd.f32 1e-05, %v2979_v13 }
 0x7dc   :  { %3896 = vrsqrt.f32 %v2983_v21  ;;  %vm3011_vm13 = vweird.f32 %v2983_v21 }
 0x7df   :  { %v2976_v57 = vpop.xlane.xlu0 %2975 }
 0x7e0   :  { %v2980_v17 = vmul.f32 %v2976_v57, %v5256_v52 }
 0x7e2   :  { %v3897_v16 = vpop.eup %3896  ;;  %v2984_v44 = vadd.f32 1e-05, %v2980_v17 }
 0x7e3   :  { %v3006_v48 = vmul.f32 %v3897_v16, %v2983_v21  ;;  %vm3012_vm12 = vweird.f32 %v3897_v16 }
 0x7e4   :  { %3898 = vrsqrt.f32 %v2984_v44  ;;  %vm3013_vm14 = vmor %vm3011_vm13, %vm3012_vm12  ;;  %vm3021_vm0 = vweird.f32 %v2984_v44 }
 0x7e5   :  { %v3007_v39 = vmul.f32 %v3897_v16, %v3006_v48 }
 0x7e7   :  { %v3008_v1 = vmul.f32 0.5, %v3007_v39 }
 0x7e9   :  { %v3009_v47 = vsub.f32 1.5, %v3008_v1 }
 0x7ea   :  { %v3899_v7 = vpop.eup %3898 }
 0x7eb   :  { %v3010_v24 = vmul.f32 %v3897_v16, %v3009_v47  ;;  %v3016_v5 = vmul.f32 %v3899_v7, %v2984_v44  ;;  %vm3022_vm15 = vweird.f32 %v3899_v7 }
 0x7ec   :  { %vm3023_vm1 = vmor %vm3021_vm0, %vm3022_vm15 }
 0x7ed   :  { %v3014_v22 = vsel %vm3013_vm14, %v3897_v16, %v3010_v24  ;;  %v3017_v38 = vmul.f32 %v3899_v7, %v3016_v5 }
 0x7ee   :  { %v3029_v49 = vmul.f32 %v3014_v22, %v5540_v18  ;;  %v3030_v26 = vmul.f32 %v3014_v22, %v5542_v19 }
 0x7ef   :  { %v3018_v52 = vmul.f32 0.5, %v3017_v38 }
 0x7f0   :  { %v3042_v2 = vmul.f32 %v5565_v53, %v3029_v49  ;;  %v3043_v33 = vmul.f32 %v5567_v27, %v3030_v26 }
 0x7f1   :  { %v3019_v0 = vsub.f32 1.5, %v3018_v52 }
 0x7f2   :  { %v3055_v29 = vadd.f32 %v5569_v37, %v3042_v2  ;;  %v3056_v3 = vadd.f32 %v5571_v54, %v3043_v33 }
 0x7f3   :  { %v3020_v4 = vmul.f32 %v3899_v7, %v3019_v0 }
 0x7f4   :  { %v3063_v58 = vadd.f32 %v3055_v29, %v5397_v41  ;;  %v3064_v32 = vadd.f32 %v3056_v3, %v5403_v34 }
 0x7f5   :  { %v3024_v18 = vsel %vm3023_vm1, %v3899_v7, %v3020_v4 }
 0x7f6   :  { %3071 = vst [vmem:[#allocation2 + $0x20] sm:$0xff] %v3063_v58  ;;  %v3031_v19 = vmul.f32 %v3024_v18, %v5549_v43  ;;  %v3032_v11 = vmul.f32 %v3024_v18, %v5551_v35 }
 0x7f7   :  { %3072 = vst [vmem:[#allocation2 + $0x28] sm:$0xff] %v3064_v32 }
 0x7f8   :  { %v3044_v56 = vmul.f32 %v5565_v53, %v3031_v19  ;;  %v3045_v36 = vmul.f32 %v5567_v27, %v3032_v11 }
 0x7fa   :  { %v3057_v41 = vadd.f32 %v5569_v37, %v3044_v56  ;;  %v3058_v34 = vadd.f32 %v5571_v54, %v3045_v36 }
 0x7fc   :  { %v3065_v42 = vadd.f32 %v3057_v41, %v5400_v30  ;;  %v3066_v43 = vadd.f32 %v3058_v34, %v5406_v63 }
 0x7fe   :  { %3073 = vst [vmem:[#allocation2 + $0x30] sm:$0xff] %v3065_v42 }
 0x7ff   :  { %3074 = vst [vmem:[#allocation2 + $0x38] sm:$0xff] %v3066_v43 }
 0x800   :  { %3087 = dma.vmem_to_hbm [thread:$0]  %s3080_s10, 1024, %s3082_s13, [#allocation3], %s3932_s14, %s3932_s14, %s3933_s15  }
 0x801   :  { %3924 = dma.done.wait [#allocation3], 1024  }
 0x802   :  { %3925 = vsyncadd [#allocation3], 4294966272 }
 0x803   :  { %3092 = vsyncpa [#allocation3], 1 }

</bundles_post_ra>
